<compile_context>
chip_gen: v6e
topology: v6e:2x2x1
jax: 0.10.0
libtpu: 0.0.40
codegen_flags: <defaults>
</compile_context>

<pallas_src>
import functools
import math

import numpy as np

import jax
import jax.numpy as jnp
from jax.experimental import pallas as pl
from jax.experimental.pallas import tpu as pltpu

LN_EPS = 1e-5  # PyTorch nn.LayerNorm default eps


# --------------------------- static head-block masks ------------------------

def _block_diag_masks(n_heads, head_dim, t_kv):
    """Static masks for the block-diagonal multi-head attention formulation.

    mask_bd (nh*t_kv, H): keeps column c of the tiled K/V copy h only when
        c // head_dim == h, turning `tile(K, nh) * mask_bd` into a
        block-diagonal operand.
    seg     (nh*t_kv, nh*t_kv): block-sum matrix; exp_scores @ seg broadcasts
        each head's softmax denominator across that head's columns (MXU work,
        no cross-lane reductions per head).
    """
    row_head = np.arange(n_heads * t_kv)[:, None] // t_kv
    col_head_feat = np.arange(n_heads * head_dim)[None, :] // head_dim
    mask_bd = (row_head == col_head_feat).astype(np.float32)
    col_head_kv = np.arange(n_heads * t_kv)[None, :] // t_kv
    seg = (row_head == col_head_kv).astype(np.float32)
    return jnp.asarray(mask_bd), jnp.asarray(seg)


# ------------------------------ fused kernel -------------------------------

def _decoder_fwd_kernel(
    trg_ref, src_ref,
    mask_s_ref, seg_s_ref, mask_c_ref, seg_c_ref,
    ft_w_ref, ft_b_ref,
    ln_g_ref, ln_b_ref,
    sa_wq_ref, sa_bq_ref, sa_wk_ref, sa_bk_ref, sa_wv_ref, sa_bv_ref,
    sa_wo_ref, sa_bo_ref,
    ea_wq_ref, ea_bq_ref, ea_wk_ref, ea_bk_ref, ea_wv_ref, ea_bv_ref,
    ea_wo_ref, ea_bo_ref,
    pf_w1_ref, pf_b1_ref, pf_w2_ref, pf_b2_ref,
    fc1_w_ref, fc1_b_ref, fc2_w_ref, fc2_b_ref,
    out_ref,
    *, n_layers):
    f32 = jnp.float32

    def layer_norm(y, g, b):
        mu = jnp.mean(y, axis=-1, keepdims=True)
        d = y - mu
        var = jnp.mean(d * d, axis=-1, keepdims=True)
        return d * jax.lax.rsqrt(var + LN_EPS) * g + b

    def mha(q_in, kv_in, wq, bq, wk, bk, wv, bv, wo, bo, mask_bd, seg):
        """All heads at once via block-diagonal K/V; no per-head loop,
        no sub-128 lane slices.  1/sqrt(hd) is already folded into wq/bq."""
        nrep = mask_bd.shape[0] // kv_in.shape[0]
        q = jnp.dot(q_in, wq, preferred_element_type=f32) + bq       # (Tq, H)
        k = jnp.dot(kv_in, wk, preferred_element_type=f32) + bk      # (Tk, H)
        v = jnp.dot(kv_in, wv, preferred_element_type=f32) + bv      # (Tk, H)
        # Sublane-tile K/V nh times and zero the off-head feature columns ->
        # block-diagonal operands (cheap vreg copies + VPU mask multiply).
        kbd = jnp.concatenate([k] * nrep, axis=0) * mask_bd          # (nh*Tk, H)
        vbd = jnp.concatenate([v] * nrep, axis=0) * mask_bd          # (nh*Tk, H)
        # All heads' scores in one lane-aligned matmul.
        s = jnp.dot(q, kbd.T, preferred_element_type=f32)            # (Tq, nh*Tk)
        # Shared per-row max is a valid (mathematically exact) shift for every
        # head's softmax; per-head sums come from one MXU matmul with `seg`.
        # (Assumes per-row head-score spreads stay << 80 so no block fully
        #  underflows -- true for LayerNorm'ed activations at this scale.)
        m = jnp.max(s, axis=-1, keepdims=True)
        e = jnp.exp(s - m)
        denom = jnp.dot(e, seg, preferred_element_type=f32)          # (Tq, nh*Tk)
        p = e * pl.reciprocal(denom, approx=True)
        o = jnp.dot(p, vbd, preferred_element_type=f32)              # (Tq, H), heads concatenated
        return jnp.dot(o, wo, preferred_element_type=f32) + bo

    # atom-feature projection for this batch element: (T, A) @ (A, H)
    x = jnp.dot(trg_ref[...], ft_w_ref[...],
                preferred_element_type=f32) + ft_b_ref[...]
    src = src_ref[...]                                               # (S, H)
    mask_s = mask_s_ref[...]
    seg_s = seg_s_ref[...]
    mask_c = mask_c_ref[...]
    seg_c = seg_c_ref[...]

    for l in range(n_layers):   # static unroll; fine at L=2 (see module TODO)
        g = ln_g_ref[l]                                              # (1, H)
        be = ln_b_ref[l]                                             # (1, H)

        # ---- self attention ----
        sa = mha(x, x,
                 sa_wq_ref[l], sa_bq_ref[l], sa_wk_ref[l], sa_bk_ref[l],
                 sa_wv_ref[l], sa_bv_ref[l], sa_wo_ref[l], sa_bo_ref[l],
                 mask_s, seg_s)
        x = layer_norm(x + sa, g, be)

        # ---- cross attention over src ----
        ea = mha(x, src,
                 ea_wq_ref[l], ea_bq_ref[l], ea_wk_ref[l], ea_bk_ref[l],
                 ea_wv_ref[l], ea_bv_ref[l], ea_wo_ref[l], ea_bo_ref[l],
                 mask_c, seg_c)
        x = layer_norm(x + ea, g, be)

        # ---- positionwise feedforward (Conv1d k=1 == per-position linear) ----
        h1 = jnp.maximum(
            jnp.dot(x, pf_w1_ref[l], preferred_element_type=f32) + pf_b1_ref[l],
            0.0)
        ff = jnp.dot(h1, pf_w2_ref[l], preferred_element_type=f32) + pf_b2_ref[l]
        x = layer_norm(x + ff, g, be)

    # ---- norm-softmax pooling over atoms, then the 2-layer MLP head ----
    nrm = jnp.sqrt(jnp.sum(x * x, axis=-1, keepdims=True))           # (T, 1)
    mx = jnp.max(nrm, axis=0, keepdims=True)
    e = jnp.exp(nrm - mx)
    w = e * pl.reciprocal(jnp.sum(e, axis=0, keepdims=True), approx=True)
    pooled = jnp.sum(x * w, axis=0, keepdims=True)                   # (1, H)
    h = jnp.maximum(
        jnp.dot(pooled, fc1_w_ref[...], preferred_element_type=f32)
        + fc1_b_ref[...], 0.0)                                       # (1, 256)
    out_ref[...] = jnp.dot(h, fc2_w_ref[...],
                           preferred_element_type=f32) + fc2_b_ref[...]


def decoder_forward(trg, src, params, n_heads):
    B, T, A = trg.shape
    S = src.shape[1]
    H = params["ft_w"].shape[1]
    L = params["sa_wq"].shape[0]
    PF = params["pf_w1"].shape[2]
    hd = H // n_heads

    mask_s, seg_s = _block_diag_masks(n_heads, hd, T)
    mask_c, seg_c = _block_diag_masks(n_heads, hd, S)

    weight_ops = [
        mask_s, seg_s, mask_c, seg_c,
        params["ft_w"], params["ft_b"],
        params["ln_g"], params["ln_b"],
        params["sa_wq_s"], params["sa_bq_s"], params["sa_wk"], params["sa_bk"],
        params["sa_wv"], params["sa_bv"], params["sa_wo"], params["sa_bo"],
        params["ea_wq_s"], params["ea_bq_s"], params["ea_wk"], params["ea_bk"],
        params["ea_wv"], params["ea_bv"], params["ea_wo"], params["ea_bo"],
        params["pf_w1"], params["pf_b1"], params["pf_w2"], params["pf_b2"],
        params["fc1_w"], params["fc1_b"], params["fc2_w"], params["fc2_b"],
    ]

    def resident(arr):
        # Full-array block, constant index_map -> DMA'd once, VMEM-resident
        # across all grid steps (blocked specs default to VMEM placement).
        zeros = (0,) * arr.ndim
        return pl.BlockSpec(arr.shape, lambda b, _z=zeros: _z)

    in_specs = [
        # one batch element per grid step; leading (batch) dim squeezed away
        pl.BlockSpec((None, T, A), lambda b: (b, 0, 0)),
        pl.BlockSpec((None, S, H), lambda b: (b, 0, 0)),
    ] + [resident(w) for w in weight_ops]

    # Advisory cost estimate for the XLA scheduler around the custom call.
    nT, nS = n_heads * T, n_heads * S
    per_layer_macs = (6 * T * H * H + 2 * S * H * H
                      + 2 * T * nT * H + T * nT * nT
                      + 2 * T * nS * H + T * nS * nS
                      + 2 * T * H * PF)
    flops = 2 * B * (T * A * H + L * per_layer_macs + H * 256 + 256)
    transcendentals = B * (L * T * (nT + nS) + T)
    bytes_accessed = int(sum(int(x.size) * x.dtype.itemsize
                             for x in [trg, src] + weight_ops) + B * 4)

    kernel = functools.partial(_decoder_fwd_kernel, n_layers=L)
    out = pl.pallas_call(
        kernel,
        out_shape=jax.ShapeDtypeStruct((B, 1, 1), jnp.float32),
        grid_spec=pltpu.PrefetchScalarGridSpec(
            num_scalar_prefetch=0,
            grid=(B,),                       # megacore: batches split across TCs on v7x
            in_specs=in_specs,
            out_specs=pl.BlockSpec((None, 1, 1), lambda b: (b, 0, 0)),
        ),
        compiler_params=pltpu.CompilerParams(
            dimension_semantics=("parallel",),
            vmem_limit_bytes=32 * 1024 * 1024),
        cost_estimate=pl.CostEstimate(flops=int(flops),
                                      transcendentals=int(transcendentals),
                                      bytes_accessed=bytes_accessed),
    )(trg, src, *weight_ops)
    return out.reshape(B, 1)


# ------------------------- pure-JAX reference model -------------------------

def decoder_reference(trg, src, params, n_heads):
    H = params["ft_w"].shape[1]
    hd = H // n_heads
    scale = math.sqrt(hd)

    def ln(y, g, b):
        mu = jnp.mean(y, axis=-1, keepdims=True)
        var = jnp.mean((y - mu) ** 2, axis=-1, keepdims=True)
        return (y - mu) / jnp.sqrt(var + LN_EPS) * g + b

    def attn(q_in, kv_in, wq, bq, wk, bk, wv, bv, wo, bo):
        q = q_in @ wq + bq
        k = kv_in @ wk + bk
        v = kv_in @ wv + bv

        def split(z):
            return z.reshape(z.shape[0], z.shape[1], n_heads, hd).transpose(0, 2, 1, 3)

        qh, kh, vh = split(q), split(k), split(v)
        s = jnp.einsum("bhtd,bhsd->bhts", qh, kh) / scale
        p = jax.nn.softmax(s, axis=-1)
        o = jnp.einsum("bhts,bhsd->bhtd", p, vh)
        o = o.transpose(0, 2, 1, 3).reshape(q_in.shape[0], q_in.shape[1], H)
        return o @ wo + bo

    x = trg @ params["ft_w"] + params["ft_b"][0]
    L = params["sa_wq"].shape[0]
    for l in range(L):
        g, be = params["ln_g"][l, 0], params["ln_b"][l, 0]
        sa = attn(x, x,
                  params["sa_wq"][l], params["sa_bq"][l, 0],
                  params["sa_wk"][l], params["sa_bk"][l, 0],
                  params["sa_wv"][l], params["sa_bv"][l, 0],
                  params["sa_wo"][l], params["sa_bo"][l, 0])
        x = ln(x + sa, g, be)
        ea = attn(x, src,
                  params["ea_wq"][l], params["ea_bq"][l, 0],
                  params["ea_wk"][l], params["ea_bk"][l, 0],
                  params["ea_wv"][l], params["ea_bv"][l, 0],
                  params["ea_wo"][l], params["ea_bo"][l, 0])
        x = ln(x + ea, g, be)
        h1 = jax.nn.relu(x @ params["pf_w1"][l] + params["pf_b1"][l, 0])
        ff = h1 @ params["pf_w2"][l] + params["pf_b2"][l, 0]
        x = ln(x + ff, g, be)

    nrm = jnp.linalg.norm(x, axis=2)
    w = jax.nn.softmax(nrm, axis=1)
    pooled = jnp.sum(x * w[:, :, None], axis=1)
    h = jax.nn.relu(pooled @ params["fc1_w"] + params["fc1_b"][0])
    return h @ params["fc2_w"] + params["fc2_b"][0]


# ----------------------------- parameter init ------------------------------

def _dense_init(key, fan_in, fan_out):
    kw, kb = jax.random.split(key)
    bound = 1.0 / math.sqrt(fan_in)
    w = jax.random.uniform(kw, (fan_in, fan_out), jnp.float32, -bound, bound)
    b = jax.random.uniform(kb, (fan_out,), jnp.float32, -bound, bound)
    return w, b


def init_params(key, atom_dim, hid_dim, n_layers, pf_dim, n_heads):
    keys = iter(jax.random.split(key, 3 + 10 * n_layers))
    p = {}
    w, b = _dense_init(next(keys), atom_dim, hid_dim)
    p["ft_w"], p["ft_b"] = w, b.reshape(1, hid_dim)

    names = ("ln_g", "ln_b",
             "sa_wq", "sa_bq", "sa_wk", "sa_bk", "sa_wv", "sa_bv", "sa_wo", "sa_bo",
             "ea_wq", "ea_bq", "ea_wk", "ea_bk", "ea_wv", "ea_bv", "ea_wo", "ea_bo",
             "pf_w1", "pf_b1", "pf_w2", "pf_b2")
    per_layer = {k: [] for k in names}
    for _ in range(n_layers):
        per_layer["ln_g"].append(jnp.ones((1, hid_dim), jnp.float32))
        per_layer["ln_b"].append(jnp.zeros((1, hid_dim), jnp.float32))
        for pre in ("sa", "ea"):
            for nm in ("q", "k", "v", "o"):
                w, b = _dense_init(next(keys), hid_dim, hid_dim)
                per_layer[f"{pre}_w{nm}"].append(w)
                per_layer[f"{pre}_b{nm}"].append(b.reshape(1, hid_dim))
        w1, b1 = _dense_init(next(keys), hid_dim, pf_dim)
        w2, b2 = _dense_init(next(keys), pf_dim, hid_dim)
        per_layer["pf_w1"].append(w1)
        per_layer["pf_b1"].append(b1.reshape(1, pf_dim))
        per_layer["pf_w2"].append(w2)
        per_layer["pf_b2"].append(b2.reshape(1, hid_dim))
    p.update({k: jnp.stack(v, axis=0) for k, v in per_layer.items()})

    w, b = _dense_init(next(keys), hid_dim, 256)
    p["fc1_w"], p["fc1_b"] = w, b.reshape(1, 256)
    w, b = _dense_init(next(keys), 256, 1)
    p["fc2_w"], p["fc2_b"] = w, b.reshape(1, 1)

    # Fold the 1/sqrt(head_dim) attention scale into the Q projections once at
    # init (one-time host cost); the kernel never multiplies by it.
    inv_scale = 1.0 / math.sqrt(hid_dim // n_heads)
    for pre in ("sa", "ea"):
        p[f"{pre}_wq_s"] = p[f"{pre}_wq"] * inv_scale
        p[f"{pre}_bq_s"] = p[f"{pre}_bq"] * inv_scale
    return p


# ---------------------------------- main -----------------------------------

if __name__ == "__main__":
    B, T, S = 2, 8, 16                 # batch, compound atoms, protein length
    ATOM, HID, NLAYERS, NHEADS, PF = 16, 32, 2, 4, 64

    key = jax.random.PRNGKey(0)
    kp, kt, ks = jax.random.split(key, 3)
    params = init_params(kp, ATOM, HID, NLAYERS, PF, NHEADS)
    trg = jax.random.normal(kt, (B, T, ATOM), jnp.float32)
    src = jax.random.normal(ks, (B, S, HID), jnp.float32)

    out = jax.block_until_ready(decoder_forward(trg, src, params, NHEADS))
    assert out.shape == (B, 1) and out.dtype == jnp.float32

    ref = jax.block_until_ready(decoder_reference(trg, src, params, NHEADS))
    # pl.reciprocal(approx=True) perturbs the softmax normalizations by
    # O(1e-4) relative; 5e-3 leaves comfortable margin.
    assert jnp.allclose(out, ref, atol=5e-3, rtol=5e-3), (out, ref)
    print("KERNEL_OK")
</pallas_src>

<mosaic_0001>
module attributes {stable_mosaic.version = 11 : i64} {
  func.func @_decoder_fwd_kernel(%arg0: i32, %arg1: memref<1x8x16xf32, #tpu.memory_space<vmem>>, %arg2: memref<1x16x32xf32, #tpu.memory_space<vmem>>, %arg3: memref<32x32xf32, #tpu.memory_space<vmem>>, %arg4: memref<32x32xf32, #tpu.memory_space<vmem>>, %arg5: memref<64x32xf32, #tpu.memory_space<vmem>>, %arg6: memref<64x64xf32, #tpu.memory_space<vmem>>, %arg7: memref<16x32xf32, #tpu.memory_space<vmem>>, %arg8: memref<1x32xf32, #tpu.memory_space<vmem>>, %arg9: memref<2x1x32xf32, #tpu.memory_space<vmem>>, %arg10: memref<2x1x32xf32, #tpu.memory_space<vmem>>, %arg11: memref<2x32x32xf32, #tpu.memory_space<vmem>>, %arg12: memref<2x1x32xf32, #tpu.memory_space<vmem>>, %arg13: memref<2x32x32xf32, #tpu.memory_space<vmem>>, %arg14: memref<2x1x32xf32, #tpu.memory_space<vmem>>, %arg15: memref<2x32x32xf32, #tpu.memory_space<vmem>>, %arg16: memref<2x1x32xf32, #tpu.memory_space<vmem>>, %arg17: memref<2x32x32xf32, #tpu.memory_space<vmem>>, %arg18: memref<2x1x32xf32, #tpu.memory_space<vmem>>, %arg19: memref<2x32x32xf32, #tpu.memory_space<vmem>>, %arg20: memref<2x1x32xf32, #tpu.memory_space<vmem>>, %arg21: memref<2x32x32xf32, #tpu.memory_space<vmem>>, %arg22: memref<2x1x32xf32, #tpu.memory_space<vmem>>, %arg23: memref<2x32x32xf32, #tpu.memory_space<vmem>>, %arg24: memref<2x1x32xf32, #tpu.memory_space<vmem>>, %arg25: memref<2x32x32xf32, #tpu.memory_space<vmem>>, %arg26: memref<2x1x32xf32, #tpu.memory_space<vmem>>, %arg27: memref<2x32x64xf32, #tpu.memory_space<vmem>>, %arg28: memref<2x1x64xf32, #tpu.memory_space<vmem>>, %arg29: memref<2x64x32xf32, #tpu.memory_space<vmem>>, %arg30: memref<2x1x32xf32, #tpu.memory_space<vmem>>, %arg31: memref<32x256xf32, #tpu.memory_space<vmem>>, %arg32: memref<1x256xf32, #tpu.memory_space<vmem>>, %arg33: memref<256x1xf32, #tpu.memory_space<vmem>>, %arg34: memref<1x1xf32, #tpu.memory_space<vmem>>, %arg35: memref<1x1x1xf32, #tpu.memory_space<vmem>>) attributes {dimension_semantics = [#tpu.dimension_semantics<parallel>], iteration_bounds = array<i64: 2>, scalar_prefetch = 0 : i64, scratch_operands = 0 : i64, tpu.core_type = #tpu.core_type<tc>, window_params = [{transform_indices = @transform_0, window_bounds = array<i64: 1, 8, 16>}, {transform_indices = @transform_1, window_bounds = array<i64: 1, 16, 32>}, {pipeline_mode = #tpu.pipeline_mode<synchronous>, transform_indices = @transform_2, window_bounds = array<i64: 32, 32>}, {pipeline_mode = #tpu.pipeline_mode<synchronous>, transform_indices = @transform_3, window_bounds = array<i64: 32, 32>}, {pipeline_mode = #tpu.pipeline_mode<synchronous>, transform_indices = @transform_4, window_bounds = array<i64: 64, 32>}, {pipeline_mode = #tpu.pipeline_mode<synchronous>, transform_indices = @transform_5, window_bounds = array<i64: 64, 64>}, {pipeline_mode = #tpu.pipeline_mode<synchronous>, transform_indices = @transform_6, window_bounds = array<i64: 16, 32>}, {pipeline_mode = #tpu.pipeline_mode<synchronous>, transform_indices = @transform_7, window_bounds = array<i64: 1, 32>}, {pipeline_mode = #tpu.pipeline_mode<synchronous>, transform_indices = @transform_8, window_bounds = array<i64: 2, 1, 32>}, {pipeline_mode = #tpu.pipeline_mode<synchronous>, transform_indices = @transform_9, window_bounds = array<i64: 2, 1, 32>}, {pipeline_mode = #tpu.pipeline_mode<synchronous>, transform_indices = @transform_10, window_bounds = array<i64: 2, 32, 32>}, {pipeline_mode = #tpu.pipeline_mode<synchronous>, transform_indices = @transform_11, window_bounds = array<i64: 2, 1, 32>}, {pipeline_mode = #tpu.pipeline_mode<synchronous>, transform_indices = @transform_12, window_bounds = array<i64: 2, 32, 32>}, {pipeline_mode = #tpu.pipeline_mode<synchronous>, transform_indices = @transform_13, window_bounds = array<i64: 2, 1, 32>}, {pipeline_mode = #tpu.pipeline_mode<synchronous>, transform_indices = @transform_14, window_bounds = array<i64: 2, 32, 32>}, {pipeline_mode = #tpu.pipeline_mode<synchronous>, transform_indices = @transform_15, window_bounds = array<i64: 2, 1, 32>}, {pipeline_mode = #tpu.pipeline_mode<synchronous>, transform_indices = @transform_16, window_bounds = array<i64: 2, 32, 32>}, {pipeline_mode = #tpu.pipeline_mode<synchronous>, transform_indices = @transform_17, window_bounds = array<i64: 2, 1, 32>}, {pipeline_mode = #tpu.pipeline_mode<synchronous>, transform_indices = @transform_18, window_bounds = array<i64: 2, 32, 32>}, {pipeline_mode = #tpu.pipeline_mode<synchronous>, transform_indices = @transform_19, window_bounds = array<i64: 2, 1, 32>}, {pipeline_mode = #tpu.pipeline_mode<synchronous>, transform_indices = @transform_20, window_bounds = array<i64: 2, 32, 32>}, {pipeline_mode = #tpu.pipeline_mode<synchronous>, transform_indices = @transform_21, window_bounds = array<i64: 2, 1, 32>}, {pipeline_mode = #tpu.pipeline_mode<synchronous>, transform_indices = @transform_22, window_bounds = array<i64: 2, 32, 32>}, {pipeline_mode = #tpu.pipeline_mode<synchronous>, transform_indices = @transform_23, window_bounds = array<i64: 2, 1, 32>}, {pipeline_mode = #tpu.pipeline_mode<synchronous>, transform_indices = @transform_24, window_bounds = array<i64: 2, 32, 32>}, {pipeline_mode = #tpu.pipeline_mode<synchronous>, transform_indices = @transform_25, window_bounds = array<i64: 2, 1, 32>}, {pipeline_mode = #tpu.pipeline_mode<synchronous>, transform_indices = @transform_26, window_bounds = array<i64: 2, 32, 64>}, {pipeline_mode = #tpu.pipeline_mode<synchronous>, transform_indices = @transform_27, window_bounds = array<i64: 2, 1, 64>}, {pipeline_mode = #tpu.pipeline_mode<synchronous>, transform_indices = @transform_28, window_bounds = array<i64: 2, 64, 32>}, {pipeline_mode = #tpu.pipeline_mode<synchronous>, transform_indices = @transform_29, window_bounds = array<i64: 2, 1, 32>}, {pipeline_mode = #tpu.pipeline_mode<synchronous>, transform_indices = @transform_30, window_bounds = array<i64: 32, 256>}, {pipeline_mode = #tpu.pipeline_mode<synchronous>, transform_indices = @transform_31, window_bounds = array<i64: 1, 256>}, {pipeline_mode = #tpu.pipeline_mode<synchronous>, transform_indices = @transform_32, window_bounds = array<i64: 256, 1>}, {pipeline_mode = #tpu.pipeline_mode<synchronous>, transform_indices = @transform_33, window_bounds = array<i64: 1, 1>}, {transform_indices = @transform_34, window_bounds = array<i64: 1, 1, 1>}]} {
    %c0 = arith.constant 0 : index
    %c0_0 = arith.constant 0 : index
    %c0_1 = arith.constant 0 : index
    %0 = vector.load %arg1[%c0, %c0_0, %c0_1] : memref<1x8x16xf32, #tpu.memory_space<vmem>>, vector<1x8x16xf32>
    %1 = vector.shape_cast %0 : vector<1x8x16xf32> to vector<8x16xf32>
    %c0_2 = arith.constant 0 : index
    %c0_3 = arith.constant 0 : index
    %2 = vector.load %arg7[%c0_2, %c0_3] : memref<16x32xf32, #tpu.memory_space<vmem>>, vector<16x32xf32>
    %cst = arith.constant dense<0.000000e+00> : vector<8x32xf32>
    %3 = tpu.matmul %1, %2, %cst {dimension_numbers = #tpu.dot_dimension_numbers<[1], [0], [0], [1], [0, 0, 1, 1], [], []>} : vector<8x16xf32>, vector<16x32xf32>, vector<8x32xf32> -> vector<8x32xf32>
    %c0_4 = arith.constant 0 : index
    %c0_5 = arith.constant 0 : index
    %4 = vector.load %arg8[%c0_4, %c0_5] : memref<1x32xf32, #tpu.memory_space<vmem>>, vector<1x32xf32>
    %5 = vector.broadcast %4 : vector<1x32xf32> to vector<8x32xf32>
    %6 = arith.addf %3, %5 : vector<8x32xf32>
    %c0_6 = arith.constant 0 : index
    %c0_7 = arith.constant 0 : index
    %c0_8 = arith.constant 0 : index
    %7 = vector.load %arg2[%c0_6, %c0_7, %c0_8] : memref<1x16x32xf32, #tpu.memory_space<vmem>>, vector<1x16x32xf32>
    %8 = vector.shape_cast %7 : vector<1x16x32xf32> to vector<16x32xf32>
    %c0_9 = arith.constant 0 : index
    %c0_10 = arith.constant 0 : index
    %9 = vector.load %arg3[%c0_9, %c0_10] : memref<32x32xf32, #tpu.memory_space<vmem>>, vector<32x32xf32>
    %c0_11 = arith.constant 0 : index
    %c0_12 = arith.constant 0 : index
    %10 = vector.load %arg4[%c0_11, %c0_12] : memref<32x32xf32, #tpu.memory_space<vmem>>, vector<32x32xf32>
    %c0_13 = arith.constant 0 : index
    %c0_14 = arith.constant 0 : index
    %11 = vector.load %arg5[%c0_13, %c0_14] : memref<64x32xf32, #tpu.memory_space<vmem>>, vector<64x32xf32>
    %c0_15 = arith.constant 0 : index
    %c0_16 = arith.constant 0 : index
    %12 = vector.load %arg6[%c0_15, %c0_16] : memref<64x64xf32, #tpu.memory_space<vmem>>, vector<64x64xf32>
    %c0_17 = arith.constant 0 : index
    %c0_18 = arith.constant 0 : index
    %c0_19 = arith.constant 0 : index
    %13 = vector.load %arg9[%c0_17, %c0_18, %c0_19] : memref<2x1x32xf32, #tpu.memory_space<vmem>>, vector<1x1x32xf32>
    %14 = vector.shape_cast %13 : vector<1x1x32xf32> to vector<1x32xf32>
    %c0_20 = arith.constant 0 : index
    %c0_21 = arith.constant 0 : index
    %c0_22 = arith.constant 0 : index
    %15 = vector.load %arg10[%c0_20, %c0_21, %c0_22] : memref<2x1x32xf32, #tpu.memory_space<vmem>>, vector<1x1x32xf32>
    %16 = vector.shape_cast %15 : vector<1x1x32xf32> to vector<1x32xf32>
    %c0_23 = arith.constant 0 : index
    %c0_24 = arith.constant 0 : index
    %c0_25 = arith.constant 0 : index
    %17 = vector.load %arg11[%c0_23, %c0_24, %c0_25] : memref<2x32x32xf32, #tpu.memory_space<vmem>>, vector<1x32x32xf32>
    %18 = vector.shape_cast %17 : vector<1x32x32xf32> to vector<32x32xf32>
    %c0_26 = arith.constant 0 : index
    %c0_27 = arith.constant 0 : index
    %c0_28 = arith.constant 0 : index
    %19 = vector.load %arg12[%c0_26, %c0_27, %c0_28] : memref<2x1x32xf32, #tpu.memory_space<vmem>>, vector<1x1x32xf32>
    %20 = vector.shape_cast %19 : vector<1x1x32xf32> to vector<1x32xf32>
    %c0_29 = arith.constant 0 : index
    %c0_30 = arith.constant 0 : index
    %c0_31 = arith.constant 0 : index
    %21 = vector.load %arg13[%c0_29, %c0_30, %c0_31] : memref<2x32x32xf32, #tpu.memory_space<vmem>>, vector<1x32x32xf32>
    %22 = vector.shape_cast %21 : vector<1x32x32xf32> to vector<32x32xf32>
    %c0_32 = arith.constant 0 : index
    %c0_33 = arith.constant 0 : index
    %c0_34 = arith.constant 0 : index
    %23 = vector.load %arg14[%c0_32, %c0_33, %c0_34] : memref<2x1x32xf32, #tpu.memory_space<vmem>>, vector<1x1x32xf32>
    %24 = vector.shape_cast %23 : vector<1x1x32xf32> to vector<1x32xf32>
    %c0_35 = arith.constant 0 : index
    %c0_36 = arith.constant 0 : index
    %c0_37 = arith.constant 0 : index
    %25 = vector.load %arg15[%c0_35, %c0_36, %c0_37] : memref<2x32x32xf32, #tpu.memory_space<vmem>>, vector<1x32x32xf32>
    %26 = vector.shape_cast %25 : vector<1x32x32xf32> to vector<32x32xf32>
    %c0_38 = arith.constant 0 : index
    %c0_39 = arith.constant 0 : index
    %c0_40 = arith.constant 0 : index
    %27 = vector.load %arg16[%c0_38, %c0_39, %c0_40] : memref<2x1x32xf32, #tpu.memory_space<vmem>>, vector<1x1x32xf32>
    %28 = vector.shape_cast %27 : vector<1x1x32xf32> to vector<1x32xf32>
    %c0_41 = arith.constant 0 : index
    %c0_42 = arith.constant 0 : index
    %c0_43 = arith.constant 0 : index
    %29 = vector.load %arg17[%c0_41, %c0_42, %c0_43] : memref<2x32x32xf32, #tpu.memory_space<vmem>>, vector<1x32x32xf32>
    %30 = vector.shape_cast %29 : vector<1x32x32xf32> to vector<32x32xf32>
    %c0_44 = arith.constant 0 : index
    %c0_45 = arith.constant 0 : index
    %c0_46 = arith.constant 0 : index
    %31 = vector.load %arg18[%c0_44, %c0_45, %c0_46] : memref<2x1x32xf32, #tpu.memory_space<vmem>>, vector<1x1x32xf32>
    %32 = vector.shape_cast %31 : vector<1x1x32xf32> to vector<1x32xf32>
    %cst_47 = arith.constant dense<0.000000e+00> : vector<8x32xf32>
    %33 = tpu.matmul %6, %18, %cst_47 {dimension_numbers = #tpu.dot_dimension_numbers<[1], [0], [0], [1], [0, 0, 1, 1], [], []>} : vector<8x32xf32>, vector<32x32xf32>, vector<8x32xf32> -> vector<8x32xf32>
    %34 = vector.broadcast %20 : vector<1x32xf32> to vector<8x32xf32>
    %35 = arith.addf %33, %34 : vector<8x32xf32>
    %cst_48 = arith.constant dense<0.000000e+00> : vector<8x32xf32>
    %36 = tpu.matmul %6, %22, %cst_48 {dimension_numbers = #tpu.dot_dimension_numbers<[1], [0], [0], [1], [0, 0, 1, 1], [], []>} : vector<8x32xf32>, vector<32x32xf32>, vector<8x32xf32> -> vector<8x32xf32>
    %37 = vector.broadcast %24 : vector<1x32xf32> to vector<8x32xf32>
    %38 = arith.addf %36, %37 : vector<8x32xf32>
    %cst_49 = arith.constant dense<0.000000e+00> : vector<8x32xf32>
    %39 = tpu.matmul %6, %26, %cst_49 {dimension_numbers = #tpu.dot_dimension_numbers<[1], [0], [0], [1], [0, 0, 1, 1], [], []>} : vector<8x32xf32>, vector<32x32xf32>, vector<8x32xf32> -> vector<8x32xf32>
    %40 = vector.broadcast %28 : vector<1x32xf32> to vector<8x32xf32>
    %41 = arith.addf %39, %40 : vector<8x32xf32>
    %42 = tpu.concatenate %38, %38, %38, %38 in 0 : vector<8x32xf32>, vector<8x32xf32>, vector<8x32xf32>, vector<8x32xf32> -> vector<32x32xf32>
    %43 = arith.mulf %42, %9 : vector<32x32xf32>
    %44 = tpu.concatenate %41, %41, %41, %41 in 0 : vector<8x32xf32>, vector<8x32xf32>, vector<8x32xf32>, vector<8x32xf32> -> vector<32x32xf32>
    %45 = arith.mulf %44, %9 : vector<32x32xf32>
    %46 = tpu.transpose %43, [1, 0] : vector<32x32xf32> -> vector<32x32xf32>
    %cst_50 = arith.constant dense<0.000000e+00> : vector<8x32xf32>
    %47 = tpu.matmul %35, %46, %cst_50 {dimension_numbers = #tpu.dot_dimension_numbers<[1], [0], [0], [1], [0, 0, 1, 1], [], []>} : vector<8x32xf32>, vector<32x32xf32>, vector<8x32xf32> -> vector<8x32xf32>
    %cst_51 = arith.constant dense<0xFF800000> : vector<8xf32>
    %48 = vector.multi_reduction <maximumf>, %47, %cst_51 [1] : vector<8x32xf32> to vector<8xf32>
    %49 = vector.shape_cast %48 : vector<8xf32> to vector<8x1xf32>
    %50 = vector.broadcast %49 : vector<8x1xf32> to vector<8x32xf32>
    %51 = arith.subf %47, %50 : vector<8x32xf32>
    %52 = math.exp %51 : vector<8x32xf32>
    %cst_52 = arith.constant dense<0.000000e+00> : vector<8x32xf32>
    %53 = tpu.matmul %52, %10, %cst_52 {dimension_numbers = #tpu.dot_dimension_numbers<[1], [0], [0], [1], [0, 0, 1, 1], [], []>} : vector<8x32xf32>, vector<32x32xf32>, vector<8x32xf32> -> vector<8x32xf32>
    %54 = tpu.reciprocal %53 {approx = true} : vector<8x32xf32> -> vector<8x32xf32>
    %55 = arith.mulf %52, %54 : vector<8x32xf32>
    %cst_53 = arith.constant dense<0.000000e+00> : vector<8x32xf32>
    %56 = tpu.matmul %55, %45, %cst_53 {dimension_numbers = #tpu.dot_dimension_numbers<[1], [0], [0], [1], [0, 0, 1, 1], [], []>} : vector<8x32xf32>, vector<32x32xf32>, vector<8x32xf32> -> vector<8x32xf32>
    %cst_54 = arith.constant dense<0.000000e+00> : vector<8x32xf32>
    %57 = tpu.matmul %56, %30, %cst_54 {dimension_numbers = #tpu.dot_dimension_numbers<[1], [0], [0], [1], [0, 0, 1, 1], [], []>} : vector<8x32xf32>, vector<32x32xf32>, vector<8x32xf32> -> vector<8x32xf32>
    %58 = vector.broadcast %32 : vector<1x32xf32> to vector<8x32xf32>
    %59 = arith.addf %57, %58 : vector<8x32xf32>
    %60 = arith.addf %6, %59 : vector<8x32xf32>
    %cst_55 = arith.constant dense<0.000000e+00> : vector<8xf32>
    %61 = vector.multi_reduction <add>, %60, %cst_55 [1] : vector<8x32xf32> to vector<8xf32>
    %62 = vector.shape_cast %61 : vector<8xf32> to vector<8x1xf32>
    %cst_56 = arith.constant 3.200000e+01 : f32
    %63 = vector.broadcast %cst_56 : f32 to vector<8x1xf32>
    %64 = arith.divf %62, %63 : vector<8x1xf32>
    %65 = vector.broadcast %64 : vector<8x1xf32> to vector<8x32xf32>
    %66 = arith.subf %60, %65 : vector<8x32xf32>
    %67 = arith.mulf %66, %66 : vector<8x32xf32>
    %cst_57 = arith.constant dense<0.000000e+00> : vector<8xf32>
    %68 = vector.multi_reduction <add>, %67, %cst_57 [1] : vector<8x32xf32> to vector<8xf32>
    %69 = vector.shape_cast %68 : vector<8xf32> to vector<8x1xf32>
    %cst_58 = arith.constant 3.200000e+01 : f32
    %70 = vector.broadcast %cst_58 : f32 to vector<8x1xf32>
    %71 = arith.divf %69, %70 : vector<8x1xf32>
    %cst_59 = arith.constant 9.99999974E-6 : f32
    %72 = vector.broadcast %cst_59 : f32 to vector<8x1xf32>
    %73 = arith.addf %71, %72 : vector<8x1xf32>
    %74 = math.rsqrt %73 : vector<8x1xf32>
    %75 = vector.broadcast %74 : vector<8x1xf32> to vector<8x32xf32>
    %76 = arith.mulf %66, %75 : vector<8x32xf32>
    %77 = vector.broadcast %14 : vector<1x32xf32> to vector<8x32xf32>
    %78 = arith.mulf %76, %77 : vector<8x32xf32>
    %79 = vector.broadcast %16 : vector<1x32xf32> to vector<8x32xf32>
    %80 = arith.addf %78, %79 : vector<8x32xf32>
    %c0_60 = arith.constant 0 : index
    %c0_61 = arith.constant 0 : index
    %c0_62 = arith.constant 0 : index
    %81 = vector.load %arg19[%c0_60, %c0_61, %c0_62] : memref<2x32x32xf32, #tpu.memory_space<vmem>>, vector<1x32x32xf32>
    %82 = vector.shape_cast %81 : vector<1x32x32xf32> to vector<32x32xf32>
    %c0_63 = arith.constant 0 : index
    %c0_64 = arith.constant 0 : index
    %c0_65 = arith.constant 0 : index
    %83 = vector.load %arg20[%c0_63, %c0_64, %c0_65] : memref<2x1x32xf32, #tpu.memory_space<vmem>>, vector<1x1x32xf32>
    %84 = vector.shape_cast %83 : vector<1x1x32xf32> to vector<1x32xf32>
    %c0_66 = arith.constant 0 : index
    %c0_67 = arith.constant 0 : index
    %c0_68 = arith.constant 0 : index
    %85 = vector.load %arg21[%c0_66, %c0_67, %c0_68] : memref<2x32x32xf32, #tpu.memory_space<vmem>>, vector<1x32x32xf32>
    %86 = vector.shape_cast %85 : vector<1x32x32xf32> to vector<32x32xf32>
    %c0_69 = arith.constant 0 : index
    %c0_70 = arith.constant 0 : index
    %c0_71 = arith.constant 0 : index
    %87 = vector.load %arg22[%c0_69, %c0_70, %c0_71] : memref<2x1x32xf32, #tpu.memory_space<vmem>>, vector<1x1x32xf32>
    %88 = vector.shape_cast %87 : vector<1x1x32xf32> to vector<1x32xf32>
    %c0_72 = arith.constant 0 : index
    %c0_73 = arith.constant 0 : index
    %c0_74 = arith.constant 0 : index
    %89 = vector.load %arg23[%c0_72, %c0_73, %c0_74] : memref<2x32x32xf32, #tpu.memory_space<vmem>>, vector<1x32x32xf32>
    %90 = vector.shape_cast %89 : vector<1x32x32xf32> to vector<32x32xf32>
    %c0_75 = arith.constant 0 : index
    %c0_76 = arith.constant 0 : index
    %c0_77 = arith.constant 0 : index
    %91 = vector.load %arg24[%c0_75, %c0_76, %c0_77] : memref<2x1x32xf32, #tpu.memory_space<vmem>>, vector<1x1x32xf32>
    %92 = vector.shape_cast %91 : vector<1x1x32xf32> to vector<1x32xf32>
    %c0_78 = arith.constant 0 : index
    %c0_79 = arith.constant 0 : index
    %c0_80 = arith.constant 0 : index
    %93 = vector.load %arg25[%c0_78, %c0_79, %c0_80] : memref<2x32x32xf32, #tpu.memory_space<vmem>>, vector<1x32x32xf32>
    %94 = vector.shape_cast %93 : vector<1x32x32xf32> to vector<32x32xf32>
    %c0_81 = arith.constant 0 : index
    %c0_82 = arith.constant 0 : index
    %c0_83 = arith.constant 0 : index
    %95 = vector.load %arg26[%c0_81, %c0_82, %c0_83] : memref<2x1x32xf32, #tpu.memory_space<vmem>>, vector<1x1x32xf32>
    %96 = vector.shape_cast %95 : vector<1x1x32xf32> to vector<1x32xf32>
    %cst_84 = arith.constant dense<0.000000e+00> : vector<8x32xf32>
    %97 = tpu.matmul %80, %82, %cst_84 {dimension_numbers = #tpu.dot_dimension_numbers<[1], [0], [0], [1], [0, 0, 1, 1], [], []>} : vector<8x32xf32>, vector<32x32xf32>, vector<8x32xf32> -> vector<8x32xf32>
    %98 = vector.broadcast %84 : vector<1x32xf32> to vector<8x32xf32>
    %99 = arith.addf %97, %98 : vector<8x32xf32>
    %cst_85 = arith.constant dense<0.000000e+00> : vector<16x32xf32>
    %100 = tpu.matmul %8, %86, %cst_85 {dimension_numbers = #tpu.dot_dimension_numbers<[1], [0], [0], [1], [0, 0, 1, 1], [], []>} : vector<16x32xf32>, vector<32x32xf32>, vector<16x32xf32> -> vector<16x32xf32>
    %101 = vector.broadcast %88 : vector<1x32xf32> to vector<16x32xf32>
    %102 = arith.addf %100, %101 : vector<16x32xf32>
    %cst_86 = arith.constant dense<0.000000e+00> : vector<16x32xf32>
    %103 = tpu.matmul %8, %90, %cst_86 {dimension_numbers = #tpu.dot_dimension_numbers<[1], [0], [0], [1], [0, 0, 1, 1], [], []>} : vector<16x32xf32>, vector<32x32xf32>, vector<16x32xf32> -> vector<16x32xf32>
    %104 = vector.broadcast %92 : vector<1x32xf32> to vector<16x32xf32>
    %105 = arith.addf %103, %104 : vector<16x32xf32>
    %106 = tpu.concatenate %102, %102, %102, %102 in 0 : vector<16x32xf32>, vector<16x32xf32>, vector<16x32xf32>, vector<16x32xf32> -> vector<64x32xf32>
    %107 = arith.mulf %106, %11 : vector<64x32xf32>
    %108 = tpu.concatenate %105, %105, %105, %105 in 0 : vector<16x32xf32>, vector<16x32xf32>, vector<16x32xf32>, vector<16x32xf32> -> vector<64x32xf32>
    %109 = arith.mulf %108, %11 : vector<64x32xf32>
    %110 = tpu.transpose %107, [1, 0] : vector<64x32xf32> -> vector<32x64xf32>
    %cst_87 = arith.constant dense<0.000000e+00> : vector<8x64xf32>
    %111 = tpu.matmul %99, %110, %cst_87 {dimension_numbers = #tpu.dot_dimension_numbers<[1], [0], [0], [1], [0, 0, 1, 1], [], []>} : vector<8x32xf32>, vector<32x64xf32>, vector<8x64xf32> -> vector<8x64xf32>
    %cst_88 = arith.constant dense<0xFF800000> : vector<8xf32>
    %112 = vector.multi_reduction <maximumf>, %111, %cst_88 [1] : vector<8x64xf32> to vector<8xf32>
    %113 = vector.shape_cast %112 : vector<8xf32> to vector<8x1xf32>
    %114 = vector.broadcast %113 : vector<8x1xf32> to vector<8x64xf32>
    %115 = arith.subf %111, %114 : vector<8x64xf32>
    %116 = math.exp %115 : vector<8x64xf32>
    %cst_89 = arith.constant dense<0.000000e+00> : vector<8x64xf32>
    %117 = tpu.matmul %116, %12, %cst_89 {dimension_numbers = #tpu.dot_dimension_numbers<[1], [0], [0], [1], [0, 0, 1, 1], [], []>} : vector<8x64xf32>, vector<64x64xf32>, vector<8x64xf32> -> vector<8x64xf32>
    %118 = tpu.reciprocal %117 {approx = true} : vector<8x64xf32> -> vector<8x64xf32>
    %119 = arith.mulf %116, %118 : vector<8x64xf32>
    %cst_90 = arith.constant dense<0.000000e+00> : vector<8x32xf32>
    %120 = tpu.matmul %119, %109, %cst_90 {dimension_numbers = #tpu.dot_dimension_numbers<[1], [0], [0], [1], [0, 0, 1, 1], [], []>} : vector<8x64xf32>, vector<64x32xf32>, vector<8x32xf32> -> vector<8x32xf32>
    %cst_91 = arith.constant dense<0.000000e+00> : vector<8x32xf32>
    %121 = tpu.matmul %120, %94, %cst_91 {dimension_numbers = #tpu.dot_dimension_numbers<[1], [0], [0], [1], [0, 0, 1, 1], [], []>} : vector<8x32xf32>, vector<32x32xf32>, vector<8x32xf32> -> vector<8x32xf32>
    %122 = vector.broadcast %96 : vector<1x32xf32> to vector<8x32xf32>
    %123 = arith.addf %121, %122 : vector<8x32xf32>
    %124 = arith.addf %80, %123 : vector<8x32xf32>
    %cst_92 = arith.constant dense<0.000000e+00> : vector<8xf32>
    %125 = vector.multi_reduction <add>, %124, %cst_92 [1] : vector<8x32xf32> to vector<8xf32>
    %126 = vector.shape_cast %125 : vector<8xf32> to vector<8x1xf32>
    %cst_93 = arith.constant 3.200000e+01 : f32
    %127 = vector.broadcast %cst_93 : f32 to vector<8x1xf32>
    %128 = arith.divf %126, %127 : vector<8x1xf32>
    %129 = vector.broadcast %128 : vector<8x1xf32> to vector<8x32xf32>
    %130 = arith.subf %124, %129 : vector<8x32xf32>
    %131 = arith.mulf %130, %130 : vector<8x32xf32>
    %cst_94 = arith.constant dense<0.000000e+00> : vector<8xf32>
    %132 = vector.multi_reduction <add>, %131, %cst_94 [1] : vector<8x32xf32> to vector<8xf32>
    %133 = vector.shape_cast %132 : vector<8xf32> to vector<8x1xf32>
    %cst_95 = arith.constant 3.200000e+01 : f32
    %134 = vector.broadcast %cst_95 : f32 to vector<8x1xf32>
    %135 = arith.divf %133, %134 : vector<8x1xf32>
    %cst_96 = arith.constant 9.99999974E-6 : f32
    %136 = vector.broadcast %cst_96 : f32 to vector<8x1xf32>
    %137 = arith.addf %135, %136 : vector<8x1xf32>
    %138 = math.rsqrt %137 : vector<8x1xf32>
    %139 = vector.broadcast %138 : vector<8x1xf32> to vector<8x32xf32>
    %140 = arith.mulf %130, %139 : vector<8x32xf32>
    %141 = vector.broadcast %14 : vector<1x32xf32> to vector<8x32xf32>
    %142 = arith.mulf %140, %141 : vector<8x32xf32>
    %143 = vector.broadcast %16 : vector<1x32xf32> to vector<8x32xf32>
    %144 = arith.addf %142, %143 : vector<8x32xf32>
    %c0_97 = arith.constant 0 : index
    %c0_98 = arith.constant 0 : index
    %c0_99 = arith.constant 0 : index
    %145 = vector.load %arg27[%c0_97, %c0_98, %c0_99] : memref<2x32x64xf32, #tpu.memory_space<vmem>>, vector<1x32x64xf32>
    %146 = vector.shape_cast %145 : vector<1x32x64xf32> to vector<32x64xf32>
    %cst_100 = arith.constant dense<0.000000e+00> : vector<8x64xf32>
    %147 = tpu.matmul %144, %146, %cst_100 {dimension_numbers = #tpu.dot_dimension_numbers<[1], [0], [0], [1], [0, 0, 1, 1], [], []>} : vector<8x32xf32>, vector<32x64xf32>, vector<8x64xf32> -> vector<8x64xf32>
    %c0_101 = arith.constant 0 : index
    %c0_102 = arith.constant 0 : index
    %c0_103 = arith.constant 0 : index
    %148 = vector.load %arg28[%c0_101, %c0_102, %c0_103] : memref<2x1x64xf32, #tpu.memory_space<vmem>>, vector<1x1x64xf32>
    %149 = vector.shape_cast %148 : vector<1x1x64xf32> to vector<1x64xf32>
    %150 = vector.broadcast %149 : vector<1x64xf32> to vector<8x64xf32>
    %151 = arith.addf %147, %150 : vector<8x64xf32>
    %cst_104 = arith.constant 0.000000e+00 : f32
    %152 = vector.broadcast %cst_104 : f32 to vector<8x64xf32>
    %153 = arith.maximumf %151, %152 : vector<8x64xf32>
    %c0_105 = arith.constant 0 : index
    %c0_106 = arith.constant 0 : index
    %c0_107 = arith.constant 0 : index
    %154 = vector.load %arg29[%c0_105, %c0_106, %c0_107] : memref<2x64x32xf32, #tpu.memory_space<vmem>>, vector<1x64x32xf32>
    %155 = vector.shape_cast %154 : vector<1x64x32xf32> to vector<64x32xf32>
    %cst_108 = arith.constant dense<0.000000e+00> : vector<8x32xf32>
    %156 = tpu.matmul %153, %155, %cst_108 {dimension_numbers = #tpu.dot_dimension_numbers<[1], [0], [0], [1], [0, 0, 1, 1], [], []>} : vector<8x64xf32>, vector<64x32xf32>, vector<8x32xf32> -> vector<8x32xf32>
    %c0_109 = arith.constant 0 : index
    %c0_110 = arith.constant 0 : index
    %c0_111 = arith.constant 0 : index
    %157 = vector.load %arg30[%c0_109, %c0_110, %c0_111] : memref<2x1x32xf32, #tpu.memory_space<vmem>>, vector<1x1x32xf32>
    %158 = vector.shape_cast %157 : vector<1x1x32xf32> to vector<1x32xf32>
    %159 = vector.broadcast %158 : vector<1x32xf32> to vector<8x32xf32>
    %160 = arith.addf %156, %159 : vector<8x32xf32>
    %161 = arith.addf %144, %160 : vector<8x32xf32>
    %cst_112 = arith.constant dense<0.000000e+00> : vector<8xf32>
    %162 = vector.multi_reduction <add>, %161, %cst_112 [1] : vector<8x32xf32> to vector<8xf32>
    %163 = vector.shape_cast %162 : vector<8xf32> to vector<8x1xf32>
    %cst_113 = arith.constant 3.200000e+01 : f32
    %164 = vector.broadcast %cst_113 : f32 to vector<8x1xf32>
    %165 = arith.divf %163, %164 : vector<8x1xf32>
    %166 = vector.broadcast %165 : vector<8x1xf32> to vector<8x32xf32>
    %167 = arith.subf %161, %166 : vector<8x32xf32>
    %168 = arith.mulf %167, %167 : vector<8x32xf32>
    %cst_114 = arith.constant dense<0.000000e+00> : vector<8xf32>
    %169 = vector.multi_reduction <add>, %168, %cst_114 [1] : vector<8x32xf32> to vector<8xf32>
    %170 = vector.shape_cast %169 : vector<8xf32> to vector<8x1xf32>
    %cst_115 = arith.constant 3.200000e+01 : f32
    %171 = vector.broadcast %cst_115 : f32 to vector<8x1xf32>
    %172 = arith.divf %170, %171 : vector<8x1xf32>
    %cst_116 = arith.constant 9.99999974E-6 : f32
    %173 = vector.broadcast %cst_116 : f32 to vector<8x1xf32>
    %174 = arith.addf %172, %173 : vector<8x1xf32>
    %175 = math.rsqrt %174 : vector<8x1xf32>
    %176 = vector.broadcast %175 : vector<8x1xf32> to vector<8x32xf32>
    %177 = arith.mulf %167, %176 : vector<8x32xf32>
    %178 = vector.broadcast %14 : vector<1x32xf32> to vector<8x32xf32>
    %179 = arith.mulf %177, %178 : vector<8x32xf32>
    %180 = vector.broadcast %16 : vector<1x32xf32> to vector<8x32xf32>
    %181 = arith.addf %179, %180 : vector<8x32xf32>
    %c1 = arith.constant 1 : index
    %c0_117 = arith.constant 0 : index
    %c0_118 = arith.constant 0 : index
    %182 = vector.load %arg9[%c1, %c0_117, %c0_118] : memref<2x1x32xf32, #tpu.memory_space<vmem>>, vector<1x1x32xf32>
    %183 = vector.shape_cast %182 : vector<1x1x32xf32> to vector<1x32xf32>
    %c1_119 = arith.constant 1 : index
    %c0_120 = arith.constant 0 : index
    %c0_121 = arith.constant 0 : index
    %184 = vector.load %arg10[%c1_119, %c0_120, %c0_121] : memref<2x1x32xf32, #tpu.memory_space<vmem>>, vector<1x1x32xf32>
    %185 = vector.shape_cast %184 : vector<1x1x32xf32> to vector<1x32xf32>
    %c1_122 = arith.constant 1 : index
    %c0_123 = arith.constant 0 : index
    %c0_124 = arith.constant 0 : index
    %186 = vector.load %arg11[%c1_122, %c0_123, %c0_124] : memref<2x32x32xf32, #tpu.memory_space<vmem>>, vector<1x32x32xf32>
    %187 = vector.shape_cast %186 : vector<1x32x32xf32> to vector<32x32xf32>
    %c1_125 = arith.constant 1 : index
    %c0_126 = arith.constant 0 : index
    %c0_127 = arith.constant 0 : index
    %188 = vector.load %arg12[%c1_125, %c0_126, %c0_127] : memref<2x1x32xf32, #tpu.memory_space<vmem>>, vector<1x1x32xf32>
    %189 = vector.shape_cast %188 : vector<1x1x32xf32> to vector<1x32xf32>
    %c1_128 = arith.constant 1 : index
    %c0_129 = arith.constant 0 : index
    %c0_130 = arith.constant 0 : index
    %190 = vector.load %arg13[%c1_128, %c0_129, %c0_130] : memref<2x32x32xf32, #tpu.memory_space<vmem>>, vector<1x32x32xf32>
    %191 = vector.shape_cast %190 : vector<1x32x32xf32> to vector<32x32xf32>
    %c1_131 = arith.constant 1 : index
    %c0_132 = arith.constant 0 : index
    %c0_133 = arith.constant 0 : index
    %192 = vector.load %arg14[%c1_131, %c0_132, %c0_133] : memref<2x1x32xf32, #tpu.memory_space<vmem>>, vector<1x1x32xf32>
    %193 = vector.shape_cast %192 : vector<1x1x32xf32> to vector<1x32xf32>
    %c1_134 = arith.constant 1 : index
    %c0_135 = arith.constant 0 : index
    %c0_136 = arith.constant 0 : index
    %194 = vector.load %arg15[%c1_134, %c0_135, %c0_136] : memref<2x32x32xf32, #tpu.memory_space<vmem>>, vector<1x32x32xf32>
    %195 = vector.shape_cast %194 : vector<1x32x32xf32> to vector<32x32xf32>
    %c1_137 = arith.constant 1 : index
    %c0_138 = arith.constant 0 : index
    %c0_139 = arith.constant 0 : index
    %196 = vector.load %arg16[%c1_137, %c0_138, %c0_139] : memref<2x1x32xf32, #tpu.memory_space<vmem>>, vector<1x1x32xf32>
    %197 = vector.shape_cast %196 : vector<1x1x32xf32> to vector<1x32xf32>
    %c1_140 = arith.constant 1 : index
    %c0_141 = arith.constant 0 : index
    %c0_142 = arith.constant 0 : index
    %198 = vector.load %arg17[%c1_140, %c0_141, %c0_142] : memref<2x32x32xf32, #tpu.memory_space<vmem>>, vector<1x32x32xf32>
    %199 = vector.shape_cast %198 : vector<1x32x32xf32> to vector<32x32xf32>
    %c1_143 = arith.constant 1 : index
    %c0_144 = arith.constant 0 : index
    %c0_145 = arith.constant 0 : index
    %200 = vector.load %arg18[%c1_143, %c0_144, %c0_145] : memref<2x1x32xf32, #tpu.memory_space<vmem>>, vector<1x1x32xf32>
    %201 = vector.shape_cast %200 : vector<1x1x32xf32> to vector<1x32xf32>
    %cst_146 = arith.constant dense<0.000000e+00> : vector<8x32xf32>
    %202 = tpu.matmul %181, %187, %cst_146 {dimension_numbers = #tpu.dot_dimension_numbers<[1], [0], [0], [1], [0, 0, 1, 1], [], []>} : vector<8x32xf32>, vector<32x32xf32>, vector<8x32xf32> -> vector<8x32xf32>
    %203 = vector.broadcast %189 : vector<1x32xf32> to vector<8x32xf32>
    %204 = arith.addf %202, %203 : vector<8x32xf32>
    %cst_147 = arith.constant dense<0.000000e+00> : vector<8x32xf32>
    %205 = tpu.matmul %181, %191, %cst_147 {dimension_numbers = #tpu.dot_dimension_numbers<[1], [0], [0], [1], [0, 0, 1, 1], [], []>} : vector<8x32xf32>, vector<32x32xf32>, vector<8x32xf32> -> vector<8x32xf32>
    %206 = vector.broadcast %193 : vector<1x32xf32> to vector<8x32xf32>
    %207 = arith.addf %205, %206 : vector<8x32xf32>
    %cst_148 = arith.constant dense<0.000000e+00> : vector<8x32xf32>
    %208 = tpu.matmul %181, %195, %cst_148 {dimension_numbers = #tpu.dot_dimension_numbers<[1], [0], [0], [1], [0, 0, 1, 1], [], []>} : vector<8x32xf32>, vector<32x32xf32>, vector<8x32xf32> -> vector<8x32xf32>
    %209 = vector.broadcast %197 : vector<1x32xf32> to vector<8x32xf32>
    %210 = arith.addf %208, %209 : vector<8x32xf32>
    %211 = tpu.concatenate %207, %207, %207, %207 in 0 : vector<8x32xf32>, vector<8x32xf32>, vector<8x32xf32>, vector<8x32xf32> -> vector<32x32xf32>
    %212 = arith.mulf %211, %9 : vector<32x32xf32>
    %213 = tpu.concatenate %210, %210, %210, %210 in 0 : vector<8x32xf32>, vector<8x32xf32>, vector<8x32xf32>, vector<8x32xf32> -> vector<32x32xf32>
    %214 = arith.mulf %213, %9 : vector<32x32xf32>
    %215 = tpu.transpose %212, [1, 0] : vector<32x32xf32> -> vector<32x32xf32>
    %cst_149 = arith.constant dense<0.000000e+00> : vector<8x32xf32>
    %216 = tpu.matmul %204, %215, %cst_149 {dimension_numbers = #tpu.dot_dimension_numbers<[1], [0], [0], [1], [0, 0, 1, 1], [], []>} : vector<8x32xf32>, vector<32x32xf32>, vector<8x32xf32> -> vector<8x32xf32>
    %cst_150 = arith.constant dense<0xFF800000> : vector<8xf32>
    %217 = vector.multi_reduction <maximumf>, %216, %cst_150 [1] : vector<8x32xf32> to vector<8xf32>
    %218 = vector.shape_cast %217 : vector<8xf32> to vector<8x1xf32>
    %219 = vector.broadcast %218 : vector<8x1xf32> to vector<8x32xf32>
    %220 = arith.subf %216, %219 : vector<8x32xf32>
    %221 = math.exp %220 : vector<8x32xf32>
    %cst_151 = arith.constant dense<0.000000e+00> : vector<8x32xf32>
    %222 = tpu.matmul %221, %10, %cst_151 {dimension_numbers = #tpu.dot_dimension_numbers<[1], [0], [0], [1], [0, 0, 1, 1], [], []>} : vector<8x32xf32>, vector<32x32xf32>, vector<8x32xf32> -> vector<8x32xf32>
    %223 = tpu.reciprocal %222 {approx = true} : vector<8x32xf32> -> vector<8x32xf32>
    %224 = arith.mulf %221, %223 : vector<8x32xf32>
    %cst_152 = arith.constant dense<0.000000e+00> : vector<8x32xf32>
    %225 = tpu.matmul %224, %214, %cst_152 {dimension_numbers = #tpu.dot_dimension_numbers<[1], [0], [0], [1], [0, 0, 1, 1], [], []>} : vector<8x32xf32>, vector<32x32xf32>, vector<8x32xf32> -> vector<8x32xf32>
    %cst_153 = arith.constant dense<0.000000e+00> : vector<8x32xf32>
    %226 = tpu.matmul %225, %199, %cst_153 {dimension_numbers = #tpu.dot_dimension_numbers<[1], [0], [0], [1], [0, 0, 1, 1], [], []>} : vector<8x32xf32>, vector<32x32xf32>, vector<8x32xf32> -> vector<8x32xf32>
    %227 = vector.broadcast %201 : vector<1x32xf32> to vector<8x32xf32>
    %228 = arith.addf %226, %227 : vector<8x32xf32>
    %229 = arith.addf %181, %228 : vector<8x32xf32>
    %cst_154 = arith.constant dense<0.000000e+00> : vector<8xf32>
    %230 = vector.multi_reduction <add>, %229, %cst_154 [1] : vector<8x32xf32> to vector<8xf32>
    %231 = vector.shape_cast %230 : vector<8xf32> to vector<8x1xf32>
    %cst_155 = arith.constant 3.200000e+01 : f32
    %232 = vector.broadcast %cst_155 : f32 to vector<8x1xf32>
    %233 = arith.divf %231, %232 : vector<8x1xf32>
    %234 = vector.broadcast %233 : vector<8x1xf32> to vector<8x32xf32>
    %235 = arith.subf %229, %234 : vector<8x32xf32>
    %236 = arith.mulf %235, %235 : vector<8x32xf32>
    %cst_156 = arith.constant dense<0.000000e+00> : vector<8xf32>
    %237 = vector.multi_reduction <add>, %236, %cst_156 [1] : vector<8x32xf32> to vector<8xf32>
    %238 = vector.shape_cast %237 : vector<8xf32> to vector<8x1xf32>
    %cst_157 = arith.constant 3.200000e+01 : f32
    %239 = vector.broadcast %cst_157 : f32 to vector<8x1xf32>
    %240 = arith.divf %238, %239 : vector<8x1xf32>
    %cst_158 = arith.constant 9.99999974E-6 : f32
    %241 = vector.broadcast %cst_158 : f32 to vector<8x1xf32>
    %242 = arith.addf %240, %241 : vector<8x1xf32>
    %243 = math.rsqrt %242 : vector<8x1xf32>
    %244 = vector.broadcast %243 : vector<8x1xf32> to vector<8x32xf32>
    %245 = arith.mulf %235, %244 : vector<8x32xf32>
    %246 = vector.broadcast %183 : vector<1x32xf32> to vector<8x32xf32>
    %247 = arith.mulf %245, %246 : vector<8x32xf32>
    %248 = vector.broadcast %185 : vector<1x32xf32> to vector<8x32xf32>
    %249 = arith.addf %247, %248 : vector<8x32xf32>
    %c1_159 = arith.constant 1 : index
    %c0_160 = arith.constant 0 : index
    %c0_161 = arith.constant 0 : index
    %250 = vector.load %arg19[%c1_159, %c0_160, %c0_161] : memref<2x32x32xf32, #tpu.memory_space<vmem>>, vector<1x32x32xf32>
    %251 = vector.shape_cast %250 : vector<1x32x32xf32> to vector<32x32xf32>
    %c1_162 = arith.constant 1 : index
    %c0_163 = arith.constant 0 : index
    %c0_164 = arith.constant 0 : index
    %252 = vector.load %arg20[%c1_162, %c0_163, %c0_164] : memref<2x1x32xf32, #tpu.memory_space<vmem>>, vector<1x1x32xf32>
    %253 = vector.shape_cast %252 : vector<1x1x32xf32> to vector<1x32xf32>
    %c1_165 = arith.constant 1 : index
    %c0_166 = arith.constant 0 : index
    %c0_167 = arith.constant 0 : index
    %254 = vector.load %arg21[%c1_165, %c0_166, %c0_167] : memref<2x32x32xf32, #tpu.memory_space<vmem>>, vector<1x32x32xf32>
    %255 = vector.shape_cast %254 : vector<1x32x32xf32> to vector<32x32xf32>
    %c1_168 = arith.constant 1 : index
    %c0_169 = arith.constant 0 : index
    %c0_170 = arith.constant 0 : index
    %256 = vector.load %arg22[%c1_168, %c0_169, %c0_170] : memref<2x1x32xf32, #tpu.memory_space<vmem>>, vector<1x1x32xf32>
    %257 = vector.shape_cast %256 : vector<1x1x32xf32> to vector<1x32xf32>
    %c1_171 = arith.constant 1 : index
    %c0_172 = arith.constant 0 : index
    %c0_173 = arith.constant 0 : index
    %258 = vector.load %arg23[%c1_171, %c0_172, %c0_173] : memref<2x32x32xf32, #tpu.memory_space<vmem>>, vector<1x32x32xf32>
    %259 = vector.shape_cast %258 : vector<1x32x32xf32> to vector<32x32xf32>
    %c1_174 = arith.constant 1 : index
    %c0_175 = arith.constant 0 : index
    %c0_176 = arith.constant 0 : index
    %260 = vector.load %arg24[%c1_174, %c0_175, %c0_176] : memref<2x1x32xf32, #tpu.memory_space<vmem>>, vector<1x1x32xf32>
    %261 = vector.shape_cast %260 : vector<1x1x32xf32> to vector<1x32xf32>
    %c1_177 = arith.constant 1 : index
    %c0_178 = arith.constant 0 : index
    %c0_179 = arith.constant 0 : index
    %262 = vector.load %arg25[%c1_177, %c0_178, %c0_179] : memref<2x32x32xf32, #tpu.memory_space<vmem>>, vector<1x32x32xf32>
    %263 = vector.shape_cast %262 : vector<1x32x32xf32> to vector<32x32xf32>
    %c1_180 = arith.constant 1 : index
    %c0_181 = arith.constant 0 : index
    %c0_182 = arith.constant 0 : index
    %264 = vector.load %arg26[%c1_180, %c0_181, %c0_182] : memref<2x1x32xf32, #tpu.memory_space<vmem>>, vector<1x1x32xf32>
    %265 = vector.shape_cast %264 : vector<1x1x32xf32> to vector<1x32xf32>
    %cst_183 = arith.constant dense<0.000000e+00> : vector<8x32xf32>
    %266 = tpu.matmul %249, %251, %cst_183 {dimension_numbers = #tpu.dot_dimension_numbers<[1], [0], [0], [1], [0, 0, 1, 1], [], []>} : vector<8x32xf32>, vector<32x32xf32>, vector<8x32xf32> -> vector<8x32xf32>
    %267 = vector.broadcast %253 : vector<1x32xf32> to vector<8x32xf32>
    %268 = arith.addf %266, %267 : vector<8x32xf32>
    %cst_184 = arith.constant dense<0.000000e+00> : vector<16x32xf32>
    %269 = tpu.matmul %8, %255, %cst_184 {dimension_numbers = #tpu.dot_dimension_numbers<[1], [0], [0], [1], [0, 0, 1, 1], [], []>} : vector<16x32xf32>, vector<32x32xf32>, vector<16x32xf32> -> vector<16x32xf32>
    %270 = vector.broadcast %257 : vector<1x32xf32> to vector<16x32xf32>
    %271 = arith.addf %269, %270 : vector<16x32xf32>
    %cst_185 = arith.constant dense<0.000000e+00> : vector<16x32xf32>
    %272 = tpu.matmul %8, %259, %cst_185 {dimension_numbers = #tpu.dot_dimension_numbers<[1], [0], [0], [1], [0, 0, 1, 1], [], []>} : vector<16x32xf32>, vector<32x32xf32>, vector<16x32xf32> -> vector<16x32xf32>
    %273 = vector.broadcast %261 : vector<1x32xf32> to vector<16x32xf32>
    %274 = arith.addf %272, %273 : vector<16x32xf32>
    %275 = tpu.concatenate %271, %271, %271, %271 in 0 : vector<16x32xf32>, vector<16x32xf32>, vector<16x32xf32>, vector<16x32xf32> -> vector<64x32xf32>
    %276 = arith.mulf %275, %11 : vector<64x32xf32>
    %277 = tpu.concatenate %274, %274, %274, %274 in 0 : vector<16x32xf32>, vector<16x32xf32>, vector<16x32xf32>, vector<16x32xf32> -> vector<64x32xf32>
    %278 = arith.mulf %277, %11 : vector<64x32xf32>
    %279 = tpu.transpose %276, [1, 0] : vector<64x32xf32> -> vector<32x64xf32>
    %cst_186 = arith.constant dense<0.000000e+00> : vector<8x64xf32>
    %280 = tpu.matmul %268, %279, %cst_186 {dimension_numbers = #tpu.dot_dimension_numbers<[1], [0], [0], [1], [0, 0, 1, 1], [], []>} : vector<8x32xf32>, vector<32x64xf32>, vector<8x64xf32> -> vector<8x64xf32>
    %cst_187 = arith.constant dense<0xFF800000> : vector<8xf32>
    %281 = vector.multi_reduction <maximumf>, %280, %cst_187 [1] : vector<8x64xf32> to vector<8xf32>
    %282 = vector.shape_cast %281 : vector<8xf32> to vector<8x1xf32>
    %283 = vector.broadcast %282 : vector<8x1xf32> to vector<8x64xf32>
    %284 = arith.subf %280, %283 : vector<8x64xf32>
    %285 = math.exp %284 : vector<8x64xf32>
    %cst_188 = arith.constant dense<0.000000e+00> : vector<8x64xf32>
    %286 = tpu.matmul %285, %12, %cst_188 {dimension_numbers = #tpu.dot_dimension_numbers<[1], [0], [0], [1], [0, 0, 1, 1], [], []>} : vector<8x64xf32>, vector<64x64xf32>, vector<8x64xf32> -> vector<8x64xf32>
    %287 = tpu.reciprocal %286 {approx = true} : vector<8x64xf32> -> vector<8x64xf32>
    %288 = arith.mulf %285, %287 : vector<8x64xf32>
    %cst_189 = arith.constant dense<0.000000e+00> : vector<8x32xf32>
    %289 = tpu.matmul %288, %278, %cst_189 {dimension_numbers = #tpu.dot_dimension_numbers<[1], [0], [0], [1], [0, 0, 1, 1], [], []>} : vector<8x64xf32>, vector<64x32xf32>, vector<8x32xf32> -> vector<8x32xf32>
    %cst_190 = arith.constant dense<0.000000e+00> : vector<8x32xf32>
    %290 = tpu.matmul %289, %263, %cst_190 {dimension_numbers = #tpu.dot_dimension_numbers<[1], [0], [0], [1], [0, 0, 1, 1], [], []>} : vector<8x32xf32>, vector<32x32xf32>, vector<8x32xf32> -> vector<8x32xf32>
    %291 = vector.broadcast %265 : vector<1x32xf32> to vector<8x32xf32>
    %292 = arith.addf %290, %291 : vector<8x32xf32>
    %293 = arith.addf %249, %292 : vector<8x32xf32>
    %cst_191 = arith.constant dense<0.000000e+00> : vector<8xf32>
    %294 = vector.multi_reduction <add>, %293, %cst_191 [1] : vector<8x32xf32> to vector<8xf32>
    %295 = vector.shape_cast %294 : vector<8xf32> to vector<8x1xf32>
    %cst_192 = arith.constant 3.200000e+01 : f32
    %296 = vector.broadcast %cst_192 : f32 to vector<8x1xf32>
    %297 = arith.divf %295, %296 : vector<8x1xf32>
    %298 = vector.broadcast %297 : vector<8x1xf32> to vector<8x32xf32>
    %299 = arith.subf %293, %298 : vector<8x32xf32>
    %300 = arith.mulf %299, %299 : vector<8x32xf32>
    %cst_193 = arith.constant dense<0.000000e+00> : vector<8xf32>
    %301 = vector.multi_reduction <add>, %300, %cst_193 [1] : vector<8x32xf32> to vector<8xf32>
    %302 = vector.shape_cast %301 : vector<8xf32> to vector<8x1xf32>
    %cst_194 = arith.constant 3.200000e+01 : f32
    %303 = vector.broadcast %cst_194 : f32 to vector<8x1xf32>
    %304 = arith.divf %302, %303 : vector<8x1xf32>
    %cst_195 = arith.constant 9.99999974E-6 : f32
    %305 = vector.broadcast %cst_195 : f32 to vector<8x1xf32>
    %306 = arith.addf %304, %305 : vector<8x1xf32>
    %307 = math.rsqrt %306 : vector<8x1xf32>
    %308 = vector.broadcast %307 : vector<8x1xf32> to vector<8x32xf32>
    %309 = arith.mulf %299, %308 : vector<8x32xf32>
    %310 = vector.broadcast %183 : vector<1x32xf32> to vector<8x32xf32>
    %311 = arith.mulf %309, %310 : vector<8x32xf32>
    %312 = vector.broadcast %185 : vector<1x32xf32> to vector<8x32xf32>
    %313 = arith.addf %311, %312 : vector<8x32xf32>
    %c1_196 = arith.constant 1 : index
    %c0_197 = arith.constant 0 : index
    %c0_198 = arith.constant 0 : index
    %314 = vector.load %arg27[%c1_196, %c0_197, %c0_198] : memref<2x32x64xf32, #tpu.memory_space<vmem>>, vector<1x32x64xf32>
    %315 = vector.shape_cast %314 : vector<1x32x64xf32> to vector<32x64xf32>
    %cst_199 = arith.constant dense<0.000000e+00> : vector<8x64xf32>
    %316 = tpu.matmul %313, %315, %cst_199 {dimension_numbers = #tpu.dot_dimension_numbers<[1], [0], [0], [1], [0, 0, 1, 1], [], []>} : vector<8x32xf32>, vector<32x64xf32>, vector<8x64xf32> -> vector<8x64xf32>
    %c1_200 = arith.constant 1 : index
    %c0_201 = arith.constant 0 : index
    %c0_202 = arith.constant 0 : index
    %317 = vector.load %arg28[%c1_200, %c0_201, %c0_202] : memref<2x1x64xf32, #tpu.memory_space<vmem>>, vector<1x1x64xf32>
    %318 = vector.shape_cast %317 : vector<1x1x64xf32> to vector<1x64xf32>
    %319 = vector.broadcast %318 : vector<1x64xf32> to vector<8x64xf32>
    %320 = arith.addf %316, %319 : vector<8x64xf32>
    %cst_203 = arith.constant 0.000000e+00 : f32
    %321 = vector.broadcast %cst_203 : f32 to vector<8x64xf32>
    %322 = arith.maximumf %320, %321 : vector<8x64xf32>
    %c1_204 = arith.constant 1 : index
    %c0_205 = arith.constant 0 : index
    %c0_206 = arith.constant 0 : index
    %323 = vector.load %arg29[%c1_204, %c0_205, %c0_206] : memref<2x64x32xf32, #tpu.memory_space<vmem>>, vector<1x64x32xf32>
    %324 = vector.shape_cast %323 : vector<1x64x32xf32> to vector<64x32xf32>
    %cst_207 = arith.constant dense<0.000000e+00> : vector<8x32xf32>
    %325 = tpu.matmul %322, %324, %cst_207 {dimension_numbers = #tpu.dot_dimension_numbers<[1], [0], [0], [1], [0, 0, 1, 1], [], []>} : vector<8x64xf32>, vector<64x32xf32>, vector<8x32xf32> -> vector<8x32xf32>
    %c1_208 = arith.constant 1 : index
    %c0_209 = arith.constant 0 : index
    %c0_210 = arith.constant 0 : index
    %326 = vector.load %arg30[%c1_208, %c0_209, %c0_210] : memref<2x1x32xf32, #tpu.memory_space<vmem>>, vector<1x1x32xf32>
    %327 = vector.shape_cast %326 : vector<1x1x32xf32> to vector<1x32xf32>
    %328 = vector.broadcast %327 : vector<1x32xf32> to vector<8x32xf32>
    %329 = arith.addf %325, %328 : vector<8x32xf32>
    %330 = arith.addf %313, %329 : vector<8x32xf32>
    %cst_211 = arith.constant dense<0.000000e+00> : vector<8xf32>
    %331 = vector.multi_reduction <add>, %330, %cst_211 [1] : vector<8x32xf32> to vector<8xf32>
    %332 = vector.shape_cast %331 : vector<8xf32> to vector<8x1xf32>
    %cst_212 = arith.constant 3.200000e+01 : f32
    %333 = vector.broadcast %cst_212 : f32 to vector<8x1xf32>
    %334 = arith.divf %332, %333 : vector<8x1xf32>
    %335 = vector.broadcast %334 : vector<8x1xf32> to vector<8x32xf32>
    %336 = arith.subf %330, %335 : vector<8x32xf32>
    %337 = arith.mulf %336, %336 : vector<8x32xf32>
    %cst_213 = arith.constant dense<0.000000e+00> : vector<8xf32>
    %338 = vector.multi_reduction <add>, %337, %cst_213 [1] : vector<8x32xf32> to vector<8xf32>
    %339 = vector.shape_cast %338 : vector<8xf32> to vector<8x1xf32>
    %cst_214 = arith.constant 3.200000e+01 : f32
    %340 = vector.broadcast %cst_214 : f32 to vector<8x1xf32>
    %341 = arith.divf %339, %340 : vector<8x1xf32>
    %cst_215 = arith.constant 9.99999974E-6 : f32
    %342 = vector.broadcast %cst_215 : f32 to vector<8x1xf32>
    %343 = arith.addf %341, %342 : vector<8x1xf32>
    %344 = math.rsqrt %343 : vector<8x1xf32>
    %345 = vector.broadcast %344 : vector<8x1xf32> to vector<8x32xf32>
    %346 = arith.mulf %336, %345 : vector<8x32xf32>
    %347 = vector.broadcast %183 : vector<1x32xf32> to vector<8x32xf32>
    %348 = arith.mulf %346, %347 : vector<8x32xf32>
    %349 = vector.broadcast %185 : vector<1x32xf32> to vector<8x32xf32>
    %350 = arith.addf %348, %349 : vector<8x32xf32>
    %351 = arith.mulf %350, %350 : vector<8x32xf32>
    %cst_216 = arith.constant dense<0.000000e+00> : vector<8xf32>
    %352 = vector.multi_reduction <add>, %351, %cst_216 [1] : vector<8x32xf32> to vector<8xf32>
    %353 = vector.shape_cast %352 : vector<8xf32> to vector<8x1xf32>
    %354 = math.sqrt %353 : vector<8x1xf32>
    %cst_217 = arith.constant dense<0xFF800000> : vector<1xf32>
    %355 = vector.multi_reduction <maximumf>, %354, %cst_217 [0] : vector<8x1xf32> to vector<1xf32>
    %356 = vector.shape_cast %355 : vector<1xf32> to vector<1x1xf32>
    %357 = vector.broadcast %356 : vector<1x1xf32> to vector<8x1xf32>
    %358 = arith.subf %354, %357 : vector<8x1xf32>
    %359 = math.exp %358 : vector<8x1xf32>
    %cst_218 = arith.constant dense<0.000000e+00> : vector<1xf32>
    %360 = vector.multi_reduction <add>, %359, %cst_218 [0] : vector<8x1xf32> to vector<1xf32>
    %361 = vector.shape_cast %360 : vector<1xf32> to vector<1x1xf32>
    %362 = tpu.reciprocal %361 {approx = true} : vector<1x1xf32> -> vector<1x1xf32>
    %363 = vector.broadcast %362 : vector<1x1xf32> to vector<8x1xf32>
    %364 = arith.mulf %359, %363 : vector<8x1xf32>
    %365 = vector.broadcast %364 : vector<8x1xf32> to vector<8x32xf32>
    %366 = arith.mulf %350, %365 : vector<8x32xf32>
    %cst_219 = arith.constant dense<0.000000e+00> : vector<32xf32>
    %367 = vector.multi_reduction <add>, %366, %cst_219 [0] : vector<8x32xf32> to vector<32xf32>
    %368 = vector.shape_cast %367 : vector<32xf32> to vector<1x32xf32>
    %c0_220 = arith.constant 0 : index
    %c0_221 = arith.constant 0 : index
    %369 = vector.load %arg31[%c0_220, %c0_221] : memref<32x256xf32, #tpu.memory_space<vmem>>, vector<32x256xf32>
    %cst_222 = arith.constant dense<0.000000e+00> : vector<1x256xf32>
    %370 = tpu.matmul %368, %369, %cst_222 {dimension_numbers = #tpu.dot_dimension_numbers<[1], [0], [0], [1], [0, 0, 1, 1], [], []>} : vector<1x32xf32>, vector<32x256xf32>, vector<1x256xf32> -> vector<1x256xf32>
    %c0_223 = arith.constant 0 : index
    %c0_224 = arith.constant 0 : index
    %371 = vector.load %arg32[%c0_223, %c0_224] : memref<1x256xf32, #tpu.memory_space<vmem>>, vector<1x256xf32>
    %372 = arith.addf %370, %371 : vector<1x256xf32>
    %cst_225 = arith.constant 0.000000e+00 : f32
    %373 = vector.broadcast %cst_225 : f32 to vector<1x256xf32>
    %374 = arith.maximumf %372, %373 : vector<1x256xf32>
    %c0_226 = arith.constant 0 : index
    %c0_227 = arith.constant 0 : index
    %375 = vector.load %arg33[%c0_226, %c0_227] : memref<256x1xf32, #tpu.memory_space<vmem>>, vector<256x1xf32>
    %cst_228 = arith.constant dense<0.000000e+00> : vector<1x1xf32>
    %376 = tpu.matmul %374, %375, %cst_228 {dimension_numbers = #tpu.dot_dimension_numbers<[1], [0], [0], [1], [0, 0, 1, 1], [], []>} : vector<1x256xf32>, vector<256x1xf32>, vector<1x1xf32> -> vector<1x1xf32>
    %c0_229 = arith.constant 0 : index
    %c0_230 = arith.constant 0 : index
    %377 = vector.load %arg34[%c0_229, %c0_230] : memref<1x1xf32, #tpu.memory_space<vmem>>, vector<1x1xf32>
    %378 = arith.addf %376, %377 : vector<1x1xf32>
    %c0_231 = arith.constant 0 : index
    %c0_232 = arith.constant 0 : index
    %c0_233 = arith.constant 0 : index
    %379 = vector.load %arg35[%c0_231, %c0_232, %c0_233] : memref<1x1x1xf32, #tpu.memory_space<vmem>>, vector<1x1x1xf32>
    %380 = vector.shape_cast %379 : vector<1x1x1xf32> to vector<1x1xf32>
    %381 = vector.shape_cast %378 : vector<1x1xf32> to vector<1x1x1xf32>
    tpu.vector_store %arg35[%c0_231, %c0_232, %c0_233], %381 {strides = array<i32>} : memref<1x1x1xf32, #tpu.memory_space<vmem>>, vector<1x1x1xf32>,
    return
  }
  func.func @transform_0(%arg0: i32) -> (i32, i32, i32) {
    %c0_i32 = arith.constant 0 : i32
    %c0_i32_0 = arith.constant 0 : i32
    %c0_i32_1 = arith.constant 0 : i32
    return %arg0, %c0_i32, %c0_i32_0 : i32, i32, i32
  }
  func.func @transform_1(%arg0: i32) -> (i32, i32, i32) {
    %c0_i32 = arith.constant 0 : i32
    %c0_i32_0 = arith.constant 0 : i32
    %c0_i32_1 = arith.constant 0 : i32
    return %arg0, %c0_i32, %c0_i32_0 : i32, i32, i32
  }
  func.func @transform_2(%arg0: i32) -> (i32, i32) {
    %c0_i32 = arith.constant 0 : i32
    %c0_i32_0 = arith.constant 0 : i32
    %c0_i32_1 = arith.constant 0 : i32
    return %c0_i32, %c0_i32_0 : i32, i32
  }
  func.func @transform_3(%arg0: i32) -> (i32, i32) {
    %c0_i32 = arith.constant 0 : i32
    %c0_i32_0 = arith.constant 0 : i32
    %c0_i32_1 = arith.constant 0 : i32
    return %c0_i32, %c0_i32_0 : i32, i32
  }
  func.func @transform_4(%arg0: i32) -> (i32, i32) {
    %c0_i32 = arith.constant 0 : i32
    %c0_i32_0 = arith.constant 0 : i32
    %c0_i32_1 = arith.constant 0 : i32
    return %c0_i32, %c0_i32_0 : i32, i32
  }
  func.func @transform_5(%arg0: i32) -> (i32, i32) {
    %c0_i32 = arith.constant 0 : i32
    %c0_i32_0 = arith.constant 0 : i32
    %c0_i32_1 = arith.constant 0 : i32
    return %c0_i32, %c0_i32_0 : i32, i32
  }
  func.func @transform_6(%arg0: i32) -> (i32, i32) {
    %c0_i32 = arith.constant 0 : i32
    %c0_i32_0 = arith.constant 0 : i32
    %c0_i32_1 = arith.constant 0 : i32
    return %c0_i32, %c0_i32_0 : i32, i32
  }
  func.func @transform_7(%arg0: i32) -> (i32, i32) {
    %c0_i32 = arith.constant 0 : i32
    %c0_i32_0 = arith.constant 0 : i32
    %c0_i32_1 = arith.constant 0 : i32
    return %c0_i32, %c0_i32_0 : i32, i32
  }
  func.func @transform_8(%arg0: i32) -> (i32, i32, i32) {
    %c0_i32 = arith.constant 0 : i32
    %c0_i32_0 = arith.constant 0 : i32
    %c0_i32_1 = arith.constant 0 : i32
    %c0_i32_2 = arith.constant 0 : i32
    return %c0_i32, %c0_i32_0, %c0_i32_1 : i32, i32, i32
  }
  func.func @transform_9(%arg0: i32) -> (i32, i32, i32) {
    %c0_i32 = arith.constant 0 : i32
    %c0_i32_0 = arith.constant 0 : i32
    %c0_i32_1 = arith.constant 0 : i32
    %c0_i32_2 = arith.constant 0 : i32
    return %c0_i32, %c0_i32_0, %c0_i32_1 : i32, i32, i32
  }
  func.func @transform_10(%arg0: i32) -> (i32, i32, i32) {
    %c0_i32 = arith.constant 0 : i32
    %c0_i32_0 = arith.constant 0 : i32
    %c0_i32_1 = arith.constant 0 : i32
    %c0_i32_2 = arith.constant 0 : i32
    return %c0_i32, %c0_i32_0, %c0_i32_1 : i32, i32, i32
  }
  func.func @transform_11(%arg0: i32) -> (i32, i32, i32) {
    %c0_i32 = arith.constant 0 : i32
    %c0_i32_0 = arith.constant 0 : i32
    %c0_i32_1 = arith.constant 0 : i32
    %c0_i32_2 = arith.constant 0 : i32
    return %c0_i32, %c0_i32_0, %c0_i32_1 : i32, i32, i32
  }
  func.func @transform_12(%arg0: i32) -> (i32, i32, i32) {
    %c0_i32 = arith.constant 0 : i32
    %c0_i32_0 = arith.constant 0 : i32
    %c0_i32_1 = arith.constant 0 : i32
    %c0_i32_2 = arith.constant 0 : i32
    return %c0_i32, %c0_i32_0, %c0_i32_1 : i32, i32, i32
  }
  func.func @transform_13(%arg0: i32) -> (i32, i32, i32) {
    %c0_i32 = arith.constant 0 : i32
    %c0_i32_0 = arith.constant 0 : i32
    %c0_i32_1 = arith.constant 0 : i32
    %c0_i32_2 = arith.constant 0 : i32
    return %c0_i32, %c0_i32_0, %c0_i32_1 : i32, i32, i32
  }
  func.func @transform_14(%arg0: i32) -> (i32, i32, i32) {
    %c0_i32 = arith.constant 0 : i32
    %c0_i32_0 = arith.constant 0 : i32
    %c0_i32_1 = arith.constant 0 : i32
    %c0_i32_2 = arith.constant 0 : i32
    return %c0_i32, %c0_i32_0, %c0_i32_1 : i32, i32, i32
  }
  func.func @transform_15(%arg0: i32) -> (i32, i32, i32) {
    %c0_i32 = arith.constant 0 : i32
    %c0_i32_0 = arith.constant 0 : i32
    %c0_i32_1 = arith.constant 0 : i32
    %c0_i32_2 = arith.constant 0 : i32
    return %c0_i32, %c0_i32_0, %c0_i32_1 : i32, i32, i32
  }
  func.func @transform_16(%arg0: i32) -> (i32, i32, i32) {
    %c0_i32 = arith.constant 0 : i32
    %c0_i32_0 = arith.constant 0 : i32
    %c0_i32_1 = arith.constant 0 : i32
    %c0_i32_2 = arith.constant 0 : i32
    return %c0_i32, %c0_i32_0, %c0_i32_1 : i32, i32, i32
  }
  func.func @transform_17(%arg0: i32) -> (i32, i32, i32) {
    %c0_i32 = arith.constant 0 : i32
    %c0_i32_0 = arith.constant 0 : i32
    %c0_i32_1 = arith.constant 0 : i32
    %c0_i32_2 = arith.constant 0 : i32
    return %c0_i32, %c0_i32_0, %c0_i32_1 : i32, i32, i32
  }
  func.func @transform_18(%arg0: i32) -> (i32, i32, i32) {
    %c0_i32 = arith.constant 0 : i32
    %c0_i32_0 = arith.constant 0 : i32
    %c0_i32_1 = arith.constant 0 : i32
    %c0_i32_2 = arith.constant 0 : i32
    return %c0_i32, %c0_i32_0, %c0_i32_1 : i32, i32, i32
  }
  func.func @transform_19(%arg0: i32) -> (i32, i32, i32) {
    %c0_i32 = arith.constant 0 : i32
    %c0_i32_0 = arith.constant 0 : i32
    %c0_i32_1 = arith.constant 0 : i32
    %c0_i32_2 = arith.constant 0 : i32
    return %c0_i32, %c0_i32_0, %c0_i32_1 : i32, i32, i32
  }
  func.func @transform_20(%arg0: i32) -> (i32, i32, i32) {
    %c0_i32 = arith.constant 0 : i32
    %c0_i32_0 = arith.constant 0 : i32
    %c0_i32_1 = arith.constant 0 : i32
    %c0_i32_2 = arith.constant 0 : i32
    return %c0_i32, %c0_i32_0, %c0_i32_1 : i32, i32, i32
  }
  func.func @transform_21(%arg0: i32) -> (i32, i32, i32) {
    %c0_i32 = arith.constant 0 : i32
    %c0_i32_0 = arith.constant 0 : i32
    %c0_i32_1 = arith.constant 0 : i32
    %c0_i32_2 = arith.constant 0 : i32
    return %c0_i32, %c0_i32_0, %c0_i32_1 : i32, i32, i32
  }
  func.func @transform_22(%arg0: i32) -> (i32, i32, i32) {
    %c0_i32 = arith.constant 0 : i32
    %c0_i32_0 = arith.constant 0 : i32
    %c0_i32_1 = arith.constant 0 : i32
    %c0_i32_2 = arith.constant 0 : i32
    return %c0_i32, %c0_i32_0, %c0_i32_1 : i32, i32, i32
  }
  func.func @transform_23(%arg0: i32) -> (i32, i32, i32) {
    %c0_i32 = arith.constant 0 : i32
    %c0_i32_0 = arith.constant 0 : i32
    %c0_i32_1 = arith.constant 0 : i32
    %c0_i32_2 = arith.constant 0 : i32
    return %c0_i32, %c0_i32_0, %c0_i32_1 : i32, i32, i32
  }
  func.func @transform_24(%arg0: i32) -> (i32, i32, i32) {
    %c0_i32 = arith.constant 0 : i32
    %c0_i32_0 = arith.constant 0 : i32
    %c0_i32_1 = arith.constant 0 : i32
    %c0_i32_2 = arith.constant 0 : i32
    return %c0_i32, %c0_i32_0, %c0_i32_1 : i32, i32, i32
  }
  func.func @transform_25(%arg0: i32) -> (i32, i32, i32) {
    %c0_i32 = arith.constant 0 : i32
    %c0_i32_0 = arith.constant 0 : i32
    %c0_i32_1 = arith.constant 0 : i32
    %c0_i32_2 = arith.constant 0 : i32
    return %c0_i32, %c0_i32_0, %c0_i32_1 : i32, i32, i32
  }
  func.func @transform_26(%arg0: i32) -> (i32, i32, i32) {
    %c0_i32 = arith.constant 0 : i32
    %c0_i32_0 = arith.constant 0 : i32
    %c0_i32_1 = arith.constant 0 : i32
    %c0_i32_2 = arith.constant 0 : i32
    return %c0_i32, %c0_i32_0, %c0_i32_1 : i32, i32, i32
  }
  func.func @transform_27(%arg0: i32) -> (i32, i32, i32) {
    %c0_i32 = arith.constant 0 : i32
    %c0_i32_0 = arith.constant 0 : i32
    %c0_i32_1 = arith.constant 0 : i32
    %c0_i32_2 = arith.constant 0 : i32
    return %c0_i32, %c0_i32_0, %c0_i32_1 : i32, i32, i32
  }
  func.func @transform_28(%arg0: i32) -> (i32, i32, i32) {
    %c0_i32 = arith.constant 0 : i32
    %c0_i32_0 = arith.constant 0 : i32
    %c0_i32_1 = arith.constant 0 : i32
    %c0_i32_2 = arith.constant 0 : i32
    return %c0_i32, %c0_i32_0, %c0_i32_1 : i32, i32, i32
  }
  func.func @transform_29(%arg0: i32) -> (i32, i32, i32) {
    %c0_i32 = arith.constant 0 : i32
    %c0_i32_0 = arith.constant 0 : i32
    %c0_i32_1 = arith.constant 0 : i32
    %c0_i32_2 = arith.constant 0 : i32
    return %c0_i32, %c0_i32_0, %c0_i32_1 : i32, i32, i32
  }
  func.func @transform_30(%arg0: i32) -> (i32, i32) {
    %c0_i32 = arith.constant 0 : i32
    %c0_i32_0 = arith.constant 0 : i32
    %c0_i32_1 = arith.constant 0 : i32
    return %c0_i32, %c0_i32_0 : i32, i32
  }
  func.func @transform_31(%arg0: i32) -> (i32, i32) {
    %c0_i32 = arith.constant 0 : i32
    %c0_i32_0 = arith.constant 0 : i32
    %c0_i32_1 = arith.constant 0 : i32
    return %c0_i32, %c0_i32_0 : i32, i32
  }
  func.func @transform_32(%arg0: i32) -> (i32, i32) {
    %c0_i32 = arith.constant 0 : i32
    %c0_i32_0 = arith.constant 0 : i32
    %c0_i32_1 = arith.constant 0 : i32
    return %c0_i32, %c0_i32_0 : i32, i32
  }
  func.func @transform_33(%arg0: i32) -> (i32, i32) {
    %c0_i32 = arith.constant 0 : i32
    %c0_i32_0 = arith.constant 0 : i32
    %c0_i32_1 = arith.constant 0 : i32
    return %c0_i32, %c0_i32_0 : i32, i32
  }
  func.func @transform_34(%arg0: i32) -> (i32, i32, i32) {
    %c0_i32 = arith.constant 0 : i32
    %c0_i32_0 = arith.constant 0 : i32
    %c0_i32_1 = arith.constant 0 : i32
    return %arg0, %c0_i32, %c0_i32_0 : i32, i32, i32
  }
}

</mosaic_0001>

<bundles_post_ra>
// kernel: tpu_custom_call.1
= control target key start
LH: loop header
LB: loop body
LE: loop exit
PB: predicated region body
PF: predicated region fallthrough
CT: control target
= control target key end

     0   :  { %s6154_s6 = smov 1   ;;  %s6155_s10 = smov 2   ;;  %s7262_s0 = inlined_call_operand.smem [shape: u32[35], index: -1, kind: input, shape index: {}] }
   0x1   :  { %s6216_s5 = sld [smem:[%s7262_s0]]   ;;  %s6156_s14 = smov 3  }
   0x2   :  { %s6221_s9 = sld [smem:[%s7262_s0 + %s6154_s6]]   ;;  %s6157_s18 = smov 4  }
   0x3   :  { %s6226_s13 = sld [smem:[%s7262_s0 + %s6155_s10]]   ;;  %s6158_s22 = smov 5  }
   0x4   :  { %s6231_s17 = sld [smem:[%s7262_s0 + %s6156_s14]]   ;;  %s6159_s26 = smov 6  }
   0x5   :  { %s6236_s21 = sld [smem:[%s7262_s0 + %s6157_s18]]   ;;  %s6160_s30 = smov 7  }
   0x6   :  { %s6241_s25 = sld [smem:[%s7262_s0 + %s6158_s22]]   ;;  %s6161_s4 = smov 8  }
   0x7   :  { %7291 = sst [smem:[#allocation31_spill]] %s6216_s5  ;;  %s6162_s10 = smov 9  }
   0x8   :  { %7292 = sst [smem:[#allocation32_spill]] %s6221_s9  ;;  %s6163_s15 = smov 10  }
   0x9   :  { %7293 = sst [smem:[#allocation33_spill]] %s6226_s13  ;;  %s6164_s20 = smov 11  }
   0xa   :  { %7294 = sst [smem:[#allocation34_spill]] %s6231_s17  ;;  %s6166_s1 = smov 13  }
   0xb   :  { %7295 = sst [smem:[#allocation35_spill]] %s6236_s21  ;;  %s6167_s7 = smov 14  }
   0xc   :  { %7296 = sst [smem:[#allocation36_spill]] %s6241_s25  ;;  %s6169_s22 = smov 16  }
   0xd   :  { %s6246_s29 = sld [smem:[%s7262_s0 + %s6159_s26]]   ;;  %s6165_s26 = smov 12  }
   0xe   :  { %s6251_s3 = sld [smem:[%s7262_s0 + %s6160_s30]]   ;;  %s6170_s28 = smov 17  }
   0xf   :  { %s6256_s8 = sld [smem:[%s7262_s0 + %s6161_s4]]  }
  0x10   :  { %s6261_s14 = sld [smem:[%s7262_s0 + %s6162_s10]]   ;;  %s6187_s10 = smov 34  }
  0x11   :  { %s6266_s19 = sld [smem:[%s7262_s0 + %s6163_s15]]   ;;  %s6168_s15 = smov 15  }
  0x12   :  { %s6271_s24 = sld [smem:[%s7262_s0 + %s6164_s20]]  }
  0x13   :  { %s6276_s30 = sld [smem:[%s7262_s0 + %s6165_s26]]  }
  0x14   :  { %7297 = sst [smem:[#allocation37_spill]] %s6251_s3 }
  0x15   :  { %7298 = sst [smem:[#allocation38_spill]] %s6256_s8 }
  0x16   :  { %7299 = sst [smem:[#allocation39_spill]] %s6261_s14 }
  0x17   :  { %s6281_s6 = sld [smem:[%s7262_s0 + %s6166_s1]]  }
  0x18   :  { %7300 = sst [smem:[#allocation40_spill]] %s6271_s24 }
  0x19   :  { %7301 = sst [smem:[#allocation41_spill]] %s6276_s30 }
  0x1a   :  { %s6286_s12 = sld [smem:[%s7262_s0 + %s6167_s7]]   ;;  %s6171_s7 = smov 18  }
  0x1b   :  { %s6291_s20 = sld [smem:[%s7262_s0 + %s6168_s15]]   ;;  %s6172_s15 = smov 19  }
  0x1c   :  { %s6296_s27 = sld [smem:[%s7262_s0 + %s6169_s22]]   ;;  %s6173_s22 = smov 20  }
  0x1d   :  { %7302 = sst [smem:[#allocation42_spill]] %s6281_s6 }
  0x1e   :  { %s6301_s4 = sld [smem:[%s7262_s0 + %s6170_s28]]   ;;  %s6174_s28 = smov 21  }
  0x1f   :  { %s6306_s25 = sld [smem:[%s7262_s0 + %s6171_s7]]   ;;  %s6175_s7 = smov 22  }
  0x20   :  { %7303 = sst [smem:[#allocation43_spill]] %s6286_s12 }
  0x21   :  { %s6311_s14 = sld [smem:[%s7262_s0 + %s6172_s15]]   ;;  %s6176_s15 = smov 23  }
  0x22   :  { %7304 = sst [smem:[#allocation44_spill]] %s6296_s27 }
  0x23   :  { %s6316_s8 = sld [smem:[%s7262_s0 + %s6173_s22]]   ;;  %s6177_s22 = smov 24  }
  0x24   :  { %7305 = sst [smem:[#allocation45_spill]] %s6301_s4 }
  0x25   :  { %7306 = sst [smem:[#allocation46_spill]] %s6306_s25 }
  0x26   :  { %s6321_s21 = sld [smem:[%s7262_s0 + %s6174_s28]]   ;;  %s6178_s28 = smov 25  }
  0x27   :  { %7307 = sst [smem:[#allocation47_spill]] %s6311_s14 }
  0x28   :  { %s6326_s25 = sld [smem:[%s7262_s0 + %s6175_s7]]   ;;  %s6179_s7 = smov 26  }
  0x29   :  { %7308 = sst [smem:[#allocation48_spill]] %s6316_s8 }
  0x2a   :  { %s6331_s27 = sld [smem:[%s7262_s0 + %s6176_s15]]   ;;  %s6180_s15 = smov 27  }
  0x2b   :  { %s6336_s8 = sld [smem:[%s7262_s0 + %s6177_s22]]   ;;  %s6181_s22 = smov 28  }
  0x2c   :  { %s6341_s24 = sld [smem:[%s7262_s0 + %s6178_s28]]   ;;  %s6182_s28 = smov 29  }
  0x2d   :  { %s6384_s30 = sld [smem:[%s7262_s0 + %s6187_s10]]  }
  0x2e   :  { %7309 = sst [smem:[#allocation49_spill]] %s6326_s25 }
  0x2f   :  { %s6346_s25 = sld [smem:[%s7262_s0 + %s6179_s7]]   ;;  %s6183_s7 = smov 30  }
  0x30   :  { %7310 = sst [smem:[#allocation50_spill]] %s6331_s27 }
  0x31   :  { %7311 = sst [smem:[#allocation51_spill]] %s6336_s8 }
  0x32   :  { %7312 = sst [smem:[#allocation52_spill]] %s6341_s24 }
  0x33   :  { %s6351_s27 = sld [smem:[%s7262_s0 + %s6180_s15]]   ;;  %s6184_s15 = smov 31  }
  0x34   :  { %s6356_s8 = sld [smem:[%s7262_s0 + %s6181_s22]]   ;;  %s6185_s22 = smov 32  }
  0x35   :  { %s6361_s24 = sld [smem:[%s7262_s0 + %s6182_s28]]   ;;  %s6186_s28 = smov 33  }
  0x36   :  { %s6366_s12 = sld [smem:[%s7262_s0 + %s6183_s7]]  }
  0x37   :  { %7317 = sst [smem:[#allocation57_spill]] %s6384_s30 }
  0x39   :  { %7313 = sst [smem:[#allocation53_spill]] %s6351_s27 }
  0x3a   :  { %7314 = sst [smem:[#allocation54_spill]] %s6356_s8 }
  0x3b   :  { %7315 = sst [smem:[#allocation55_spill]] %s6361_s24 }
  0x3c   :  { %7316 = sst [smem:[#allocation56_spill]] %s6366_s12 }
  0x3d   :  { %s6371_s27 = sld [smem:[%s7262_s0 + %s6184_s15]]  }
  0x3e   :  { %s6376_s8 = sld [smem:[%s7262_s0 + %s6185_s22]]  }
  0x3f   :  { %s4688_s24 = sld [smem:[%s7262_s0 + %s6186_s28]]  }
  0x45   :  { %v74_v0 = vstv %s4688_s24 }
  0x46   :  { %75 = vst [vmem:[#allocation2] sm:$0x1] %v74_v0 }
  0x47   :  { %76 = vsyncpa [#allocation4], 0 }
  0x48   :  { %78 = vsyncpa [#allocation4 + $0x1], 0 }
  0x49   :  { %79 = vsyncpa [#allocation6], 0 }
  0x4a   :  { %81 = vsyncpa [#allocation6 + $0x1], 0 }
  0x4b   :  { %82 = vsyncpa [#allocation9], 0 }
  0x4c   :  { %83 = vsyncpa [#allocation12], 0 }
  0x4d   :  { %84 = vsyncpa [#allocation15], 0 }
  0x4e   :  { %85 = vsyncpa [#allocation18], 0 }
  0x4f   :  { %86 = vsyncpa [#allocation21], 0  ;;  %s6386_s15 = smov 0   ;;  %s6388_s16 = smov 0  }
  0x50   :  { %s6390_s18 = smov 0   ;;  %s6392_s22 = smov 0  }
  0x51 LB: > { %s7318_s9 = sld [smem:[#allocation32_spill]]  ;;  %s6188_s0 = smov [#allocation7]   ;;  %s6144_s16 = sphi %s6388_s16, %s7372_s16   ;;  %s6140_s15 = sphi %s6386_s15, %s7371_s15   ;;  %s6152_s22 = sphi %s6392_s22, %s7374_s22   ;;  %s6148_s18 = sphi %s6390_s18, %s7373_s18  }
  0x52   : > { %s7319_s5 = sld [smem:[#allocation31_spill]]  ;;  %s859_s24 = sshll.u32 %s6188_s0, 4  ;;  %s860_s24 = int_to_ptr.vmem [resolvable:$true] %s859_s24 }
  0x53   : > { %s6407_s23 = sadd.s32 4294967295, %s6152_s22   ;;  %p4692_p0 = scmp.ge.s32.totalorder %s6152_s22, 1 }
  0x54   : > { %p7284_p1 = scmp.eq.s32.totalorder %s6407_s23, 0  ;;  %p847_p2 = scmp.lt.s32.totalorder %s6152_s22, 3 }
  0x55   : > { %s6189_s28 = smov [#allocation8]   ;;  %s6190_s10 = smov [#allocation11]  }
  0x56   : > { %p6412_p3 = pnand %p4692_p0, %p847_p2  ;;  %s872_s1 = sshll.u32 %s6189_s28, 4  ;;  %s6424_s1 = int_to_ptr.vmem [resolvable:$true] %s872_s1 }
  0x57   : > { %s905_s7 = sshll.u32 %s6190_s10, 4  ;;  %s5759_s0 = scalar_lea.vmem %s860_s24, 512  ;;  %s6426_s7 = int_to_ptr.vmem [resolvable:$true] %s905_s7 }
  0x58   : > { %s7320_s26 = scalar_select %p6412_p3, 1, 0 }
  0x59   : > { %p5566_p4 = pneg %p6412_p3  ;;  %p5760_p7 = scmp.ne.s32.totalorder %s860_s24, %s5759_s0 }
  0x5a   : > { %p5767_p10 = scmp.lt.s32.totalorder %s860_s24, %s860_s24  ;;  %p5768_p11 = scmp.lt.s32.totalorder %s5759_s0, %s5759_s0 }
  0x5b   : > { %p6420_p5 = pnand %p5566_p4, %p7284_p1 }
  0x5c   : > { %p5769_p12 = por %p5768_p11, %p5767_p10 }
  0x5d   : > { %p6430_p6 = pneg %p6420_p5 }
  0x5f   : > { %p5762_p8 = pnand %p5760_p7, %p6430_p6 }
  0x61   : > { %p5763_p9 = pneg %p5762_p8 }
  0x63   : > { %p5770_p13 = pnand %p5769_p12, %p5763_p9 }
  0x65   : > { %5773 = shalt.err (!%p5770_p13)
}
  0x66   : > { %s7280_s28 = smov 128   ;;  %s7323_s13 = sld [smem:[#allocation33_spill]] }
  0x67   : > { %s7282_s10 = smov 8   ;;  %s5785_s30 = scalar_lea.vmem %s6424_s1, 512 }
  0x68   : > { %p5786_p0 = scmp.ne.s32.totalorder %s6424_s1, %s5785_s30  ;;  %p5793_p7 = scmp.lt.s32.totalorder %s6424_s1, %s6424_s1 }
  0x69   : > { %p5794_p8 = scmp.lt.s32.totalorder %s5785_s30, %s5785_s30 }
  0x6a   : > { %p5788_p2 = pnand %p5786_p0, %p6430_p6 }
  0x6b   : > { %p5795_p9 = por %p5794_p8, %p5793_p7 }
  0x6c   : > { %5569 = dma.hbm_to_vmem [thread:$0]  (!%p6420_p5), %s7323_s13, 512, %s860_s24, [#allocation6], %s7280_s28, %s7280_s28, %s7282_s10  }
  0x6d   : > { %p5789_p4 = pneg %p5788_p2 }
  0x6f   : > { %p5796_p10 = pnand %p5795_p9, %p5789_p4 }
  0x71   : > { %5799 = shalt.err (!%p5796_p10)
}
  0x72   : > { %s7324_s17 = sld [smem:[#allocation34_spill]]  ;;  %s5811_s24 = scalar_lea.vmem %s6426_s7, 16 }
  0x73   : > { %p5812_p11 = scmp.ne.s32.totalorder %s6426_s7, %s5811_s24  ;;  %s5818_s30 = scalar_lea.vmem %s6426_s7, 32 }
  0x74   : > { %p5819_p0 = scmp.lt.s32.totalorder %s6426_s7, %s6426_s7  ;;  %p5820_p2 = scmp.lt.s32.totalorder %s5818_s30, %s5811_s24 }
  0x75   : > { %p5814_p12 = pnand %p5812_p11, %p6430_p6 }
  0x76   : > { %p5821_p4 = por %p5820_p2, %p5819_p0 }
  0x77   : > { %p5815_p13 = pneg %p5814_p12 }
  0x78   : > { %5572 = dma.hbm_to_vmem [thread:$0]  (!%p6420_p5), %s7324_s17, 512, %s6424_s1, [#allocation9], %s7280_s28, %s7280_s28, %s7282_s10  }
  0x79   : > { %p5822_p7 = pnand %p5821_p4, %p5815_p13 }
  0x7b   : > { %5825 = shalt.err (!%p5822_p7)
}
  0x7c   : > { %s7325_s3 = sld [smem:[#allocation37_spill]]  ;;  %s6193_s0 = smov [#allocation14]  }
  0x7d   : > { %s946_s1 = sshll.u32 %s6193_s0, 4  ;;  %s6194_s28 = smov [#allocation17]   ;;  %s947_s1 = int_to_ptr.vmem [resolvable:$true] %s946_s1 }
  0x7e   : > { %s978_s10 = sshll.u32 %s6194_s28, 4  ;;  %s5837_s13 = scalar_lea.vmem %s947_s1, 32  ;;  %s979_s10 = int_to_ptr.vmem [resolvable:$true] %s978_s10 }
  0x7f   : > { %p5838_p8 = scmp.ne.s32.totalorder %s947_s1, %s5837_s13  ;;  %p5845_p11 = scmp.lt.s32.totalorder %s947_s1, %s947_s1 }
  0x80   : > { %p5846_p12 = scmp.lt.s32.totalorder %s5837_s13, %s5837_s13 }
  0x81   : > { %p5840_p9 = pnand %p5838_p8, %p6430_p6 }
  0x82   : > { %5578 = dma.hbm_to_vmem [thread:$0]  (!%p6420_p5), %s7325_s3, 16, %s6426_s7, [#allocation12]  }
  0x83   : > { %p5841_p10 = pneg %p5840_p9  ;;  %p5847_p13 = por %p5846_p12, %p5845_p11 }
  0x85   : > { %p5848_p0 = pnand %p5847_p13, %p5841_p10 }
  0x87   : > { %5851 = shalt.err (!%p5848_p0)
}
  0x88   : > { %s7285_s24 = smov 16   ;;  %s6196_s7 = smov 1  }
  0x89   : > { %5584 = dma.hbm_to_vmem [thread:$0]  (!%p6420_p5), %s6291_s20, 32, %s947_s1, [#allocation15], %s7285_s24, %s7285_s24, %s6196_s7  }
  0x8a   : > { %s5863_s28 = scalar_lea.vmem %s979_s10, 32  ;;  %p5871_p8 = scmp.lt.s32.totalorder %s979_s10, %s979_s10 }
  0x8b   : > { %p5864_p2 = scmp.ne.s32.totalorder %s979_s10, %s5863_s28  ;;  %p5872_p9 = scmp.lt.s32.totalorder %s5863_s28, %s5863_s28 }
  0x8d   : > { %p5866_p4 = pnand %p5864_p2, %p6430_p6  ;;  %p5873_p10 = por %p5872_p9, %p5871_p8 }
  0x8f   : > { %p5867_p7 = pneg %p5866_p4 }
  0x91   : > { %p5874_p11 = pnand %p5873_p10, %p5867_p7 }
  0x93   : > { %5877 = shalt.err (!%p5874_p11)
}
  0x94   : > { %s7326_s14 = sld [smem:[#allocation47_spill]]  ;;  %s6197_s13 = smov [#allocation20]  }
  0x95   : > { %s1019_s30 = sshll.u32 %s6197_s13, 4  ;;  %s6198_s0 = smov [#allocation10]   ;;  %s1020_s30 = int_to_ptr.vmem [resolvable:$true] %s1019_s30 }
  0x96   : > { %s891_s1 = sshll.u32 %s6198_s0, 4  ;;  %s5889_s3 = scalar_lea.vmem %s1020_s30, 1024  ;;  %s892_s1 = int_to_ptr.vmem [resolvable:$true] %s891_s1 }
  0x97   : > { %p5890_p12 = scmp.ne.s32.totalorder %s1020_s30, %s5889_s3  ;;  %p5897_p2 = scmp.lt.s32.totalorder %s1020_s30, %s1020_s30 }
  0x98   : > { %p5898_p4 = scmp.lt.s32.totalorder %s5889_s3, %s5889_s3 }
  0x99   : > { %p5892_p13 = pnand %p5890_p12, %p6430_p6 }
  0x9a   : > { %5590 = dma.hbm_to_vmem [thread:$0]  (!%p6420_p5), %s7326_s14, 32, %s979_s10, [#allocation18], %s7285_s24, %s7285_s24, %s6196_s7  }
  0x9b   : > { %p5893_p0 = pneg %p5892_p13  ;;  %p5899_p7 = por %p5898_p4, %p5897_p2 }
  0x9d   : > { %p5900_p8 = pnand %p5899_p7, %p5893_p0 }
  0x9f   : > { %5903 = shalt.err (!%p5900_p8)
}
  0xa0   : > { %s7327_s28 = smov 8   ;;  %s7328_s17 = smov 128  }
  0xa1   : > { %5596 = dma.hbm_to_vmem [thread:$0]  (!%p6420_p5), %s6346_s25, 1024, %s1020_s30, [#allocation21], %s7328_s17, %s7328_s17, %s7327_s28  }
  0xa2   : > { %s5915_s10 = scalar_lea.vmem %s892_s1, 256  ;;  %p5923_p12 = scmp.lt.s32.totalorder %s892_s1, %s892_s1 }
  0xa3   : > { %p5916_p9 = scmp.ne.s32.totalorder %s892_s1, %s5915_s10  ;;  %p5924_p13 = scmp.lt.s32.totalorder %s5915_s10, %s5915_s10 }
  0xa5   : > { %p5918_p10 = pnand %p5916_p9, %p6430_p6  ;;  %p5925_p1 = por %p5924_p13, %p5923_p12 }
  0xa7   : > { %p5919_p11 = pneg %p5918_p10 }
  0xa9   : > { %p5926_p2 = pnand %p5925_p1, %p5919_p11 }
  0xab   : > { %5929 = shalt.err (!%p5926_p2)
}
  0xac   : > { %5575 = dma.hbm_to_vmem [thread:$0]  (!%p6420_p5), %s6246_s29, 256, %s892_s1, [#allocation9], %s7328_s17, %s7328_s17, %s7327_s28  }
  0xad   : > { %s6199_s3 = smov [#allocation13]   ;;  %s6200_s30 = smov [#allocation16]  }
  0xae   : > { %s930_s13 = sshll.u32 %s6199_s3, 4  ;;  %s962_s0 = sshll.u32 %s6200_s30, 4  ;;  %s931_s13 = int_to_ptr.vmem [resolvable:$true] %s930_s13  ;;  %s963_s0 = int_to_ptr.vmem [resolvable:$true] %s962_s0 }
  0xaf   : > { %s5941_s24 = scalar_lea.vmem %s931_s13, 32  ;;  %p5949_p1 = scmp.lt.s32.totalorder %s931_s13, %s931_s13 }
  0xb0   : > { %p5942_p0 = scmp.ne.s32.totalorder %s931_s13, %s5941_s24  ;;  %p5950_p8 = scmp.lt.s32.totalorder %s5941_s24, %s5941_s24 }
  0xb2   : > { %p5944_p4 = pnand %p5942_p0, %p6430_p6  ;;  %p5951_p9 = por %p5950_p8, %p5949_p1 }
  0xb4   : > { %p5945_p7 = pneg %p5944_p4 }
  0xb6   : > { %p5952_p10 = pnand %p5951_p9, %p5945_p7 }
  0xb8   : > { %5955 = shalt.err (!%p5952_p10)
}
  0xb9   : > { %s7329_s10 = smov 16   ;;  %s7330_s6 = sld [smem:[#allocation42_spill]] }
  0xba   : > { %s5967_s1 = scalar_lea.vmem %s963_s0, 32  ;;  %p5975_p2 = scmp.lt.s32.totalorder %s963_s0, %s963_s0 }
  0xbb   : > { %p5968_p11 = scmp.ne.s32.totalorder %s963_s0, %s5967_s1  ;;  %p5976_p0 = scmp.lt.s32.totalorder %s5967_s1, %s5967_s1 }
  0xbd   : > { %p5970_p12 = pnand %p5968_p11, %p6430_p6  ;;  %p5977_p4 = por %p5976_p0, %p5975_p2 }
  0xbf   : > { %5581 = dma.hbm_to_vmem [thread:$0]  (!%p6420_p5), %s7330_s6, 32, %s931_s13, [#allocation12], %s7329_s10, %s7329_s10, %s6196_s7  }
  0xc0   : > { %p5971_p13 = pneg %p5970_p12 }
  0xc2   : > { %p5978_p1 = pnand %p5977_p4, %p5971_p13 }
  0xc4   : > { %5981 = shalt.err (!%p5978_p1)
}
  0xc5   : > { %s7331_s4 = sld [smem:[#allocation45_spill]]  ;;  %s6201_s24 = smov [#allocation19]  }
  0xc6   : > { %s994_s3 = sshll.u32 %s6201_s24, 4  ;;  %s6202_s13 = smov [#allocation22]   ;;  %s995_s3 = int_to_ptr.vmem [resolvable:$true] %s994_s3 }
  0xc7   : > { %s1041_s30 = sshll.u32 %s6202_s13, 4  ;;  %s5993_s6 = scalar_lea.vmem %s995_s3, 32  ;;  %s1042_s30 = int_to_ptr.vmem [resolvable:$true] %s1041_s30 }
  0xc8   : > { %p5994_p7 = scmp.ne.s32.totalorder %s995_s3, %s5993_s6  ;;  %p6001_p10 = scmp.lt.s32.totalorder %s995_s3, %s995_s3 }
  0xc9   : > { %p6002_p11 = scmp.lt.s32.totalorder %s5993_s6, %s5993_s6 }
  0xca   : > { %p5996_p8 = pnand %p5994_p7, %p6430_p6 }
  0xcb   : > { %5587 = dma.hbm_to_vmem [thread:$0]  (!%p6420_p5), %s7331_s4, 32, %s963_s0, [#allocation15], %s7329_s10, %s7329_s10, %s6196_s7  }
  0xcc   : > { %p5997_p9 = pneg %p5996_p8  ;;  %p6003_p12 = por %p6002_p11, %p6001_p10 }
  0xce   : > { %p6004_p13 = pnand %p6003_p12, %p5997_p9 }
  0xd0   : > { %6007 = shalt.err (!%p6004_p13)
}
  0xd1   : > { %5593 = dma.hbm_to_vmem [thread:$0]  (!%p6420_p5), %s6321_s21, 32, %s995_s3, [#allocation18], %s7329_s10, %s7329_s10, %s6196_s7  }
  0xd2   : > { %s6019_s0 = scalar_lea.vmem %s1042_s30, 1024  ;;  %p6027_p1 = scmp.lt.s32.totalorder %s1042_s30, %s1042_s30 }
  0xd3   : > { %p6020_p2 = scmp.ne.s32.totalorder %s1042_s30, %s6019_s0  ;;  %p6028_p7 = scmp.lt.s32.totalorder %s6019_s0, %s6019_s0 }
  0xd5   : > { %p6022_p0 = pnand %p6020_p2, %p6430_p6  ;;  %p6029_p8 = por %p6028_p7, %p6027_p1 }
  0xd7   : > { %p6023_p4 = pneg %p6022_p0 }
  0xd9   : > { %p6030_p10 = pnand %p6029_p8, %p6023_p4 }
  0xdb   : > { %6033 = shalt.err (!%p6030_p10)
}
  0xdc   : > { %s6203_s6 = smov 256   ;;  %s7332_s12 = sld [smem:[#allocation56_spill]] }
  0xdd   : > { %s6529_s11 = sadd.s32 1, %s6152_s22   ;;  %s99_s2 = sadd.s32 1, %s6148_s18 }
  0xde   : > { %s96_s7 = ssub.s32 %s6152_s22, %s6529_s11  ;;  %p106_p6 = scmp.ne.s32.totalorder %s6148_s18, %s6144_s16 }
  0xdf   : > { %p97_p9 = scmp.eq.s32.totalorder %s96_s7, 0  ;;  %p107_p11 = scmp.eq.s32.totalorder %s6152_s22, 0 }
  0xe0   : > { %p112_p12 = scmp.ne.s32.totalorder %s6144_s16, %s6140_s15  ;;  %p5618_p13 = scmp.lt.s32.totalorder %s6152_s22, 2 }
  0xe1   : > { %s6541_s1 = scalar_select %p97_p9, %s6148_s18, %s99_s2  }
  0xe2   : > { %5599 = dma.hbm_to_vmem [thread:$0]  (!%p6420_p5), %s7332_s12, 1024, %s1042_s30, [#allocation21], %s6203_s6, %s6203_s6, %s7329_s10  }
  0xe3   : > { %p108_p2 = por %p107_p11, %p106_p6  ;;  %p7333_p0 = scmp.eq.s32.totalorder %s6407_s23, 0 }
  0xe4   : > { %s6550_s10 = sand.u32 1, %s6148_s18   ;;  %s4706_s3 = sshll.u32 %s6152_s22, 7 }
  0xe5   : > { %p6545_p4 = por %p7333_p0, %p112_p12  ;;  %s4705_s13 = sshll.u32 %s6550_s10, 3 }
  0xe6   : > { %s6555_s30 = scalar_lea.hbm %s7319_s5, %s4706_s3  ;;  %s1068_s15 = scalar_lea.vmem [#allocation3], %s4705_s13 }
  0xe7   : > { %s7334_s24 = scalar_select %p6545_p4, 1, 0 }
  0xe8   : > { %s1075_s0 = sshll.u32 %s1068_s15, 4  ;;  %p6557_p5 = pnand %p5618_p13, %p108_p2  ;;  %s1076_s0 = int_to_ptr.vmem [resolvable:$true] %s1075_s0 }
  0xe9   : > { %s4707_s2 = sshll.u32 %s6550_s10, 4  ;;  %s1065_s7 = scalar_lea.sflag [#allocation4], %s6550_s10 }
  0xea   : > { %s6034_s4 = scalar_lea.hbm %s6555_s30, 128  ;;  %p6036_p7 = pneg %p6557_p5 }
  0xeb   : > { %p6035_p1 = scmp.ne.s32.totalorder %s6555_s30, %s6034_s4  ;;  %s6039_s3 = scalar_lea.hbm %s7319_s5, 256 }
  0xec   : > { %p6040_p6 = scmp.lt.s32.totalorder %s6555_s30, %s7319_s5  ;;  %p6041_p9 = scmp.lt.s32.totalorder %s6039_s3, %s6034_s4 }
  0xed   : > { %p6037_p8 = pnand %p6036_p7, %p6035_p1 }
  0xee   : > { %p6042_p11 = por %p6041_p9, %p6040_p6 }
  0xef   : > { %p6038_p10 = pneg %p6037_p8 }
  0xf1   : > { %p6043_p12 = pnand %p6042_p11, %p6038_p10 }
  0xf3   : > { %6046 = shalt.err (!%p6043_p12)
}
  0xf4   : > { %s6047_s13 = scalar_lea.vmem %s1076_s0, 128  ;;  %s6204_s10 = smov [#allocation3]  }
  0xf5   : > { %p6048_p13 = scmp.ne.s32.totalorder %s1076_s0, %s6047_s13  ;;  %s6052_s15 = sshll.u32 %s6204_s10, 4  ;;  %s6053_s15 = int_to_ptr.vmem [resolvable:$false] %s6052_s15 }
  0xf6   : > { %s6054_s12 = scalar_lea.vmem %s6053_s15, 256  ;;  %p6055_p4 = scmp.lt.s32.totalorder %s1076_s0, %s6053_s15 }
  0xf7   : > { %p6050_p2 = pnand %p6048_p13, %p6036_p7  ;;  %p6056_p1 = scmp.lt.s32.totalorder %s6054_s12, %s6047_s13 }
  0xf9   : > { %p6051_p0 = pneg %p6050_p2  ;;  %p6057_p8 = por %p6056_p1, %p6055_p4 }
  0xfb   : > { %p6058_p3 = pnand %p6057_p8, %p6051_p0 }
  0xfd   : > { %6061 = shalt.err (!%p6058_p3)
}
  0xfe   : > { %5603 = dma.hbm_to_vmem [thread:$0]  (!%p6557_p5), %s6555_s30, 128, %s1076_s0, %s1065_s7  }
  0xff   : > { %s1086_s4 = scalar_lea.vmem [#allocation5], %s4707_s2  ;;  %s1082_s10 = sand.u32 1, %s6152_s22  }
 0x100   : > { %s1093_s3 = sshll.u32 %s1086_s4, 4  ;;  %s4860_s15 = sshll.u32 %s6152_s22, 8  ;;  %s6580_s3 = int_to_ptr.vmem [resolvable:$true] %s1093_s3 }
 0x101   : > { %s6584_s12 = scalar_lea.hbm %s7318_s9, %s4860_s15  ;;  %s1083_s13 = scalar_lea.sflag [#allocation6], %s1082_s10 }
 0x102   : > { %s6062_s5 = scalar_lea.hbm %s6584_s12, 256  ;;  %s6067_s14 = scalar_lea.hbm %s7318_s9, 512 }
 0x103   : > { %p6063_p3 = scmp.ne.s32.totalorder %s6584_s12, %s6062_s5  ;;  %p6068_p6 = scmp.lt.s32.totalorder %s6584_s12, %s7318_s9 }
 0x104   : > { %p6069_p9 = scmp.lt.s32.totalorder %s6067_s14, %s6062_s5 }
 0x105   : > { %p6065_p4 = pnand %p6063_p3, %p6036_p7 }
 0x106   : > { %p6070_p11 = por %p6069_p9, %p6068_p6 }
 0x107   : > { %p6066_p10 = pneg %p6065_p4 }
 0x109   : > { %p6071_p12 = pnand %p6070_p11, %p6066_p10 }
 0x10b   : > { %6074 = shalt.err (!%p6071_p12)
}
 0x10c   : > { %s6075_s22 = scalar_lea.vmem %s6580_s3, 256  ;;  %s6205_s30 = smov [#allocation5]  }
 0x10d   : > { %p6076_p13 = scmp.ne.s32.totalorder %s6580_s3, %s6075_s22  ;;  %s6080_s0 = sshll.u32 %s6205_s30, 4  ;;  %s6081_s0 = int_to_ptr.vmem [resolvable:$false] %s6080_s0 }
 0x10e   : > { %s6082_s2 = scalar_lea.vmem %s6081_s0, 512  ;;  %p6083_p1 = scmp.lt.s32.totalorder %s6580_s3, %s6081_s0 }
 0x10f   : > { %p6078_p2 = pnand %p6076_p13, %p6036_p7  ;;  %p6084_p8 = scmp.lt.s32.totalorder %s6082_s2, %s6075_s22 }
 0x111   : > { %p6079_p0 = pneg %p6078_p2  ;;  %p6085_p3 = por %p6084_p8, %p6083_p1 }
 0x113   : > { %p6086_p4 = pnand %p6085_p3, %p6079_p0 }
 0x115   : > { %6089 = shalt.err (!%p6086_p4)
}
 0x116   : > { %5606 = dma.hbm_to_vmem [thread:$0]  (!%p6557_p5), %s6584_s12, 256, %s6580_s3, %s1083_s13, %s7328_s17, %s7328_s17, %s7327_s28  }
 0x117   : > { %p7336_p7 = scmp.ne.s32.totalorder %s7320_s26, 0 }
 0x118   : > { %s1107_s5 = sand.u32 (!%p7336_p7), 1, %s6144_s16   ;;  %p7337_p10 = scmp.ne.s32.totalorder (!%p7336_p7), %s7334_s24, 0 }
 0x119   : > { %1105 = sbr.rel (%p7336_p7) target bundleno = 8396 (0x20cc), region = 156  ;;  %s4711_s14 = sshll.u32 (!%p7336_p7), %s1107_s5, 3 }
 0x11a   : > { %s1108_s7 = scalar_lea.sflag (!%p7336_p7), [#allocation4], %s1107_s5  ;;  %s1111_s4 = scalar_lea.vmem (!%p7336_p7), [#allocation3], %s4711_s14 }
 0x11e   : > { %6107 = dma.done.wait (%p7337_p10), %s1108_s7, 128  }
 0x11f   : > { %6109 = vsyncadd (%p7337_p10), %s1108_s7, 4294967168  ;;  %s1116_s6 = sand.u32 1, %s6407_s23   ;;  %s4712_s10 = sshll.u32 %s1107_s5, 4 }
 0x120   : > { %s1117_s15 = scalar_lea.sflag [#allocation6], %s1116_s6  ;;  %s6615_s17 = scalar_lea.vmem [#allocation5], %s4712_s10 }
 0x121   : > { %6111 = dma.done.wait (%p7337_p10), %s1117_s15, 256  }
 0x122   : > { %6113 = vsyncadd (%p7337_p10), %s1117_s15, 4294967040  ;;  %p7338_p5 = scmp.eq.s32.totalorder %s6407_s23, 0 }
 0x124   : > { %6115 = dma.done.wait (%p7338_p5), [#allocation6], 512   ;;  %p7339_p6 = pmov %p7338_p5 }
 0x125   : > { %p7340_p9 = pmov %p7338_p5 }
 0x126   : > { %6117 = vsyncadd (%p7339_p6), [#allocation6], 4294966784 }
 0x127   : > { %6119 = dma.done.wait (%p7340_p9), [#allocation9], 768   ;;  %p7341_p11 = pmov %p7338_p5 }
 0x128   : > { %p7342_p12 = pmov %p7338_p5 }
 0x129   : > { %6121 = vsyncadd (%p7341_p11), [#allocation9], 4294966528 }
 0x12a   : > { %6123 = dma.done.wait (%p7342_p12), [#allocation12], 48   ;;  %p7343_p13 = pmov %p7338_p5 }
 0x12b   : > { %p7344_p2 = pmov %p7338_p5 }
 0x12c   : > { %6125 = vsyncadd (%p7343_p13), [#allocation12], 4294967248 }
 0x12d   : > { %6127 = dma.done.wait (%p7344_p2), [#allocation15], 64   ;;  %p7345_p0 = pmov %p7344_p2 }
 0x12f   : > { %6129 = vsyncadd (%p7345_p0), [#allocation15], 4294967232  ;;  %p7346_p1 = pmov %p7345_p0 }
 0x130   : > { %p7347_p8 = pmov %p7345_p0 }
 0x131   : > { %6131 = dma.done.wait (%p7346_p1), [#allocation18], 64  }
 0x132   : > { %6133 = vsyncadd (%p7347_p8), [#allocation18], 4294967232  ;;  %p7348_p3 = pmov %p7345_p0 }
 0x133   : > { %p7349_p4 = pmov %p7345_p0 }
 0x134   : > { %6135 = dma.done.wait (%p7348_p3), [#allocation21], 2048  }
 0x135   : > { %6137 = vsyncadd (%p7349_p4), [#allocation21], 4294965248  ;;  %s7350_s26 = sld [smem:[#allocation41_spill]]  ;;  %v6206_v1 = vmov 0.0   ;;  %vm6207_vm0 = vmmov 0   ;;  %v1257_v2 = vld [vmem:[#allocation10 + $0x8] sm:$0xff] }
 0x136   : > { %5095 = vmatprep.subr.mxu0 %v6206_v1  ;;  %5099 = vmatprep.mubr.msk.f32.mxu0 %vm6207_vm0, %v6206_v1  ;;  %v1256_v3 = vld [vmem:[#allocation10] sm:$0xff]  ;;  %v1255_v4 = vld [vmem:[%s1111_s4] sm:$0xff]  ;;  %vm1265_vm1 = vcmask 130048   ;;  %s7351_s28 = sld [smem:[#allocation43_spill]]  ;;  %vm1393_vm2 = vcmask 261120   ;;  %v6701_v31 = vld [vmem:[#allocation7 + $0x8] sm:$0xff] }
 0x137   : > { %5102 = vmatprep.subr.mxu1 %v6206_v1  ;;  %5110 = vmatprep.mubr.msk.f32.mxu1 %vm6207_vm0, %v6206_v1  ;;  %v1370_v5 = vld [vmem:[%s6266_s19 + $0x18] sm:$0xff]  ;;  %v1369_v7 = vld [vmem:[%s6266_s19 + $0x10] sm:$0xff]  ;;  %v1368_v9 = vld [vmem:[%s6266_s19 + $0x8] sm:$0xff]  ;;  %s7352_s24 = sld [smem:[#allocation40_spill]]  ;;  %vm2354_vm3 = vcmask 523264   ;;  %p1252_p7 = scmp.lt.s32.totalorder %s6407_s23, 1 }
 0x138   : > { %5096 = vmatpush3.msra.mxu0 %v1257_v2  ;;  %5103 = vmatpush3.msra.mxu1 %v1370_v5  ;;  %v1367_v11 = vld [vmem:[%s6266_s19] sm:$0xff]  ;;  %v6693_v23 = vld [vmem:[#allocation7 + $0x18] sm:$0xff]  ;;  %v6706_v35 = vld [vmem:[#allocation7] sm:$0xff]  ;;  %s7353_s3 = sld [smem:[#allocation44_spill]]  ;;  %vm4469_vm6 = vcmask 0  }
 0x139   : > { %5097 = vmatprep.subr.mxu0 %v6206_v1  ;;  %5104 = vmatprep.subr.mxu1 %v6206_v1  ;;  %v4724_v13 = vld [vmem:[#allocation11] ss:$0 sm:$0xff]  ;;  %v4728_v21 = vld [vmem:[#allocation13] ss:$0 sm:$0xff]  ;;  %v6718_v42 = vld [vmem:[#allocation8 + $0x18] sm:$0xff]  ;;  %s7354_s12 = sld [smem:[#allocation48_spill]] }
 0x13a   : > { %5098 = vmatpush3.msra.mxu0 %v1256_v3  ;;  %5105 = vmatpush3.msra.mxu1 %v1369_v7  ;;  %v6696_v29 = vld [vmem:[#allocation7 + $0x10] sm:$0xff]  ;;  %v6724_v44 = vld [vmem:[#allocation8 + $0x8] sm:$0xff]  ;;  %v6728_v45 = vld [vmem:[#allocation8] sm:$0xff]  ;;  %s7355_s13 = sld [smem:[#allocation46_spill]]  ;;  %s7376_s23 = smov (!%p1252_p7, %s6407_s23), 1 }
 0x13b   : > { %v1375_v6 = vld [vmem:[%s7350_s26 + $0x18] sm:$0xff]  ;;  %5100 = vmatmul.mubr.msk.f32.vlgmr.msra.gmra.mxu0 %vm1265_vm1, %v1255_v4  ;;  %5113 = vmatprep.subr.mxu0 %v6206_v1  ;;  %v1374_v8 = vld [vmem:[%s7350_s26 + $0x10] sm:$0xff]  ;;  %v1373_v10 = vld [vmem:[%s7350_s26 + $0x8] sm:$0xff]  ;;  %s7356_s22 = sld [smem:[#allocation35_spill]] }
 0x13c   : > { %5114 = vmatpush3.msra.mxu0 %v1375_v6  ;;  %5106 = vmatprep.subr.mxu1 %v6206_v1  ;;  %v1372_v12 = vld [vmem:[%s7350_s26] sm:$0xff]  ;;  %v1380_v16 = vld [vmem:[%s7351_s28 + $0x18] sm:$0xff]  ;;  %v1379_v18 = vld [vmem:[%s7351_s28 + $0x10] sm:$0xff]  ;;  %s7358_s0 = sld [smem:[#allocation38_spill]] }
 0x13d   : > { %5115 = vmatprep.subr.mxu0 %v6206_v1  ;;  %5107 = vmatpush3.msra.mxu1 %v1368_v9  ;;  %v1378_v19 = vld [vmem:[%s7351_s28 + $0x8] sm:$0xff]  ;;  %v1377_v20 = vld [vmem:[%s7351_s28] sm:$0xff]  ;;  %s7359_s2 = sld [smem:[#allocation39_spill]] }
 0x13e   : > { %5116 = vmatpush3.msra.mxu0 %v1374_v8  ;;  %5108 = vmatprep.subr.mxu1 %v6206_v1  ;;  %v4726_v36 = vld [vmem:[%s7352_s24] ss:$0 sm:$0xff]  ;;  %v6720_v43 = vld [vmem:[#allocation8 + $0x10] sm:$0xff]  ;;  %v1385_v56 = vld [vmem:[%s7353_s3 + $0x18] sm:$0xff]  ;;  %s7360_s5 = sld [smem:[#allocation49_spill]] }
 0x13f   : > { %5117 = vmatprep.subr.mxu0 %v6206_v1  ;;  %5121 = vmatprep.mubr.msk.f32.mxu0 %vm6207_vm0, %v6206_v1  ;;  %v4730_v49 = vld [vmem:[#allocation14] ss:$0 sm:$0xff]  ;;  %v1384_v57 = vld [vmem:[%s7353_s3 + $0x10] sm:$0xff]  ;;  %v1383_v58 = vld [vmem:[%s7353_s3 + $0x8] sm:$0xff]  ;;  %s7361_s14 = sld [smem:[#allocation36_spill]] }
 0x140   : > { %5118 = vmatpush3.msra.mxu0 %v1373_v10  ;;  %5109 = vmatpush3.msra.mxu1 %v1367_v11  ;;  %v1382_v63 = vld [vmem:[%s7353_s3] sm:$0xff]  ;;  %v1982_v9 = vld [vmem:[%s7354_s12 + $0x18] sm:$0xff]  ;;  %v1981_v10 = vld [vmem:[%s7354_s12 + $0x10] sm:$0xff]  ;;  %s7362_s7 = sld [smem:[#allocation50_spill]] }
 0x141   : > { %5119 = vmatprep.subr.mxu0 %v6206_v1  ;;  %5124 = vmatprep.subr.mxu1 %v6206_v1  ;;  %v4739_v3 = vld [vmem:[#allocation16] ss:$0 sm:$0xff]  ;;  %s7357_s30 = smov %s7356_s22  ;;  %s7363_s4 = sld [smem:[#allocation51_spill]] }
 0x142   : > { %5120 = vmatpush3.msra.mxu0 %v1372_v12  ;;  %v6761_v11 = vld [vmem:[%s6615_s17] sm:$0xff]  ;;  %s7364_s6 = sld [smem:[#allocation52_spill]] }
 0x143   : > { %5168 = vmatprep.subr.mxu0 %v6206_v1  ;;  %v1980_v12 = vld [vmem:[%s7354_s12 + $0x8] sm:$0xff]  ;;  %s7365_s10 = sld [smem:[#allocation54_spill]] }
 0x144   : > { %s7366_s15 = sld [smem:[#allocation53_spill]] }
 0x1fb   : > { %v1335_v14 = vpop.f32.mrf.mxu0 }
 0x1fc   : > { %v6671_v15 = vadd.f32 %v4724_v13, %v1335_v14  ;;  %v1979_v13 = vld [vmem:[%s7354_s12] sm:$0xff] }
 0x1fd   : > { %v5101_v17 = vpop.f32.mrf.mxu0  ;;  %v6768_v14 = vld [vmem:[%s6615_s17 + $0x8] sm:$0xff]  ;;  %s7367_s17 = smov %s7366_s15 }
 0x1fe   : > { %5111 = vmatmul.mubr.msk.f32.vlgmr.msra.gmra.mxu1 %vm1393_vm2, %v6671_v15  ;;  %5122 = vmatmul.mubr.msk.f32.vlgmr.msra.gmra.mxu0 %vm1393_vm2, %v6671_v15 }
 0x1ff   : > { %5125 = vmatpush3.msra.mxu1 %v1380_v16  ;;  %5132 = vmatprep.mubr.msk.f32.mxu1 %vm6207_vm0, %v6206_v1 }
 0x200   : > { %5126 = vmatprep.subr.mxu1 %v6206_v1  ;;  %5176 = vmatprep.mubr.msk.f32.mxu0 %vm6207_vm0, %v6206_v1 }
 0x201   : > { %5127 = vmatpush3.msra.mxu1 %v1379_v18  ;;  %5169 = vmatpush3.msra.mxu0 %v1385_v56 }
 0x202   : > { %5128 = vmatprep.subr.mxu1 %v6206_v1  ;;  %5170 = vmatprep.subr.mxu0 %v6206_v1 }
 0x203   : > { %5129 = vmatpush3.msra.mxu1 %v1378_v19  ;;  %5171 = vmatpush3.msra.mxu0 %v1384_v57  ;;  %v6832_v57 = vld [vmem:[%s7358_s0] ss:$0 sm:$0xff] }
 0x204   : > { %5130 = vmatprep.subr.mxu1 %v6206_v1  ;;  %5172 = vmatprep.subr.mxu0 %v6206_v1 }
 0x205   : > { %5131 = vmatpush3.msra.mxu1 %v1377_v20  ;;  %5173 = vmatpush3.msra.mxu0 %v1383_v58  ;;  %v1977_v20 = vld [vmem:[%s7355_s13 + $0x18] sm:$0xff] }
 0x206   : > { %5133 = vmatmul.mubr.msk.f32.vlgmr.msra.gmra.mxu1 %vm1393_vm2, %v6671_v15  ;;  %5135 = vmatprep.subr.mxu1 %v6206_v1 }
 0x207   : > { %5143 = vmatprep.mubr.msk.f32.mxu1 %vm6207_vm0, %v6206_v1  ;;  %5174 = vmatprep.subr.mxu0 %v6206_v1 }
 0x208   : > { %5175 = vmatpush3.msra.mxu0 %v1382_v63 }
 0x209   : > { %5190 = vmatprep.subr.mxu0 %v1982_v9 }
 0x2be   : > { %v1463_v22 = vpop.f32.mrf.mxu1  ;;  %v1539_v24 = vpop.f32.mrf.mxu0 }
 0x2bf   : > { %v1540_v25 = vadd.f32 %v4728_v21, %v1539_v24  ;;  %v1464_v38 = vadd.f32 %v4726_v36, %v1463_v22  ;;  %v1976_v21 = vld [vmem:[%s7355_s13 + $0x10] sm:$0xff]  ;;  %v1975_v22 = vld [vmem:[%s7355_s13 + $0x8] sm:$0xff]  ;;  %v1974_v24 = vld [vmem:[%s7355_s13] sm:$0xff] }
 0x2c0   : > { %v5112_v26 = vpop.f32.mrf.mxu1  ;;  %v5123_v27 = vpop.f32.mrf.mxu0  ;;  %v6792_v36 = vld [vmem:[%s7357_s30 + $0x28] sm:$0xff] }
 0x2c1   : > { %v1622_v28 = vmul.f32 %v1540_v25, %v6693_v23  ;;  %v1621_v30 = vmul.f32 %v1540_v25, %v6696_v29  ;;  %v1620_v34 = vmul.f32 %v1540_v25, %v6701_v31  ;;  %v1619_v37 = vmul.f32 %v1540_v25, %v6706_v35  ;;  %v4745_v25 = vld [vmem:[#allocation19] ss:$0 sm:$0xff]  ;;  %v6784_v26 = vld [vmem:[%s7356_s22 + $0x38] sm:$0xff]  ;;  %s7368_s22 = sld [smem:[#allocation55_spill]] }
 0x2c3   : > { %5136 = vmatpush3.xpose.msk.msra.mxu1 %vm1393_vm2, %v1622_v28 }
 0x2c4   : > { %5137 = vmatprep.subr.mxu1 %v6206_v1 }
 0x2c6   : > { %v1615_v32 = vpop.f32.mrf.mxu1 }
 0x2c7   : > { %5138 = vmatpush3.xpose.msk.msra.mxu1 %vm1393_vm2, %v1621_v30  ;;  %v1616_v50 = vadd.f32 %v4730_v49, %v1615_v32  ;;  %v6817_v49 = vld [vmem:[%s7357_s30 + $0x8] sm:$0xff]  ;;  %s7369_s9 = smov %s7368_s22 }
 0x2c8   : > { %v5134_v33 = vpop.f32.mrf.mxu1  ;;  %5139 = vmatprep.subr.mxu1 %v6206_v1 }
 0x2c9   : > { %v1626_v52 = vmul.f32 %v1616_v50, %v6693_v23  ;;  %v1625_v53 = vmul.f32 %v1616_v50, %v6696_v29  ;;  %v1624_v54 = vmul.f32 %v1616_v50, %v6701_v31  ;;  %v1623_v55 = vmul.f32 %v1616_v50, %v6706_v35  ;;  %v6788_v33 = vld [vmem:[%s7357_s30 + $0x30] sm:$0xff] }
 0x2cb   : > { %5140 = vmatpush3.xpose.msk.msra.mxu1 %vm1393_vm2, %v1620_v34 }
 0x2cc   : > { %5141 = vmatprep.subr.mxu1 %v6206_v1 }
 0x2cf   : > { %5142 = vmatpush3.xpose.msk.msra.mxu1 %vm1393_vm2, %v1619_v37 }
 0x2d0   : > { %5146 = vmatprep.subr.mxu1 %v6206_v1 }
 0x2d2   : > { %5144 = vmatmul.mubr.msk.f32.vlgmr.msra.gmra.mxu1 %vm1393_vm2, %v1464_v38 }
 0x2d3   : > { %5154 = vmatprep.mubr.msk.f32.mxu1 %vm6207_vm0, %v6206_v1  ;;  %5147 = vmatpush3.msra.mxu1 %v6718_v42 }
 0x2d4   : > { %5148 = vmatprep.subr.mxu1 %v6206_v1 }
 0x2d5   : > { %5149 = vmatpush3.msra.mxu1 %v6720_v43 }
 0x2d6   : > { %5150 = vmatprep.subr.mxu1 %v6206_v1 }
 0x2d7   : > { %5151 = vmatpush3.msra.mxu1 %v6724_v44 }
 0x2d8   : > { %5152 = vmatprep.subr.mxu1 %v6206_v1 }
 0x2d9   : > { %5153 = vmatpush3.msra.mxu1 %v6728_v45 }
 0x2da   : > { %5157 = vmatprep.subr.mxu1 %v6206_v1 }
 0x392   : > { %v1708_v39 = vpop.f32.mrf.mxu1 }
 0x393   : > { %v1712_v40 = vsel %vm1393_vm2, %v1708_v39, -inf }
 0x394   : > { %1713 = vmax.xlane.f32.xlu0 %v1712_v40  ;;  %v5145_v41 = vpop.f32.mrf.mxu1 }
 0x395   : > { %v6805_v41 = vld [vmem:[%s7357_s30 + $0x18] sm:$0xff] }
 0x41d   : > { %v1714_v46 = vpop.xlane.xlu0 %1713 }
 0x41e   : > { %v1715_v47 = vsub.f32 %v1708_v39, %v1714_v46  ;;  %v6799_v39 = vld [vmem:[%s7357_s30 + $0x20] sm:$0xff] }
 0x420   : > { %v1716_v48 = vmul.f32 1.442695, %v1715_v47  ;;  %v6811_v47 = vld [vmem:[%s7357_s30 + $0x10] sm:$0xff] }
 0x422   : > { %5714 = vpow2.f32 %v1716_v48 }
 0x42f   : > { %v5715_v51 = vpop.eup %5714 }
 0x430   : > { %5155 = vmatmul.mubr.msk.f32.vlgmr.msra.gmra.mxu1 %vm1393_vm2, %v5715_v51 }
 0x431   : > { %5158 = vmatpush3.msra.mxu1 %v1626_v52  ;;  %5165 = vmatprep.mubr.msk.f32.mxu1 %vm6207_vm0, %v6206_v1 }
 0x432   : > { %5159 = vmatprep.subr.mxu1 %v6206_v1 }
 0x433   : > { %5160 = vmatpush3.msra.mxu1 %v1625_v53 }
 0x434   : > { %5161 = vmatprep.subr.mxu1 %v6206_v1 }
 0x435   : > { %5162 = vmatpush3.msra.mxu1 %v1624_v54 }
 0x436   : > { %5163 = vmatprep.subr.mxu1 %v6206_v1 }
 0x437   : > { %5164 = vmatpush3.msra.mxu1 %v1623_v55 }
 0x438   : > { %5179 = vmatprep.subr.mxu1 %v6206_v1 }
 0x4f0   : > { %v1787_v59 = vpop.f32.mrf.mxu1 }
 0x4f1   : > { %5716 = vrcp.f32 %v1787_v59  ;;  %v6835_v59 = vld [vmem:[%s7359_s2] ss:$0 sm:$0xff] }
 0x4f2   : > { %v5156_v60 = vpop.f32.mrf.mxu1 }
 0x4fe   : > { %v5717_v61 = vpop.eup %5716 }
 0x4ff   : > { %v1792_v62 = vmul.f32 %v5717_v61, %v5715_v51  ;;  %v6823_v51 = vld [vmem:[%s7357_s30] sm:$0xff] }
 0x501   : > { %5166 = vmatmul.mubr.msk.f32.vlgmr.msra.gmra.mxu1 %vm1393_vm2, %v1792_v62  ;;  %v4743_v62 = vld [vmem:[#allocation17] ss:$0 sm:$0xff] }
 0x502   : > { %5187 = vmatprep.mubr.msk.f32.mxu1 %vm6207_vm0, %v6206_v1  ;;  %5180 = vmatpush3.msra.mxu1 %v1977_v20 }
 0x503   : > { %5181 = vmatprep.subr.mxu1 %v6206_v1 }
 0x504   : > { %5182 = vmatpush3.msra.mxu1 %v1976_v21 }
 0x505   : > { %5183 = vmatprep.subr.mxu1 %v6206_v1 }
 0x506   : > { %5184 = vmatpush3.msra.mxu1 %v1975_v22 }
 0x507   : > { %5185 = vmatprep.subr.mxu1 %v6206_v1 }
 0x508   : > { %5186 = vmatpush3.msra.mxu1 %v1974_v24 }
 0x5c1   : > { %v1862_v0 = vpop.f32.mrf.mxu1 }
 0x5c2   : > { %5177 = vmatmul.mubr.msk.f32.vlgmr.msra.gmra.mxu0 %vm1393_vm2, %v1862_v0 }
 0x5c3   : > { %v5167_v2 = vpop.f32.mrf.mxu1  ;;  %5191 = vmatpush3.msra.mxu0 %v1982_v9  ;;  %5198 = vmatprep.mubr.msk.f32.mxu0 %vm1393_vm2, %v6761_v11 }
 0x5c4   : > { %5192 = vmatprep.subr.mxu0 %v1981_v10 }
 0x5c5   : > { %5193 = vmatpush3.msra.mxu0 %v1981_v10  ;;  %v6859_v10 = vld [vmem:[%s7361_s14 + $0x38] sm:$0xff] }
 0x5c6   : > { %5194 = vmatprep.subr.mxu0 %v1980_v12 }
 0x5c7   : > { %5195 = vmatpush3.msra.mxu0 %v1980_v12  ;;  %v6863_v12 = vld [vmem:[%s7361_s14 + $0x30] sm:$0xff] }
 0x5c8   : > { %5196 = vmatprep.subr.mxu0 %v1979_v13 }
 0x5c9   : > { %5197 = vmatpush3.msra.mxu0 %v1979_v13  ;;  %v6867_v13 = vld [vmem:[%s7361_s14 + $0x28] sm:$0xff] }
 0x5ca   : > { %5199 = vmatmul.mubr.msk.f32.vlgmr.msra.gmra.mxu0 %vm1393_vm2, %v6768_v14  ;;  %5212 = vmatprep.subr.mxu0 %v6206_v1 }
 0x5cb   : > { %5228 = vmatprep.mubr.msk.f32.mxu0 %vm6207_vm0, %v6206_v1 }
 0x682   : > { %v1941_v4 = vpop.f32.mrf.mxu0 }
 0x683   : > { %v1942_v5 = vadd.f32 %v4739_v3, %v1941_v4  ;;  %v1987_v3 = vld [vmem:[%s7360_s5 + $0x18] sm:$0xff]  ;;  %v1986_v4 = vld [vmem:[%s7360_s5 + $0x10] sm:$0xff] }
 0x684   : > { %v5178_v6 = vpop.f32.mrf.mxu0  ;;  %5201 = vmatprep.subr.mxu1 %v1987_v3 }
 0x685   : > { %v1945_v7 = vadd.f32 %v1942_v5, %v6671_v15  ;;  %v1985_v5 = vld [vmem:[%s7360_s5 + $0x8] sm:$0xff]  ;;  %v1984_v6 = vld [vmem:[%s7360_s5] sm:$0xff] }
 0x687   : > { %v1946_v8 = vsel %vm1393_vm2, %v1945_v7, 0.0 }
 0x688   : > { %1947 = vadd.xlane.f32.xlu0 %v1946_v8 }
 0x68a   : > { %v5200_v27 = vpop.f32.mrf.mxu0 }
 0x68b   : > { %v2157_v28 = vadd.f32 %v5200_v27, %v4745_v25 }
 0x68c   : > { %v2151_v30 = vpop.f32.mrf.mxu0 }
 0x68d   : > { %v2248_v32 = vmul.f32 %v2157_v28, %v6784_v26  ;;  %v2152_v34 = vadd.f32 %v4745_v25, %v2151_v30  ;;  %v2246_v38 = vmul.f32 %v2157_v28, %v6792_v36  ;;  %v2244_v46 = vmul.f32 %v2157_v28, %v6805_v41  ;;  %v4748_v25 = vld [vmem:[%s7362_s7] ss:$0 sm:$0xff] }
 0x68e   : > { %v2242_v50 = vmul.f32 %v2157_v28, %v6817_v49 }
 0x68f   : > { %5213 = vmatpush3.xpose.msk.msra.mxu0 %vm1393_vm2, %v2248_v32  ;;  %v2247_v37 = vmul.f32 %v2152_v34, %v6788_v33  ;;  %v2245_v40 = vmul.f32 %v2152_v34, %v6799_v39  ;;  %v2243_v48 = vmul.f32 %v2152_v34, %v6811_v47  ;;  %v2241_v52 = vmul.f32 %v2152_v34, %v6823_v51 }
 0x690   : > { %5214 = vmatprep.subr.mxu0 %v6206_v1 }
 0x693   : > { %5215 = vmatpush3.xpose.msk.msra.mxu0 %vm1393_vm2, %v2247_v37 }
 0x694   : > { %5216 = vmatprep.subr.mxu0 %v6206_v1 }
 0x697   : > { %5217 = vmatpush3.xpose.msk.msra.mxu0 %vm1393_vm2, %v2246_v38 }
 0x698   : > { %5218 = vmatprep.subr.mxu0 %v6206_v1 }
 0x69b   : > { %5219 = vmatpush3.xpose.msk.msra.mxu0 %vm1393_vm2, %v2245_v40 }
 0x69c   : > { %5220 = vmatprep.subr.mxu0 %v6206_v1 }
 0x69f   : > { %5221 = vmatpush3.xpose.msk.msra.mxu0 %vm1393_vm2, %v2244_v46 }
 0x6a0   : > { %5222 = vmatprep.subr.mxu0 %v6206_v1 }
 0x6a3   : > { %5223 = vmatpush3.xpose.msk.msra.mxu0 %vm1393_vm2, %v2243_v48 }
 0x6a4   : > { %5224 = vmatprep.subr.mxu0 %v6206_v1 }
 0x6a7   : > { %5225 = vmatpush3.xpose.msk.msra.mxu0 %vm1393_vm2, %v2242_v50 }
 0x6a8   : > { %5226 = vmatprep.subr.mxu0 %v6206_v1 }
 0x6ab   : > { %5227 = vmatpush3.xpose.msk.msra.mxu0 %vm1393_vm2, %v2241_v52 }
 0x6ac   : > { %5269 = vmatprep.subr.mxu0 %v6206_v1 }
 0x711   : > { %v1948_v15 = vpop.xlane.xlu0 %1947 }
 0x712   : > { %v1950_v16 = vmul.f32 0.03125, %v1948_v15  ;;  %v6872_v15 = vld [vmem:[%s7361_s14 + $0x20] sm:$0xff] }
 0x714   : > { %v1951_v17 = vsub.f32 %v1945_v7, %v1950_v16  ;;  %v6877_v16 = vld [vmem:[%s7361_s14 + $0x18] sm:$0xff] }
 0x716   : > { %v1952_v18 = vmul.f32 %v1951_v17, %v1951_v17 }
 0x718   : > { %v1953_v19 = vsel %vm1393_vm2, %v1952_v18, 0.0  ;;  %v6887_v18 = vld [vmem:[%s7361_s14 + $0x8] sm:$0xff] }
 0x719   : > { %1954 = vadd.xlane.f32.xlu1 %v1953_v19  ;;  %v6892_v19 = vld [vmem:[%s7361_s14] sm:$0xff] }
 0x7a2   : > { %v1955_v53 = vpop.xlane.xlu1 %1954 }
 0x7a3   : > { %v1956_v54 = vmul.f32 0.03125, %v1955_v53  ;;  %v1992_v53 = vld [vmem:[%s7363_s4 + $0x18] sm:$0xff] }
 0x7a5   : > { %v1957_v55 = vadd.f32 1e-05, %v1956_v54  ;;  %v1991_v54 = vld [vmem:[%s7363_s4 + $0x10] sm:$0xff] }
 0x7a7   : > { %5718 = vrsqrt.f32 %v1957_v55  ;;  %v1990_v55 = vld [vmem:[%s7363_s4 + $0x8] sm:$0xff] }
 0x7b4   : > { %v5719_v56 = vpop.eup %5718 }
 0x7b5   : > { %v1959_v58 = vmul.f32 %v5719_v56, %v1951_v17  ;;  %v6882_v17 = vld [vmem:[%s7361_s14 + $0x10] sm:$0xff] }
 0x7b7   : > { %v1966_v60 = vmul.f32 %v6832_v57, %v1959_v58 }
 0x7b9   : > { %v6839_v61 = vadd.f32 %v6835_v59, %v1966_v60 }
 0x7bb   : > { %5188 = vmatmul.mubr.msk.f32.vlgmr.msra.gmra.mxu1 %vm1393_vm2, %v6839_v61 }
 0x7bc   : > { %5209 = vmatprep.mubr.msk.f32.mxu1 %vm1393_vm2, %v6761_v11  ;;  %5202 = vmatpush3.msra.mxu1 %v1987_v3  ;;  %v4762_v3 = vld [vmem:[%s7364_s6] ss:$0 sm:$0xff] }
 0x7bd   : > { %5203 = vmatprep.subr.mxu1 %v1986_v4 }
 0x7be   : > { %5204 = vmatpush3.msra.mxu1 %v1986_v4 }
 0x7bf   : > { %5205 = vmatprep.subr.mxu1 %v1985_v5 }
 0x7c0   : > { %5206 = vmatpush3.msra.mxu1 %v1985_v5 }
 0x7c1   : > { %5207 = vmatprep.subr.mxu1 %v1984_v6 }
 0x7c2   : > { %5208 = vmatpush3.msra.mxu1 %v1984_v6 }
 0x7c3   : > { %5210 = vmatmul.mubr.msk.f32.vlgmr.msra.gmra.mxu1 %vm1393_vm2, %v6768_v14  ;;  %5231 = vmatprep.subr.mxu1 %v6206_v1 }
 0x7c4   : > { %5247 = vmatprep.mubr.msk.f32.mxu1 %vm6207_vm0, %v6206_v1  ;;  %5232 = vmatpush3.msra.mxu1 %v6859_v10 }
 0x7c5   : > { %5233 = vmatprep.subr.mxu1 %v6206_v1 }
 0x7c6   : > { %5234 = vmatpush3.msra.mxu1 %v6863_v12 }
 0x7c7   : > { %5235 = vmatprep.subr.mxu1 %v6206_v1 }
 0x7c8   : > { %5236 = vmatpush3.msra.mxu1 %v6867_v13 }
 0x7c9   : > { %5237 = vmatprep.subr.mxu1 %v6206_v1 }
 0x7ca   : > { %5238 = vmatpush3.msra.mxu1 %v6872_v15 }
 0x7cb   : > { %5239 = vmatprep.subr.mxu1 %v6206_v1 }
 0x7cc   : > { %5240 = vmatpush3.msra.mxu1 %v6877_v16 }
 0x7cd   : > { %5241 = vmatprep.subr.mxu1 %v6206_v1 }
 0x7ce   : > { %5242 = vmatpush3.msra.mxu1 %v6882_v17 }
 0x7cf   : > { %5243 = vmatprep.subr.mxu1 %v6206_v1 }
 0x7d0   : > { %5244 = vmatpush3.msra.mxu1 %v6887_v18 }
 0x7d1   : > { %5245 = vmatprep.subr.mxu1 %v6206_v1 }
 0x7d2   : > { %5246 = vmatpush3.msra.mxu1 %v6892_v19 }
 0x7d3   : > { %5250 = vmatprep.subr.mxu1 %v6206_v1 }
 0x87b   : > { %v2069_v63 = vpop.f32.mrf.mxu1 }
 0x87c   : > { %v2070_v0 = vadd.f32 %v4743_v62, %v2069_v63  ;;  %v1989_v63 = vld [vmem:[%s7363_s4] sm:$0xff] }
 0x87d   : > { %v5189_v2 = vpop.f32.mrf.mxu1 }
 0x87e   : > { %5229 = vmatmul.mubr.msk.f32.vlgmr.msra.gmra.mxu0 %vm1393_vm2, %v2070_v0 }
 0x87f   : > { %5277 = vmatprep.mubr.msk.f32.mxu0 %vm6207_vm0, %v6206_v1  ;;  %5270 = vmatpush3.msra.mxu0 %v1992_v53 }
 0x880   : > { %5271 = vmatprep.subr.mxu0 %v6206_v1 }
 0x881   : > { %5272 = vmatpush3.msra.mxu0 %v1991_v54 }
 0x882   : > { %5273 = vmatprep.subr.mxu0 %v6206_v1 }
 0x883   : > { %v5211_v24 = vpop.f32.mrf.mxu1  ;;  %5274 = vmatpush3.msra.mxu0 %v1990_v55  ;;  %v2691_v55 = vld [vmem:[%s7365_s10 + $0x10] sm:$0xff] }
 0x884   : > { %v2238_v28 = vadd.f32 %v5211_v24, %v4748_v25  ;;  %5275 = vmatprep.subr.mxu0 %v6206_v1 }
 0x885   : > { %v2232_v27 = vpop.f32.mrf.mxu1  ;;  %5276 = vmatpush3.msra.mxu0 %v1989_v63 }
 0x886   : > { %v2233_v30 = vadd.f32 %v4748_v25, %v2232_v27  ;;  %v2256_v32 = vmul.f32 %v2238_v28, %v6784_v26  ;;  %v2254_v38 = vmul.f32 %v2238_v28, %v6792_v36  ;;  %v2252_v46 = vmul.f32 %v2238_v28, %v6805_v41  ;;  %5291 = vmatprep.subr.mxu0 %v6206_v1  ;;  %v2607_v25 = vld [vmem:[#allocation20 + $0x18] sm:$0xff]  ;;  %v2606_v27 = vld [vmem:[#allocation20 + $0x10] sm:$0xff] }
 0x887   : > { %v2250_v50 = vmul.f32 %v2238_v28, %v6817_v49  ;;  %v2604_v28 = vld [vmem:[#allocation20] sm:$0xff] }
 0x888   : > { %v2255_v37 = vmul.f32 %v2233_v30, %v6788_v33  ;;  %v2253_v40 = vmul.f32 %v2233_v30, %v6799_v39  ;;  %v2251_v48 = vmul.f32 %v2233_v30, %v6811_v47  ;;  %v2249_v52 = vmul.f32 %v2233_v30, %v6823_v51  ;;  %v2696_v30 = vld [vmem:[%s7365_s10 + $0x38] sm:$0xff] }
 0x93e   : > { %v2350_v7 = vpop.f32.mrf.mxu0 }
 0x93f   : > { %v2355_v8 = vsel %vm2354_vm3, %v2350_v7, -inf }
 0x940   : > { %2356 = vmax.xlane.f32.xlu1 %v2355_v8  ;;  %v5230_v9 = vpop.f32.mrf.mxu0 }
 0x9c9   : > { %v2357_v20 = vpop.xlane.xlu1 %2356 }
 0x9ca   : > { %v2358_v21 = vsub.f32 %v2350_v7, %v2357_v20 }
 0x9cc   : > { %v2359_v22 = vmul.f32 1.442695, %v2358_v21 }
 0x9ce   : > { %5720 = vpow2.f32 %v2359_v22 }
 0x9db   : > { %v5721_v34 = vpop.eup %5720 }
 0x9dc   : > { %5248 = vmatmul.mubr.msk.f32.vlgmr.msra.gmra.mxu1 %vm2354_vm3, %v5721_v34 }
 0x9dd   : > { %5251 = vmatpush3.msra.mxu1 %v2256_v32  ;;  %5266 = vmatprep.mubr.msk.f32.mxu1 %vm6207_vm0, %v6206_v1  ;;  %v2695_v32 = vld [vmem:[%s7365_s10 + $0x30] sm:$0xff] }
 0x9de   : > { %5252 = vmatprep.subr.mxu1 %v6206_v1 }
 0x9df   : > { %5253 = vmatpush3.msra.mxu1 %v2255_v37  ;;  %v2693_v37 = vld [vmem:[%s7365_s10 + $0x20] sm:$0xff] }
 0x9e0   : > { %5254 = vmatprep.subr.mxu1 %v6206_v1 }
 0x9e1   : > { %5255 = vmatpush3.msra.mxu1 %v2254_v38  ;;  %v2692_v38 = vld [vmem:[%s7365_s10 + $0x18] sm:$0xff] }
 0x9e2   : > { %5256 = vmatprep.subr.mxu1 %v6206_v1 }
 0x9e3   : > { %5257 = vmatpush3.msra.mxu1 %v2253_v40 }
 0x9e4   : > { %5258 = vmatprep.subr.mxu1 %v6206_v1 }
 0x9e5   : > { %5259 = vmatpush3.msra.mxu1 %v2252_v46 }
 0x9e6   : > { %5260 = vmatprep.subr.mxu1 %v6206_v1 }
 0x9e7   : > { %5261 = vmatpush3.msra.mxu1 %v2251_v48 }
 0x9e8   : > { %5262 = vmatprep.subr.mxu1 %v6206_v1 }
 0x9e9   : > { %5263 = vmatpush3.msra.mxu1 %v2250_v50 }
 0x9ea   : > { %5264 = vmatprep.subr.mxu1 %v6206_v1 }
 0x9eb   : > { %5265 = vmatpush3.msra.mxu1 %v2249_v52 }
 0x9ec   : > { %5280 = vmatprep.subr.mxu1 %v6206_v1 }
 0xa9c   : > { %v2430_v56 = vpop.f32.mrf.mxu1 }
 0xa9d   : > { %5722 = vrcp.f32 %v2430_v56  ;;  %v2690_v56 = vld [vmem:[%s7365_s10 + $0x8] sm:$0xff] }
 0xa9e   : > { %v5249_v58 = vpop.f32.mrf.mxu1 }
 0xa9f   : > { %v2689_v58 = vld [vmem:[%s7365_s10] sm:$0xff] }
 0xaaa   : > { %v5723_v60 = vpop.eup %5722 }
 0xaab   : > { %v2435_v62 = vmul.f32 %v5723_v60, %v5721_v34  ;;  %v2694_v34 = vld [vmem:[%s7365_s10 + $0x28] sm:$0xff]  ;;  %v4764_v60 = vld [vmem:[%s7366_s15] ss:$0 sm:$0xff]  ;;  %s7370_s15 = sld [smem:[#allocation57_spill]] }
 0xaad   : > { %5267 = vmatmul.mubr.msk.f32.vlgmr.msra.gmra.mxu1 %vm2354_vm3, %v2435_v62 }
 0xaae   : > { %5288 = vmatprep.mubr.msk.f32.mxu1 %vm6207_vm0, %v6206_v1  ;;  %5281 = vmatpush3.msra.mxu1 %v2607_v25  ;;  %v4773_v25 = vld [vmem:[%s6266_s19 + $0x38] sm:$0xff] }
 0xaaf   : > { %5282 = vmatprep.subr.mxu1 %v6206_v1 }
 0xab0   : > { %5283 = vmatpush3.msra.mxu1 %v2606_v27  ;;  %v4782_v27 = vld [vmem:[%s7351_s28 + $0x38] sm:$0xff] }
 0xab1   : > { %5284 = vmatprep.subr.mxu1 %v6206_v1 }
 0xb6d   : > { %v2505_v0 = vpop.f32.mrf.mxu1 }
 0xb6e   : > { %5278 = vmatmul.mubr.msk.f32.vlgmr.msra.gmra.mxu0 %vm1393_vm2, %v2505_v0 }
 0xb6f   : > { %v5268_v2 = vpop.f32.mrf.mxu1  ;;  %5307 = vmatprep.mubr.msk.f32.mxu0 %vm6207_vm0, %v6206_v1  ;;  %5292 = vmatpush3.msra.mxu0 %v2696_v30  ;;  %v4771_v30 = vld [vmem:[%s6266_s19 + $0x28] sm:$0xff] }
 0xb70   : > { %5293 = vmatprep.subr.mxu0 %v6206_v1 }
 0xb71   : > { %5294 = vmatpush3.msra.mxu0 %v2695_v32  ;;  %v4780_v32 = vld [vmem:[%s7351_s28 + $0x28] sm:$0xff] }
 0xb72   : > { %5295 = vmatprep.subr.mxu0 %v6206_v1 }
 0xb73   : > { %5296 = vmatpush3.msra.mxu0 %v2694_v34  ;;  %v4770_v34 = vld [vmem:[%s6266_s19 + $0x20] sm:$0xff] }
 0xb74   : > { %5297 = vmatprep.subr.mxu0 %v6206_v1 }
 0xb75   : > { %5298 = vmatpush3.msra.mxu0 %v2693_v37  ;;  %v4779_v37 = vld [vmem:[%s7351_s28 + $0x20] sm:$0xff] }
 0xb76   : > { %5299 = vmatprep.subr.mxu0 %v6206_v1 }
 0xb77   : > { %5300 = vmatpush3.msra.mxu0 %v2692_v38 }
 0xb78   : > { %5301 = vmatprep.subr.mxu0 %v6206_v1 }
 0xb79   : > { %5302 = vmatpush3.msra.mxu0 %v2691_v55  ;;  %v4777_v55 = vld [vmem:[%s7350_s26 + $0x30] sm:$0xff] }
 0xb7a   : > { %5303 = vmatprep.subr.mxu0 %v6206_v1 }
 0xb7b   : > { %5304 = vmatpush3.msra.mxu0 %v2690_v56  ;;  %v4776_v56 = vld [vmem:[%s7350_s26 + $0x28] sm:$0xff] }
 0xb7c   : > { %5305 = vmatprep.subr.mxu0 %v6206_v1 }
 0xb7d   : > { %5306 = vmatpush3.msra.mxu0 %v2689_v58  ;;  %v4789_v58 = vld [vmem:[#allocation13 + $0x1] ss:$0 sm:$0xff] }
 0xb7e   : > { %5332 = vmatprep.subr.mxu0 %v6206_v1 }
 0xc2e   : > { %v2584_v4 = vpop.f32.mrf.mxu0 }
 0xc2f   : > { %v2585_v5 = vadd.f32 %v4762_v3, %v2584_v4  ;;  %v4766_v3 = vld [vmem:[%s7368_s22] ss:$0 sm:$0xff]  ;;  %s1254_s22 = scalar_lea.vmem %s7370_s15, %s7376_s23 }
 0xc30   : > { %v5279_v6 = vpop.f32.mrf.mxu0 }
 0xc31   : > { %v2588_v7 = vadd.f32 %v2585_v5, %v6839_v61  ;;  %v2605_v61 = vld [vmem:[#allocation20 + $0x8] sm:$0xff] }
 0xc32   : > { %5285 = vmatpush3.msra.mxu1 %v2605_v61  ;;  %v4772_v61 = vld [vmem:[%s6266_s19 + $0x30] sm:$0xff] }
 0xc33   : > { %v2589_v8 = vsel %vm1393_vm2, %v2588_v7, 0.0  ;;  %5286 = vmatprep.subr.mxu1 %v6206_v1 }
 0xc34   : > { %2590 = vadd.xlane.f32.xlu0 %v2589_v8  ;;  %5287 = vmatpush3.msra.mxu1 %v2604_v28  ;;  %v4781_v28 = vld [vmem:[%s7351_s28 + $0x30] sm:$0xff] }
 0xc35   : > { %5310 = vmatprep.subr.mxu1 %v6206_v1 }
 0xcbd   : > { %v2591_v9 = vpop.xlane.xlu0 %2590 }
 0xcbe   : > { %v2592_v20 = vmul.f32 0.03125, %v2591_v9 }
 0xcc0   : > { %v2593_v21 = vsub.f32 %v2588_v7, %v2592_v20 }
 0xcc2   : > { %v2594_v22 = vmul.f32 %v2593_v21, %v2593_v21 }
 0xcc4   : > { %v2595_v24 = vsel %vm1393_vm2, %v2594_v22, 0.0 }
 0xcc5   : > { %2596 = vadd.xlane.f32.xlu1 %v2595_v24 }
 0xd4e   : > { %v2597_v40 = vpop.xlane.xlu1 %2596 }
 0xd4f   : > { %v2598_v46 = vmul.f32 0.03125, %v2597_v40 }
 0xd51   : > { %v2599_v48 = vadd.f32 1e-05, %v2598_v46 }
 0xd53   : > { %5724 = vrsqrt.f32 %v2599_v48 }
 0xd60   : > { %v5725_v50 = vpop.eup %5724 }
 0xd61   : > { %v2601_v52 = vmul.f32 %v5725_v50, %v2593_v21 }
 0xd63   : > { %v2602_v53 = vmul.f32 %v6832_v57, %v2601_v52 }
 0xd65   : > { %v2603_v54 = vadd.f32 %v6835_v59, %v2602_v53 }
 0xd67   : > { %5289 = vmatmul.mubr.msk.f32.vlgmr.msra.gmra.mxu1 %vm1393_vm2, %v2603_v54 }
 0xd68   : > { %5318 = vmatprep.mubr.msk.f32.mxu1 %vm6207_vm0, %v6206_v1  ;;  %5311 = vmatpush3.msra.mxu1 %v4773_v25 }
 0xd69   : > { %5312 = vmatprep.subr.mxu1 %v6206_v1 }
 0xd6a   : > { %5313 = vmatpush3.msra.mxu1 %v4772_v61 }
 0xd6b   : > { %5314 = vmatprep.subr.mxu1 %v6206_v1 }
 0xd6c   : > { %5315 = vmatpush3.msra.mxu1 %v4771_v30 }
 0xd6d   : > { %5316 = vmatprep.subr.mxu1 %v6206_v1 }
 0xd6e   : > { %5317 = vmatpush3.msra.mxu1 %v4770_v34 }
 0xd6f   : > { %5321 = vmatprep.subr.mxu1 %v6206_v1 }
 0xe27   : > { %v2684_v62 = vpop.f32.mrf.mxu1 }
 0xe28   : > { %v2685_v63 = vadd.f32 %v4764_v60, %v2684_v62 }
 0xe29   : > { %v5290_v0 = vpop.f32.mrf.mxu1 }
 0xe2a   : > { %v2688_v2 = vmax.f32 %v2685_v63, 0.0 }
 0xe2c   : > { %5308 = vmatmul.mubr.msk.f32.vlgmr.msra.gmra.mxu0 %vm2354_vm3, %v2688_v2 }
 0xe2d   : > { %5340 = vmatprep.mubr.msk.f32.mxu0 %vm6207_vm0, %v6206_v1  ;;  %5333 = vmatpush3.msra.mxu0 %v4782_v27 }
 0xe2e   : > { %5334 = vmatprep.subr.mxu0 %v6206_v1 }
 0xe2f   : > { %5335 = vmatpush3.msra.mxu0 %v4781_v28 }
 0xe30   : > { %5336 = vmatprep.subr.mxu0 %v6206_v1 }
 0xe31   : > { %5337 = vmatpush3.msra.mxu0 %v4780_v32  ;;  %v4784_v32 = vld [vmem:[%s7353_s3 + $0x28] sm:$0xff] }
 0xe32   : > { %5338 = vmatprep.subr.mxu0 %v6206_v1 }
 0xe33   : > { %5339 = vmatpush3.msra.mxu0 %v4779_v37 }
 0xe34   : > { %5354 = vmatprep.subr.mxu0 %v6206_v1 }
 0xeec   : > { %v2773_v4 = vpop.f32.mrf.mxu0 }
 0xeed   : > { %v2774_v5 = vadd.f32 %v4766_v3, %v2773_v4  ;;  %v4787_v3 = vld [vmem:[%s7352_s24 + $0x1] ss:$0 sm:$0xff] }
 0xeee   : > { %v5309_v6 = vpop.f32.mrf.mxu0 }
 0xeef   : > { %v2777_v7 = vadd.f32 %v2774_v5, %v2603_v54  ;;  %v4778_v54 = vld [vmem:[%s7350_s26 + $0x38] sm:$0xff] }
 0xef1   : > { %v2778_v8 = vsel %vm1393_vm2, %v2777_v7, 0.0 }
 0xef2   : > { %2779 = vadd.xlane.f32.xlu0 %v2778_v8 }
 0xf7b   : > { %v2780_v9 = vpop.xlane.xlu0 %2779 }
 0xf7c   : > { %v2781_v20 = vmul.f32 0.03125, %v2780_v9 }
 0xf7e   : > { %v2782_v21 = vsub.f32 %v2777_v7, %v2781_v20 }
 0xf80   : > { %v2783_v22 = vmul.f32 %v2782_v21, %v2782_v21 }
 0xf82   : > { %v2784_v24 = vsel %vm1393_vm2, %v2783_v22, 0.0  ;;  %v4791_v22 = vld [vmem:[#allocation14 + $0x1] ss:$0 sm:$0xff] }
 0xf83   : > { %2785 = vadd.xlane.f32.xlu1 %v2784_v24 }
0x100c   : > { %v2786_v38 = vpop.xlane.xlu1 %2785 }
0x100d   : > { %v2787_v40 = vmul.f32 0.03125, %v2786_v38  ;;  %v4783_v38 = vld [vmem:[%s7353_s3 + $0x20] sm:$0xff] }
0x100f   : > { %v2788_v46 = vadd.f32 1e-05, %v2787_v40 }
0x1011   : > { %5726 = vrsqrt.f32 %v2788_v46 }
0x101e   : > { %v5727_v48 = vpop.eup %5726 }
0x101f   : > { %v2790_v50 = vmul.f32 %v5727_v48, %v2782_v21  ;;  %v4800_v48 = vld [vmem:[#allocation16 + $0x1] ss:$0 sm:$0xff] }
0x1021   : > { %v2791_v52 = vmul.f32 %v6832_v57, %v2790_v50  ;;  %v4775_v57 = vld [vmem:[%s7350_s26 + $0x20] sm:$0xff] }
0x1023   : > { %v6986_v53 = vadd.f32 %v6835_v59, %v2791_v52 }
0x1025   : > { %5319 = vmatmul.mubr.msk.f32.vlgmr.msra.gmra.mxu1 %vm1393_vm2, %v6986_v53  ;;  %5341 = vmatmul.mubr.msk.f32.vlgmr.msra.gmra.mxu0 %vm1393_vm2, %v6986_v53 }
0x1026   : > { %5322 = vmatpush3.msra.mxu1 %v4778_v54  ;;  %5329 = vmatprep.mubr.msk.f32.mxu1 %vm6207_vm0, %v6206_v1 }
0x1027   : > { %5323 = vmatprep.subr.mxu1 %v6206_v1  ;;  %5355 = vmatpush3.msra.mxu0 %v6718_v42 }
0x1028   : > { %5324 = vmatpush3.msra.mxu1 %v4777_v55  ;;  %5356 = vmatprep.subr.mxu0 %v6206_v1 }
0x1029   : > { %5325 = vmatprep.subr.mxu1 %v6206_v1  ;;  %5357 = vmatpush3.msra.mxu0 %v6720_v43 }
0x102a   : > { %5326 = vmatpush3.msra.mxu1 %v4776_v56  ;;  %5358 = vmatprep.subr.mxu0 %v6206_v1 }
0x102b   : > { %5327 = vmatprep.subr.mxu1 %v6206_v1  ;;  %5359 = vmatpush3.msra.mxu0 %v6724_v44 }
0x102c   : > { %5328 = vmatpush3.msra.mxu1 %v4775_v57  ;;  %5360 = vmatprep.subr.mxu0 %v6206_v1  ;;  %v4811_v57 = vld [vmem:[%s7354_s12 + $0x38] sm:$0xff] }
0x102d   : > { %5330 = vmatmul.mubr.msk.f32.vlgmr.msra.gmra.mxu1 %vm1393_vm2, %v6986_v53  ;;  %5343 = vmatprep.subr.mxu1 %v6206_v1 }
0x102e   : > { %5351 = vmatprep.mubr.msk.f32.mxu1 %vm6207_vm0, %v6206_v1  ;;  %5361 = vmatpush3.msra.mxu0 %v6728_v45 }
0x102f   : > { %5362 = vmatprep.mubr.msk.f32.mxu0 %vm6207_vm0, %v6206_v1  ;;  %5365 = vmatprep.subr.mxu0 %v6206_v1 }
0x10e5   : > { %v2900_v42 = vpop.f32.mrf.mxu1  ;;  %v3052_v43 = vpop.f32.mrf.mxu0 }
0x10e6   : > { %v2901_v5 = vadd.f32 %v4787_v3, %v2900_v42  ;;  %v3053_v24 = vadd.f32 %v4791_v22, %v3052_v43  ;;  %v4810_v42 = vld [vmem:[%s7354_s12 + $0x30] sm:$0xff]  ;;  %v4809_v43 = vld [vmem:[%s7354_s12 + $0x28] sm:$0xff] }
0x10e7   : > { %v5320_v44 = vpop.f32.mrf.mxu1  ;;  %v5342_v59 = vpop.f32.mrf.mxu0  ;;  %v4824_v3 = vld [vmem:[#allocation19 + $0x1] ss:$0 sm:$0xff] }
0x10e8   : > { %v3063_v27 = vmul.f32 %v3053_v24, %v6693_v23  ;;  %v3062_v61 = vmul.f32 %v3053_v24, %v6696_v29  ;;  %v3061_v28 = vmul.f32 %v3053_v24, %v6701_v31  ;;  %v3060_v30 = vmul.f32 %v3053_v24, %v6706_v35  ;;  %v4808_v44 = vld [vmem:[%s7354_s12 + $0x20] sm:$0xff] }
0x10ed   : > { %v2976_v60 = vpop.f32.mrf.mxu1 }
0x10ee   : > { %v2977_v62 = vadd.f32 %v4789_v58, %v2976_v60 }
0x10ef   : > { %v5331_v63 = vpop.f32.mrf.mxu1 }
0x10f0   : > { %v3059_v0 = vmul.f32 %v2977_v62, %v6693_v23  ;;  %v3058_v45 = vmul.f32 %v2977_v62, %v6696_v29  ;;  %v3057_v2 = vmul.f32 %v2977_v62, %v6701_v31  ;;  %v3056_v4 = vmul.f32 %v2977_v62, %v6706_v35  ;;  %v4786_v23 = vld [vmem:[%s7353_s3 + $0x38] sm:$0xff]  ;;  %v4785_v29 = vld [vmem:[%s7353_s3 + $0x30] sm:$0xff] }
0x10f1   : > { %v4807_v63 = vld [vmem:[%s7355_s13 + $0x38] sm:$0xff] }
0x10f2   : > { %5344 = vmatpush3.xpose.msk.msra.mxu1 %vm1393_vm2, %v3059_v0  ;;  %v4806_v0 = vld [vmem:[%s7355_s13 + $0x30] sm:$0xff] }
0x10f3   : > { %5345 = vmatprep.subr.mxu1 %v6206_v1 }
0x10f6   : > { %5346 = vmatpush3.xpose.msk.msra.mxu1 %vm1393_vm2, %v3058_v45  ;;  %v4805_v45 = vld [vmem:[%s7355_s13 + $0x28] sm:$0xff] }
0x10f7   : > { %5347 = vmatprep.subr.mxu1 %v6206_v1 }
0x10fa   : > { %5348 = vmatpush3.xpose.msk.msra.mxu1 %vm1393_vm2, %v3057_v2  ;;  %v4804_v2 = vld [vmem:[%s7355_s13 + $0x20] sm:$0xff] }
0x10fb   : > { %5349 = vmatprep.subr.mxu1 %v6206_v1 }
0x10fe   : > { %5350 = vmatpush3.xpose.msk.msra.mxu1 %vm1393_vm2, %v3056_v4 }
0x10ff   : > { %5376 = vmatprep.subr.mxu1 %v6206_v1 }
0x1101   : > { %5352 = vmatmul.mubr.msk.f32.vlgmr.msra.gmra.mxu1 %vm1393_vm2, %v2901_v5 }
0x1102   : > { %5384 = vmatprep.mubr.msk.f32.mxu1 %vm6207_vm0, %v6206_v1  ;;  %5377 = vmatpush3.msra.mxu1 %v4786_v23 }
0x1103   : > { %5378 = vmatprep.subr.mxu1 %v6206_v1 }
0x1104   : > { %5379 = vmatpush3.msra.mxu1 %v4785_v29  ;;  %v7101_v29 = vld [vmem:[%s7358_s0 + $0x1] ss:$0 sm:$0xff] }
0x1105   : > { %5380 = vmatprep.subr.mxu1 %v6206_v1 }
0x1106   : > { %5381 = vmatpush3.msra.mxu1 %v4784_v32 }
0x1107   : > { %5382 = vmatprep.subr.mxu1 %v6206_v1 }
0x1108   : > { %5383 = vmatpush3.msra.mxu1 %v4783_v38 }
0x1109   : > { %5398 = vmatprep.subr.mxu1 %v4811_v57 }
0x11c1   : > { %v3145_v6 = vpop.f32.mrf.mxu1 }
0x11c2   : > { %v3149_v7 = vsel %vm1393_vm2, %v3145_v6, -inf }
0x11c3   : > { %3150 = vmax.xlane.f32.xlu0 %v3149_v7  ;;  %v5353_v8 = vpop.f32.mrf.mxu1 }
0x124c   : > { %v3151_v9 = vpop.xlane.xlu0 %3150 }
0x124d   : > { %v3152_v20 = vsub.f32 %v3145_v6, %v3151_v9 }
0x124f   : > { %v3153_v21 = vmul.f32 1.442695, %v3152_v20 }
0x1251   : > { %5728 = vpow2.f32 %v3153_v21 }
0x125e   : > { %v5729_v25 = vpop.eup %5728 }
0x125f   : > { %5363 = vmatmul.mubr.msk.f32.vlgmr.msra.gmra.mxu0 %vm1393_vm2, %v5729_v25 }
0x1260   : > { %5366 = vmatpush3.msra.mxu0 %v3063_v27  ;;  %5373 = vmatprep.mubr.msk.f32.mxu0 %vm6207_vm0, %v6206_v1 }
0x1261   : > { %5367 = vmatprep.subr.mxu0 %v6206_v1 }
0x1262   : > { %5368 = vmatpush3.msra.mxu0 %v3062_v61 }
0x1263   : > { %5369 = vmatprep.subr.mxu0 %v6206_v1 }
0x1264   : > { %5370 = vmatpush3.msra.mxu0 %v3061_v28 }
0x1265   : > { %5371 = vmatprep.subr.mxu0 %v6206_v1 }
0x1266   : > { %5372 = vmatpush3.msra.mxu0 %v3060_v30 }
0x1267   : > { %5387 = vmatprep.subr.mxu0 %v6206_v1 }
0x131f   : > { %v3224_v31 = vpop.f32.mrf.mxu0 }
0x1320   : > { %5730 = vrcp.f32 %v3224_v31  ;;  %v7104_v31 = vld [vmem:[%s7359_s2 + $0x1] ss:$0 sm:$0xff] }
0x1321   : > { %v5364_v35 = vpop.f32.mrf.mxu0 }
0x132d   : > { %v5731_v34 = vpop.eup %5730 }
0x132e   : > { %v3229_v37 = vmul.f32 %v5731_v34, %v5729_v25 }
0x1330   : > { %5374 = vmatmul.mubr.msk.f32.vlgmr.msra.gmra.mxu0 %vm1393_vm2, %v3229_v37  ;;  %v4822_v37 = vld [vmem:[#allocation17 + $0x1] ss:$0 sm:$0xff] }
0x1331   : > { %5395 = vmatprep.mubr.msk.f32.mxu0 %vm6207_vm0, %v6206_v1  ;;  %5388 = vmatpush3.msra.mxu0 %v4807_v63 }
0x1332   : > { %5389 = vmatprep.subr.mxu0 %v6206_v1 }
0x1333   : > { %5390 = vmatpush3.msra.mxu0 %v4806_v0  ;;  %v4841_v0 = vld [vmem:[%s7364_s6 + $0x1] ss:$0 sm:$0xff] }
0x1334   : > { %5391 = vmatprep.subr.mxu0 %v6206_v1 }
0x1335   : > { %5392 = vmatpush3.msra.mxu0 %v4805_v45 }
0x1336   : > { %5393 = vmatprep.subr.mxu0 %v6206_v1 }
0x1337   : > { %5394 = vmatpush3.msra.mxu0 %v4804_v2 }
0x13f0   : > { %v3299_v40 = vpop.f32.mrf.mxu0 }
0x13f1   : > { %5385 = vmatmul.mubr.msk.f32.vlgmr.msra.gmra.mxu1 %vm1393_vm2, %v3299_v40 }
0x13f2   : > { %v5375_v46 = vpop.f32.mrf.mxu0  ;;  %5406 = vmatprep.mubr.msk.f32.mxu1 %vm1393_vm2, %v6761_v11  ;;  %5399 = vmatpush3.msra.mxu1 %v4811_v57 }
0x13f3   : > { %5400 = vmatprep.subr.mxu1 %v4810_v42 }
0x13f4   : > { %5401 = vmatpush3.msra.mxu1 %v4810_v42 }
0x13f5   : > { %5402 = vmatprep.subr.mxu1 %v4809_v43 }
0x13f6   : > { %5403 = vmatpush3.msra.mxu1 %v4809_v43 }
0x13f7   : > { %5404 = vmatprep.subr.mxu1 %v4808_v44 }
0x13f8   : > { %5405 = vmatpush3.msra.mxu1 %v4808_v44 }
0x13f9   : > { %5407 = vmatmul.mubr.msk.f32.vlgmr.msra.gmra.mxu1 %vm1393_vm2, %v6768_v14  ;;  %5420 = vmatprep.subr.mxu1 %v6206_v1 }
0x13fa   : > { %5436 = vmatprep.mubr.msk.f32.mxu1 %vm6207_vm0, %v6206_v1 }
0x14b1   : > { %v3378_v50 = vpop.f32.mrf.mxu1 }
0x14b2   : > { %v3379_v52 = vadd.f32 %v4800_v48, %v3378_v50  ;;  %v4815_v48 = vld [vmem:[%s7360_s5 + $0x38] sm:$0xff]  ;;  %v4814_v50 = vld [vmem:[%s7360_s5 + $0x30] sm:$0xff] }
0x14b3   : > { %v5386_v54 = vpop.f32.mrf.mxu1  ;;  %5409 = vmatprep.subr.mxu0 %v4815_v48 }
0x14b4   : > { %v3382_v55 = vadd.f32 %v3379_v52, %v6986_v53  ;;  %v4813_v52 = vld [vmem:[%s7360_s5 + $0x28] sm:$0xff]  ;;  %v4812_v54 = vld [vmem:[%s7360_s5 + $0x20] sm:$0xff] }
0x14b6   : > { %v3383_v56 = vsel %vm1393_vm2, %v3382_v55, 0.0 }
0x14b7   : > { %3384 = vadd.xlane.f32.xlu1 %v3383_v56 }
0x14b9   : > { %v5408_v4 = vpop.f32.mrf.mxu1 }
0x14ba   : > { %v3595_v5 = vadd.f32 %v5408_v4, %v4824_v3 }
0x14bb   : > { %v3589_v6 = vpop.f32.mrf.mxu1 }
0x14bc   : > { %v3686_v7 = vmul.f32 %v3595_v5, %v6784_v26  ;;  %v3590_v8 = vadd.f32 %v4824_v3, %v3589_v6  ;;  %v3684_v20 = vmul.f32 %v3595_v5, %v6792_v36  ;;  %v3682_v22 = vmul.f32 %v3595_v5, %v6805_v41 }
0x14bd   : > { %v3680_v25 = vmul.f32 %v3595_v5, %v6817_v49 }
0x14be   : > { %5421 = vmatpush3.xpose.msk.msra.mxu1 %vm1393_vm2, %v3686_v7  ;;  %v3685_v9 = vmul.f32 %v3590_v8, %v6788_v33  ;;  %v3683_v21 = vmul.f32 %v3590_v8, %v6799_v39  ;;  %v3681_v24 = vmul.f32 %v3590_v8, %v6811_v47  ;;  %v3679_v27 = vmul.f32 %v3590_v8, %v6823_v51 }
0x14bf   : > { %5422 = vmatprep.subr.mxu1 %v6206_v1 }
0x14c2   : > { %5423 = vmatpush3.xpose.msk.msra.mxu1 %vm1393_vm2, %v3685_v9 }
0x14c3   : > { %5424 = vmatprep.subr.mxu1 %v6206_v1 }
0x14c6   : > { %5425 = vmatpush3.xpose.msk.msra.mxu1 %vm1393_vm2, %v3684_v20 }
0x14c7   : > { %5426 = vmatprep.subr.mxu1 %v6206_v1 }
0x14ca   : > { %5427 = vmatpush3.xpose.msk.msra.mxu1 %vm1393_vm2, %v3683_v21  ;;  %v4045_v21 = vld [vmem:[#allocation20 + $0x38] sm:$0xff] }
0x14cb   : > { %5428 = vmatprep.subr.mxu1 %v6206_v1 }
0x14ce   : > { %5429 = vmatpush3.xpose.msk.msra.mxu1 %vm1393_vm2, %v3682_v22  ;;  %v4044_v22 = vld [vmem:[#allocation20 + $0x30] sm:$0xff] }
0x14cf   : > { %5430 = vmatprep.subr.mxu1 %v6206_v1 }
0x14d2   : > { %5431 = vmatpush3.xpose.msk.msra.mxu1 %vm1393_vm2, %v3681_v24  ;;  %v4043_v24 = vld [vmem:[#allocation20 + $0x28] sm:$0xff] }
0x14d3   : > { %5432 = vmatprep.subr.mxu1 %v6206_v1 }
0x14d6   : > { %5433 = vmatpush3.xpose.msk.msra.mxu1 %vm1393_vm2, %v3680_v25  ;;  %v4042_v25 = vld [vmem:[#allocation20 + $0x20] sm:$0xff] }
0x14d7   : > { %5434 = vmatprep.subr.mxu1 %v6206_v1 }
0x14da   : > { %5435 = vmatpush3.xpose.msk.msra.mxu1 %vm1393_vm2, %v3679_v27  ;;  %v4853_v27 = vld [vmem:[%s7365_s10 + $0x78] sm:$0xff] }
0x14db   : > { %5477 = vmatprep.subr.mxu1 %v6206_v1 }
0x1540   : > { %v3385_v53 = vpop.xlane.xlu1 %3384 }
0x1541   : > { %v3386_v59 = vmul.f32 0.03125, %v3385_v53 }
0x1543   : > { %v3387_v58 = vsub.f32 %v3382_v55, %v3386_v59 }
0x1545   : > { %v3388_v60 = vmul.f32 %v3387_v58, %v3387_v58 }
0x1547   : > { %v3389_v62 = vsel %vm1393_vm2, %v3388_v60, 0.0  ;;  %v4817_v60 = vld [vmem:[%s7363_s4 + $0x20] sm:$0xff] }
0x1548   : > { %3390 = vadd.xlane.f32.xlu0 %v3389_v62 }
0x15d1   : > { %v3391_v61 = vpop.xlane.xlu0 %3390 }
0x15d2   : > { %v3392_v28 = vmul.f32 0.03125, %v3391_v61  ;;  %v4852_v61 = vld [vmem:[%s7365_s10 + $0x70] sm:$0xff] }
0x15d4   : > { %v3393_v30 = vadd.f32 1e-05, %v3392_v28  ;;  %v4851_v28 = vld [vmem:[%s7365_s10 + $0x68] sm:$0xff] }
0x15d6   : > { %5732 = vrsqrt.f32 %v3393_v30  ;;  %v4850_v30 = vld [vmem:[%s7365_s10 + $0x60] sm:$0xff] }
0x15e3   : > { %v5733_v23 = vpop.eup %5732 }
0x15e4   : > { %v3395_v32 = vmul.f32 %v5733_v23, %v3387_v58  ;;  %v4849_v23 = vld [vmem:[%s7365_s10 + $0x58] sm:$0xff] }
0x15e6   : > { %v3402_v35 = vmul.f32 %v7101_v29, %v3395_v32 }
0x15e8   : > { %v7108_v34 = vadd.f32 %v7104_v31, %v3402_v35 }
0x15ea   : > { %5396 = vmatmul.mubr.msk.f32.vlgmr.msra.gmra.mxu0 %vm1393_vm2, %v7108_v34 }
0x15eb   : > { %5417 = vmatprep.mubr.msk.f32.mxu0 %vm1393_vm2, %v6761_v11  ;;  %5410 = vmatpush3.msra.mxu0 %v4815_v48  ;;  %v4848_v48 = vld [vmem:[%s7365_s10 + $0x50] sm:$0xff] }
0x15ec   : > { %5411 = vmatprep.subr.mxu0 %v4814_v50 }
0x15ed   : > { %5412 = vmatpush3.msra.mxu0 %v4814_v50  ;;  %v4847_v50 = vld [vmem:[%s7365_s10 + $0x48] sm:$0xff] }
0x15ee   : > { %5413 = vmatprep.subr.mxu0 %v4813_v52 }
0x15ef   : > { %5414 = vmatpush3.msra.mxu0 %v4813_v52  ;;  %v4846_v52 = vld [vmem:[%s7365_s10 + $0x40] sm:$0xff] }
0x15f0   : > { %5415 = vmatprep.subr.mxu0 %v4812_v54 }
0x15f1   : > { %5416 = vmatpush3.msra.mxu0 %v4812_v54  ;;  %v4844_v54 = vld [vmem:[%s7367_s17 + $0x1] ss:$0 sm:$0xff] }
0x15f2   : > { %5418 = vmatmul.mubr.msk.f32.vlgmr.msra.gmra.mxu0 %vm1393_vm2, %v6768_v14  ;;  %5439 = vmatprep.subr.mxu0 %v6206_v1 }
0x15f3   : > { %5440 = vmatpush3.msra.mxu0 %v6859_v10  ;;  %5455 = vmatprep.mubr.msk.f32.mxu0 %vm6207_vm0, %v6206_v1 }
0x15f4   : > { %5441 = vmatprep.subr.mxu0 %v6206_v1 }
0x15f5   : > { %5442 = vmatpush3.msra.mxu0 %v6863_v12 }
0x15f6   : > { %5443 = vmatprep.subr.mxu0 %v6206_v1 }
0x15f7   : > { %5444 = vmatpush3.msra.mxu0 %v6867_v13 }
0x15f8   : > { %5445 = vmatprep.subr.mxu0 %v6206_v1 }
0x15f9   : > { %5446 = vmatpush3.msra.mxu0 %v6872_v15 }
0x15fa   : > { %5447 = vmatprep.subr.mxu0 %v6206_v1 }
0x15fb   : > { %5448 = vmatpush3.msra.mxu0 %v6877_v16 }
0x15fc   : > { %5449 = vmatprep.subr.mxu0 %v6206_v1 }
0x15fd   : > { %5450 = vmatpush3.msra.mxu0 %v6882_v17  ;;  %v4827_v17 = vld [vmem:[%s7362_s7 + $0x1] ss:$0 sm:$0xff] }
0x15fe   : > { %5451 = vmatprep.subr.mxu0 %v6206_v1 }
0x15ff   : > { %5452 = vmatpush3.msra.mxu0 %v6887_v18 }
0x1600   : > { %5453 = vmatprep.subr.mxu0 %v6206_v1 }
0x1601   : > { %5454 = vmatpush3.msra.mxu0 %v6892_v19 }
0x1602   : > { %5458 = vmatprep.subr.mxu0 %v6206_v1 }
0x16aa   : > { %v3513_v38 = vpop.f32.mrf.mxu0 }
0x16ab   : > { %v3514_v40 = vadd.f32 %v4822_v37, %v3513_v38 }
0x16ac   : > { %v5397_v46 = vpop.f32.mrf.mxu0 }
0x16ad   : > { %5437 = vmatmul.mubr.msk.f32.vlgmr.msra.gmra.mxu1 %vm1393_vm2, %v3514_v40 }
0x16ae   : > { %5485 = vmatprep.mubr.msk.f32.mxu1 %vm6207_vm0, %v6206_v1 }
0x16b2   : > { %v5419_v16 = vpop.f32.mrf.mxu0 }
0x16b3   : > { %v3676_v56 = vadd.f32 %v5419_v16, %v4827_v17 }
0x16b4   : > { %v3670_v55 = vpop.f32.mrf.mxu0 }
0x16b5   : > { %v3671_v18 = vadd.f32 %v4827_v17, %v3670_v55  ;;  %v3694_v57 = vmul.f32 %v3676_v56, %v6784_v26  ;;  %v3692_v43 = vmul.f32 %v3676_v56, %v6792_v36  ;;  %v3690_v26 = vmul.f32 %v3676_v56, %v6805_v41  ;;  %v4820_v41 = vld [vmem:[%s7363_s4 + $0x38] sm:$0xff] }
0x16b6   : > { %v3688_v36 = vmul.f32 %v3676_v56, %v6817_v49  ;;  %5478 = vmatpush3.msra.mxu1 %v4820_v41  ;;  %v4818_v49 = vld [vmem:[%s7363_s4 + $0x28] sm:$0xff] }
0x16b7   : > { %v3693_v19 = vmul.f32 %v3671_v18, %v6788_v33  ;;  %v3691_v44 = vmul.f32 %v3671_v18, %v6799_v39  ;;  %v3689_v33 = vmul.f32 %v3671_v18, %v6811_v47  ;;  %v3687_v39 = vmul.f32 %v3671_v18, %v6823_v51  ;;  %v4819_v47 = vld [vmem:[%s7363_s4 + $0x30] sm:$0xff]  ;;  %5479 = vmatprep.subr.mxu1 %v6206_v1 }
0x16b8   : > { %5480 = vmatpush3.msra.mxu1 %v4819_v47 }
0x16b9   : > { %5481 = vmatprep.subr.mxu1 %v6206_v1 }
0x16ba   : > { %5482 = vmatpush3.msra.mxu1 %v4818_v49 }
0x16bb   : > { %5483 = vmatprep.subr.mxu1 %v6206_v1 }
0x16bc   : > { %5484 = vmatpush3.msra.mxu1 %v4817_v60  ;;  %v4273_v60 = vld [vmem:[#allocation22 + $0x18] sm:$0xff] }
0x16bd   : > { %5499 = vmatprep.subr.mxu1 %v6206_v1 }
0x176d   : > { %v3788_v11 = vpop.f32.mrf.mxu1 }
0x176e   : > { %v3792_v14 = vsel %vm2354_vm3, %v3788_v11, -inf }
0x176f   : > { %3793 = vmax.xlane.f32.xlu1 %v3792_v14  ;;  %v5438_v10 = vpop.f32.mrf.mxu1 }
0x17f8   : > { %v3794_v12 = vpop.xlane.xlu1 %3793 }
0x17f9   : > { %v3795_v13 = vsub.f32 %v3788_v11, %v3794_v12 }
0x17fb   : > { %v3796_v15 = vmul.f32 1.442695, %v3795_v13  ;;  %v4855_v13 = vld [vmem:[%s7369_s9 + $0x1] ss:$0 sm:$0xff] }
0x17fd   : > { %5734 = vpow2.f32 %v3796_v15 }
0x180a   : > { %v5735_v42 = vpop.eup %5734 }
0x180b   : > { %5456 = vmatmul.mubr.msk.f32.vlgmr.msra.gmra.mxu0 %vm2354_vm3, %v5735_v42 }
0x180c   : > { %5459 = vmatpush3.msra.mxu0 %v3694_v57  ;;  %5474 = vmatprep.mubr.msk.f32.mxu0 %vm6207_vm0, %v6206_v1 }
0x180d   : > { %5460 = vmatprep.subr.mxu0 %v6206_v1 }
0x180e   : > { %5461 = vmatpush3.msra.mxu0 %v3693_v19 }
0x180f   : > { %5462 = vmatprep.subr.mxu0 %v6206_v1 }
0x1810   : > { %5463 = vmatpush3.msra.mxu0 %v3692_v43 }
0x1811   : > { %5464 = vmatprep.subr.mxu0 %v6206_v1 }
0x1812   : > { %5465 = vmatpush3.msra.mxu0 %v3691_v44 }
0x1813   : > { %5466 = vmatprep.subr.mxu0 %v6206_v1 }
0x1814   : > { %5467 = vmatpush3.msra.mxu0 %v3690_v26 }
0x1815   : > { %5468 = vmatprep.subr.mxu0 %v6206_v1 }
0x1816   : > { %5469 = vmatpush3.msra.mxu0 %v3689_v33 }
0x1817   : > { %5470 = vmatprep.subr.mxu0 %v6206_v1 }
0x1818   : > { %5471 = vmatpush3.msra.mxu0 %v3688_v36 }
0x1819   : > { %5472 = vmatprep.subr.mxu0 %v6206_v1 }
0x181a   : > { %5473 = vmatpush3.msra.mxu0 %v3687_v39 }
0x181b   : > { %5488 = vmatprep.subr.mxu0 %v6206_v1 }
0x18cb   : > { %v3867_v51 = vpop.f32.mrf.mxu0 }
0x18cc   : > { %5736 = vrcp.f32 %v3867_v51  ;;  %v4277_v51 = vld [vmem:[#allocation22 + $0x38] sm:$0xff] }
0x18cd   : > { %v5457_v53 = vpop.f32.mrf.mxu0 }
0x18ce   : > { %v4276_v53 = vld [vmem:[#allocation22 + $0x30] sm:$0xff] }
0x18d9   : > { %v5737_v59 = vpop.eup %5736 }
0x18da   : > { %v3872_v58 = vmul.f32 %v5737_v59, %v5735_v42  ;;  %v4275_v59 = vld [vmem:[#allocation22 + $0x28] sm:$0xff] }
0x18dc   : > { %5475 = vmatmul.mubr.msk.f32.vlgmr.msra.gmra.mxu0 %vm2354_vm3, %v3872_v58  ;;  %v4274_v58 = vld [vmem:[#allocation22 + $0x20] sm:$0xff] }
0x18dd   : > { %5496 = vmatprep.mubr.msk.f32.mxu0 %vm6207_vm0, %v6206_v1  ;;  %5489 = vmatpush3.msra.mxu0 %v4045_v21 }
0x18de   : > { %5490 = vmatprep.subr.mxu0 %v6206_v1 }
0x18df   : > { %5491 = vmatpush3.msra.mxu0 %v4044_v22 }
0x18e0   : > { %5492 = vmatprep.subr.mxu0 %v6206_v1 }
0x18e1   : > { %5493 = vmatpush3.msra.mxu0 %v4043_v24 }
0x18e2   : > { %5494 = vmatprep.subr.mxu0 %v6206_v1 }
0x18e3   : > { %5495 = vmatpush3.msra.mxu0 %v4042_v25 }
0x18e4   : > { %4317 = vmatprep.subr.mxu0 %v4277_v51  ;;  %v4369_v51 = vld [vmem:[%s6376_s8 + $0x18] sm:$0xff] }
0x199c   : > { %v3942_v62 = vpop.f32.mrf.mxu0 }
0x199d   : > { %5486 = vmatmul.mubr.msk.f32.vlgmr.msra.gmra.mxu1 %vm1393_vm2, %v3942_v62  ;;  %v4272_v62 = vld [vmem:[#allocation22 + $0x10] sm:$0xff] }
0x199e   : > { %v5476_v63 = vpop.f32.mrf.mxu0  ;;  %5515 = vmatprep.mubr.msk.f32.mxu1 %vm6207_vm0, %v6206_v1  ;;  %5500 = vmatpush3.msra.mxu1 %v4853_v27 }
0x199f   : > { %5501 = vmatprep.subr.mxu1 %v6206_v1  ;;  %v4271_v63 = vld [vmem:[#allocation22 + $0x8] sm:$0xff] }
0x19a0   : > { %5502 = vmatpush3.msra.mxu1 %v4852_v61 }
0x19a1   : > { %5503 = vmatprep.subr.mxu1 %v6206_v1 }
0x19a2   : > { %5504 = vmatpush3.msra.mxu1 %v4851_v28 }
0x19a3   : > { %5505 = vmatprep.subr.mxu1 %v6206_v1 }
0x19a4   : > { %5506 = vmatpush3.msra.mxu1 %v4850_v30 }
0x19a5   : > { %5507 = vmatprep.subr.mxu1 %v6206_v1 }
0x19a6   : > { %5508 = vmatpush3.msra.mxu1 %v4849_v23 }
0x19a7   : > { %5509 = vmatprep.subr.mxu1 %v6206_v1 }
0x19a8   : > { %5510 = vmatpush3.msra.mxu1 %v4848_v48 }
0x19a9   : > { %5511 = vmatprep.subr.mxu1 %v6206_v1 }
0x19aa   : > { %5512 = vmatpush3.msra.mxu1 %v4847_v50 }
0x19ab   : > { %5513 = vmatprep.subr.mxu1 %v6206_v1 }
0x19ac   : > { %5514 = vmatpush3.msra.mxu1 %v4846_v52 }
0x1a5d   : > { %v4021_v45 = vpop.f32.mrf.mxu1 }
0x1a5e   : > { %v4022_v2 = vadd.f32 %v4841_v0, %v4021_v45 }
0x1a5f   : > { %v5487_v3 = vpop.f32.mrf.mxu1 }
0x1a60   : > { %v4025_v4 = vadd.f32 %v4022_v2, %v7108_v34 }
0x1a62   : > { %v4026_v5 = vsel %vm1393_vm2, %v4025_v4, 0.0 }
0x1a63   : > { %4027 = vadd.xlane.f32.xlu0 %v4026_v5 }
0x1aec   : > { %v4028_v6 = vpop.xlane.xlu0 %4027 }
0x1aed   : > { %v4029_v7 = vmul.f32 0.03125, %v4028_v6 }
0x1aef   : > { %v4030_v8 = vsub.f32 %v4025_v4, %v4029_v7 }
0x1af1   : > { %v4031_v9 = vmul.f32 %v4030_v8, %v4030_v8 }
0x1af3   : > { %v4032_v20 = vsel %vm1393_vm2, %v4031_v9, 0.0 }
0x1af4   : > { %4033 = vadd.xlane.f32.xlu1 %v4032_v20 }
0x1b7d   : > { %v4034_v32 = vpop.xlane.xlu1 %4033 }
0x1b7e   : > { %v4035_v35 = vmul.f32 0.03125, %v4034_v32 }
0x1b80   : > { %v4036_v34 = vadd.f32 1e-05, %v4035_v35 }
0x1b82   : > { %5738 = vrsqrt.f32 %v4036_v34 }
0x1b8f   : > { %v5739_v37 = vpop.eup %5738 }
0x1b90   : > { %v4038_v38 = vmul.f32 %v5739_v37, %v4030_v8 }
0x1b92   : > { %v4039_v40 = vmul.f32 %v7101_v29, %v4038_v38 }
0x1b94   : > { %v4040_v46 = vadd.f32 %v7104_v31, %v4039_v40 }
0x1b96   : > { %5497 = vmatmul.mubr.msk.f32.vlgmr.msra.gmra.mxu0 %vm1393_vm2, %v4040_v46 }
0x1b97   : > { %4357 = vmatprep.mubr.f32.mxu0 %v6206_v1  ;;  %4318 = vmatpush1.msra.mxu0 %v4276_v53  ;;  %v4384_v53 = vld [vmem:[%s6376_s8 + $0x90] sm:$0xff] }
0x1b98   : > { %4319 = vmatprep.subr.mxu0 %v4275_v59  ;;  %v4368_v59 = vld [vmem:[%s6376_s8 + $0x10] sm:$0xff] }
0x1b99   : > { %4320 = vmatpush1.msra.mxu0 %v4274_v58  ;;  %v4383_v58 = vld [vmem:[%s6376_s8 + $0x88] sm:$0xff] }
0x1b9a   : > { %4321 = vmatprep.subr.mxu0 %v4273_v60  ;;  %v4367_v60 = vld [vmem:[%s6376_s8 + $0x8] sm:$0xff] }
0x1b9b   : > { %4322 = vmatpush1.msra.mxu0 %v4272_v62  ;;  %v4382_v62 = vld [vmem:[%s6376_s8 + $0x80] sm:$0xff] }
0x1b9c   : > { %4323 = vmatprep.subr.mxu0 %v4271_v63  ;;  %v4366_v63 = vld [vmem:[%s6376_s8] sm:$0xff] }
0x1c56   : > { %v4123_v11 = vpop.f32.mrf.mxu0 }
0x1c57   : > { %v4124_v14 = vadd.f32 %v4844_v54, %v4123_v11  ;;  %v4381_v11 = vld [vmem:[%s6376_s8 + $0x78] sm:$0xff] }
0x1c58   : > { %v5498_v10 = vpop.f32.mrf.mxu0 }
0x1c59   : > { %v4127_v12 = vmax.f32 %v4124_v14, 0.0  ;;  %v4396_v14 = vld [vmem:[%s6376_s8 + $0xf0] sm:$0xff] }
0x1c5a   : > { %v4380_v10 = vld [vmem:[%s6376_s8 + $0x70] sm:$0xff] }
0x1c5b   : > { %5516 = vmatmul.mubr.msk.f32.vlgmr.msra.gmra.mxu1 %vm2354_vm3, %v4127_v12  ;;  %v4395_v12 = vld [vmem:[%s6376_s8 + $0xe8] sm:$0xff] }
0x1d1b   : > { %v4214_v15 = vpop.f32.mrf.mxu1 }
0x1d1c   : > { %v4215_v16 = vadd.f32 %v4855_v13, %v4214_v15  ;;  %v4379_v13 = vld [vmem:[%s6376_s8 + $0x68] sm:$0xff]  ;;  %v4394_v15 = vld [vmem:[%s6376_s8 + $0xe0] sm:$0xff] }
0x1d1d   : > { %v5517_v17 = vpop.f32.mrf.mxu1 }
0x1d1e   : > { %v4218_v55 = vadd.f32 %v4215_v16, %v4040_v46  ;;  %v4378_v16 = vld [vmem:[%s6376_s8 + $0x60] sm:$0xff]  ;;  %v4393_v17 = vld [vmem:[%s6376_s8 + $0xd8] sm:$0xff] }
0x1d20   : > { %v4219_v56 = vsel %vm1393_vm2, %v4218_v55, 0.0 }
0x1d21   : > { %4220 = vadd.xlane.f32.xlu0 %v4219_v56  ;;  %v4392_v56 = vld [vmem:[%s6376_s8 + $0xd0] sm:$0xff] }
0x1daa   : > { %v4221_v18 = vpop.xlane.xlu0 %4220 }
0x1dab   : > { %v4222_v57 = vmul.f32 0.03125, %v4221_v18  ;;  %v4376_v18 = vld [vmem:[%s6376_s8 + $0x50] sm:$0xff] }
0x1dad   : > { %v4223_v42 = vsub.f32 %v4218_v55, %v4222_v57  ;;  %v4377_v55 = vld [vmem:[%s6376_s8 + $0x58] sm:$0xff]  ;;  %v4391_v57 = vld [vmem:[%s6376_s8 + $0xc8] sm:$0xff] }
0x1daf   : > { %v4224_v1 = vmul.f32 %v4223_v42, %v4223_v42 }
0x1db1   : > { %v4225_v19 = vsel %vm1393_vm2, %v4224_v1, 0.0  ;;  %v4390_v1 = vld [vmem:[%s6376_s8 + $0xc0] sm:$0xff] }
0x1db2   : > { %4226 = vadd.xlane.f32.xlu1 %v4225_v19  ;;  %v4374_v19 = vld [vmem:[%s6376_s8 + $0x40] sm:$0xff] }
0x1e3b   : > { %v4227_v43 = vpop.xlane.xlu1 %4226 }
0x1e3c   : > { %v4228_v44 = vmul.f32 0.03125, %v4227_v43  ;;  %v4389_v43 = vld [vmem:[%s6376_s8 + $0xb8] sm:$0xff] }
0x1e3e   : > { %v4229_v26 = vadd.f32 1e-05, %v4228_v44  ;;  %v4373_v44 = vld [vmem:[%s6376_s8 + $0x38] sm:$0xff] }
0x1e40   : > { %5740 = vrsqrt.f32 %v4229_v26  ;;  %v4388_v26 = vld [vmem:[%s6376_s8 + $0xb0] sm:$0xff] }
0x1e4d   : > { %v5741_v33 = vpop.eup %5740 }
0x1e4e   : > { %v4231_v36 = vmul.f32 %v5741_v33, %v4223_v42  ;;  %v4375_v42 = vld [vmem:[%s6376_s8 + $0x48] sm:$0xff]  ;;  %v4372_v33 = vld [vmem:[%s6376_s8 + $0x30] sm:$0xff] }
0x1e50   : > { %v4232_v39 = vmul.f32 %v7101_v29, %v4231_v36  ;;  %v4270_v29 = vld [vmem:[#allocation22] sm:$0xff] }
0x1e51   : > { %4324 = vmatpush1.msra.mxu0 %v4270_v29  ;;  %v4387_v36 = vld [vmem:[%s6376_s8 + $0xa8] sm:$0xff]  ;;  %v4280_v29 = vlaneseq }
0x1e52   : > { %v4233_v41 = vadd.f32 %v7104_v31, %v4232_v39  ;;  %v4397_v31 = vld [vmem:[%s6376_s8 + $0xf8] sm:$0xff]  ;;  %v4371_v39 = vld [vmem:[%s6376_s8 + $0x28] sm:$0xff] }
0x1e53   : > { %5060 = vmatprep.subr.mxu0 %v4397_v31  ;;  %v4281_v31 = vshrl.u32 %v4280_v29, 7 }
0x1e54   : > { %v4234_v47 = vmul.f32 %v4233_v41, %v4233_v41 }
0x1e56   : > { %v4235_v49 = vsel %vm1393_vm2, %v4234_v47, 0.0  ;;  %v4370_v47 = vld [vmem:[%s6376_s8 + $0x20] sm:$0xff] }
0x1e57   : > { %4236 = vadd.xlane.f32.xlu0 %v4235_v49  ;;  %v4385_v49 = vld [vmem:[%s6376_s8 + $0x98] sm:$0xff] }
0x1ee0   : > { %v4237_v0 = vpop.xlane.xlu0 %4236 }
0x1ee1   : > { %5742 = vrsqrt.f32 %v4237_v0  ;;  %vm4240_vm4 = vcmp.eq.f32.partialorder %v4237_v0, inf  ;;  %v4243_v3 = vand.u32 2147483648, %v4237_v0  ;;  %vm4242_vm5 = vcmp.eq.f32.partialorder %v4237_v0, 0.0 }
0x1eee   : > { %v5743_v45 = vpop.eup %5742 }
0x1eef   : > { %v4239_v2 = vmul.f32 %v5743_v45, %v4237_v0  ;;  %v4278_v45 = vld [vmem:[%s6371_s27] sm:$0x3] }
0x1ef1   : > { %v4241_v4 = vsel %vm4240_vm4, %v4237_v0, %v4239_v2  ;;  %v4282_v0 = vsub.s32 0, %v4281_v31  ;;  %v4286_v2 = vsub.s32 1, %v4281_v31 }
0x1ef2   : > { %v4244_v5 = vsel %vm4242_vm5, %v4243_v3, %v4241_v4 }
0x1ef3   : > { %v4245_v6 = vrot.slane %v4244_v5, 4  ;;  %v4283_v3 = vrot.slane %v4278_v45, %v4282_v0  ;;  %v4287_v4 = vrot.slane %v4278_v45, %v4286_v2 }
0x1ef5   : > { %v4246_v7 = vmax.f32 %v4244_v5, %v4245_v6 }
0x1ef7   : > { %v4247_v8 = vrot.slane %v4246_v7, 2 }
0x1ef9   : > { %v4248_v9 = vmax.f32 %v4246_v7, %v4247_v8 }
0x1efb   : > { %v4249_v20 = vrot.slane %v4248_v9, 1 }
0x1efd   : > { %v4250_v21 = vmax.f32 %v4248_v9, %v4249_v20 }
0x1eff   : > { %v4251_v22 = vsub.f32 %v4244_v5, %v4250_v21 }
0x1f01   : > { %v4252_v24 = vmul.f32 1.442695, %v4251_v22  ;;  %v4398_v22 = vld [vmem:[#allocation2] sm:$0x1] }
0x1f03   : > { %5744 = vpow2.f32 %v4252_v24 }
0x1f10   : > { %v5745_v25 = vpop.eup %5744 }
0x1f11   : > { %v4254_v27 = vrot.slane %v5745_v25, 4 }
0x1f13   : > { %v4255_v61 = vadd.f32 %v5745_v25, %v4254_v27 }
0x1f15   : > { %v4256_v28 = vrot.slane %v4255_v61, 2 }
0x1f17   : > { %v4257_v30 = vadd.f32 %v4256_v28, %v4255_v61 }
0x1f19   : > { %v4258_v23 = vrot.slane %v4257_v30, 1 }
0x1f1b   : > { %v4259_v32 = vadd.f32 %v4258_v23, %v4257_v30 }
0x1f1d   : > { %5746 = vrcp.f32 %v4259_v32 }
0x1f2a   : > { %v5747_v35 = vpop.eup %5746 }
0x1f2b   : > { %v4261_v34 = vmul.f32 %v5747_v35, %v5745_v25 }
0x1f2d   : > { %v4262_v37 = vmul.f32 %v4261_v34, %v4233_v41  ;;  %v4386_v41 = vld [vmem:[%s6376_s8 + $0xa0] sm:$0xff] }
0x1f2f   : > { %v4263_v38 = vsel %vm1393_vm2, %v4262_v37, 0.0 }
0x1f30   : > { %v4264_v40 = vrot.slane %v4263_v38, 4 }
0x1f32   : > { %v4265_v46 = vadd.f32 %v4264_v40, %v4263_v38 }
0x1f34   : > { %v4266_v48 = vrot.slane %v4265_v46, 2 }
0x1f36   : > { %v4267_v50 = vadd.f32 %v4266_v48, %v4265_v46 }
0x1f38   : > { %v4268_v52 = vrot.slane %v4267_v50, 1 }
0x1f3a   : > { %v4269_v54 = vadd.f32 %v4268_v52, %v4267_v50 }
0x1f3c   : > { %4857 = vmatmul.mubr.msk.f32.vlgmr.msra.gmra.mxu0 %vm1393_vm2, %v4269_v54 }
0x1f3d   : > { %5061 = vmatpush3.msra.mxu0 %v4381_v11 }
0x1f3e   : > { %5062 = vmatprep.subr.mxu0 %v4396_v14 }
0x1f3f   : > { %5063 = vmatpush3.msra.mxu0 %v4380_v10 }
0x1f40   : > { %5064 = vmatprep.subr.mxu0 %v4395_v12 }
0x1f41   : > { %5065 = vmatpush3.msra.mxu0 %v4379_v13 }
0x1f42   : > { %5066 = vmatprep.subr.mxu0 %v4394_v15 }
0x1f43   : > { %5067 = vmatpush3.msra.mxu0 %v4378_v16 }
0x1f44   : > { %5068 = vmatprep.subr.mxu0 %v4393_v17 }
0x1f45   : > { %5069 = vmatpush3.msra.mxu0 %v4377_v55 }
0x1f46   : > { %5070 = vmatprep.subr.mxu0 %v4392_v56 }
0x1f47   : > { %5071 = vmatpush3.msra.mxu0 %v4376_v18 }
0x1f48   : > { %5072 = vmatprep.subr.mxu0 %v4391_v57 }
0x1f49   : > { %5073 = vmatpush3.msra.mxu0 %v4375_v42 }
0x1f4a   : > { %5074 = vmatprep.subr.mxu0 %v4390_v1 }
0x1f4b   : > { %5075 = vmatpush3.msra.mxu0 %v4374_v19 }
0x1f4c   : > { %5076 = vmatprep.subr.mxu0 %v4389_v43 }
0x1f4d   : > { %5077 = vmatpush3.msra.mxu0 %v4373_v44 }
0x1f4e   : > { %5078 = vmatprep.subr.mxu0 %v4388_v26 }
0x1f4f   : > { %5079 = vmatpush3.msra.mxu0 %v4372_v33 }
0x1f50   : > { %5080 = vmatprep.subr.mxu0 %v4387_v36 }
0x1f51   : > { %5081 = vmatpush3.msra.mxu0 %v4371_v39 }
0x1f52   : > { %5082 = vmatprep.subr.mxu0 %v4386_v41 }
0x1f53   : > { %5083 = vmatpush3.msra.mxu0 %v4370_v47 }
0x1f54   : > { %5084 = vmatprep.subr.mxu0 %v4385_v49 }
0x1f55   : > { %5085 = vmatpush3.msra.mxu0 %v4369_v51 }
0x1f56   : > { %5086 = vmatprep.subr.mxu0 %v4384_v53 }
0x1f57   : > { %5087 = vmatpush3.msra.mxu0 %v4368_v59 }
0x1f58   : > { %5088 = vmatprep.subr.mxu0 %v4383_v58 }
0x1f59   : > { %5089 = vmatpush3.msra.mxu0 %v4367_v60 }
0x1f5a   : > { %5090 = vmatprep.subr.mxu0 %v4382_v62 }
0x1f5b   : > { %5091 = vmatpush3.msra.mxu0 %v4366_v63 }
0x1ffc   : > { %v4359_v5 = vpop.f32.mrf.mxu0 }
0x1ffd   : > { %v4360_v6 = vadd.f32 %v4359_v5, %v4283_v3 }
0x1ffe   : > { %v4361_v7 = vpop.f32.mrf.mxu0 }
0x1fff   : > { %v4362_v8 = vadd.f32 %v4361_v7, %v4287_v4  ;;  %v4364_v20 = vmax.f32 %v4360_v6, 0.0 }
0x2001   : > { %v4365_v9 = vmax.f32 %v4362_v8, 0.0 }
0x2003   : > { %4463 = vmatprep.mubr.f32.mxu0 %v4365_v9 }
0x2004   : > { %4464 = vmatmul.mubr.f32.vlgmr.msra.gmra.mxu0 %v4364_v20 }
0x20c4   : > { %v5092_v21 = vpop.f32.mrf.mxu0 }
0x20c6   : > { %v5093_v24 = vpop.f32.mrf.mxu0 }
0x20c7   : > { %v5094_v25 = vadd.f32 %v5093_v24, %v5092_v21 }
0x20c9   : > { %v4466_v27 = vadd.f32 %v5094_v25, %v4398_v22 }
0x20cb   : > { %4470 = vst.msk [vmem:[%s1254_s22] sm:$0x1] %vm4469_vm6, %v4466_v27 }
0x20cc PF: > { %p89_p10 = scmp.ge.s32.totalorder %s6529_s11, 4   ;;  %s7371_s15 = smov %s6144_s16 }
0x20cd   : > { %s7372_s16 = smov %s6148_s18  ;;  %s7373_s18 = smov %s6541_s1 }
0x20ce   : > { %s7374_s22 = smov %s6529_s11  ;;  %91 = sbr.rel (!%p89_p10) target bundleno = 81 (0x51), region = 309 }
0x20d3   :  { %4488 = vsyncpa [#allocation4], 1 }
0x20d4   :  { %4490 = vsyncpa [#allocation4 + $0x1], 1 }
0x20d5   :  { %4491 = vsyncpa [#allocation6], 1 }
0x20d6   :  { %4493 = vsyncpa [#allocation6 + $0x1], 1 }
0x20d7   :  { %4494 = vsyncpa [#allocation9], 1 }
0x20d8   :  { %4495 = vsyncpa [#allocation12], 1 }
0x20d9   :  { %4496 = vsyncpa [#allocation15], 1 }
0x20da   :  { %4497 = vsyncpa [#allocation18], 1 }
0x20db   :  { %4498 = vsyncpa [#allocation21], 1 }

</bundles_post_ra>
